<compile_context>
chip_gen: v6e
topology: v6e:2x2x1
jax: 0.10.0
libtpu: 0.0.40
codegen_flags: <defaults>
</compile_context>

<pallas_src>
import functools

import jax
import jax.numpy as jnp
from jax.experimental import pallas as pl
from jax.experimental.pallas import tpu as pltpu


# ----------------------------- small trace-time helpers -----------------------------

def _largest_divisor(n, cap):
    """Largest divisor of n that is <= cap (>= 1)."""
    cap = max(1, min(cap, n))
    for t in range(cap, 0, -1):
        if n % t == 0:
            return t
    return 1


def _row_tile(m, cap=1024):
    """Largest divisor of m that is a multiple of 8 and <= cap; fall back to full m."""
    t = cap - (cap % 8)
    while t >= 8:
        if m % t == 0:
            return t
        t -= 8
    return m


# ----------------------------- Pallas kernels -----------------------------

def _matmul_bias_kernel(x_ref, w_ref, b_ref, o_ref):
    # o = x @ w + b   (whole K and N resident; grid only over M row-tiles)
    o_ref[...] = (jnp.dot(x_ref[...], w_ref[...],
                          preferred_element_type=jnp.float32)
                  + b_ref[...]).astype(o_ref.dtype)


def _conv_tap_kernel(x_ref, w_ref, y_ref, s_ref, sq_ref, acc_ref, *, H, W):
    """One (n, d, kd) grid step of the 3x3x3 conv.

    x_ref:  (1, 1, H+2, W+2, Cin)  padded depth-slice d+kd of the input
    w_ref:  (27, Cin, Cout)        all tap weights, resident across the grid
    y_ref:  (1, 1, H*W, Cout)      conv output slab for (n, d)
    s_ref / sq_ref: (1, Cout)      per-channel sum / sum-of-squares accumulators (resident)
    acc_ref: VMEM (H*W, Cout) f32  slab accumulator across the kd reduction axis
    """
    n = pl.program_id(0)
    d = pl.program_id(1)
    kd = pl.program_id(2)

    @pl.when((n == 0) & (d == 0) & (kd == 0))
    def _init_stats():
        s_ref[...] = jnp.zeros_like(s_ref)
        sq_ref[...] = jnp.zeros_like(sq_ref)

    @pl.when(kd == 0)
    def _init_acc():
        acc_ref[...] = jnp.zeros_like(acc_ref)

    acc = acc_ref[...]
    for j in range(9):                                   # unrolled (kh, kw) taps
        kh, kw = j // 3, j % 3
        xs = x_ref[0, 0, kh:kh + H, kw:kw + W, :]        # (H, W, Cin) shifted window
        xs = xs.reshape(H * W, xs.shape[-1])             # layout-trivial merge into sublanes
        wt = w_ref[kd * 9 + j]                           # (Cin, Cout) tap weight
        acc = acc + jnp.dot(xs, wt, preferred_element_type=jnp.float32)
    acc_ref[...] = acc

    @pl.when(kd == pl.num_programs(2) - 1)
    def _finalize():
        y_ref[0, 0, :, :] = acc
        s_ref[...] += jnp.sum(acc, axis=0, keepdims=True)
        sq_ref[...] += jnp.sum(acc * acc, axis=0, keepdims=True)


def _bn_relu_kernel(x_ref, scale_ref, shift_ref, o_ref):
    y = x_ref[...] * scale_ref[...] + shift_ref[...]
    o_ref[...] = jnp.maximum(y, 0.0).astype(o_ref.dtype)


# ----------------------------- layer wrappers -----------------------------

def conv_transpose3d_k2s2(x_cl, w, b):
    """ConvTranspose3d(kernel=2, stride=2, pad=0).
    x_cl: (N, D, H, W, Cin);  w: (Cin, Cout, 2, 2, 2) (PyTorch layout);  b: (Cout,)."""
    N, D, H, W, Cin = x_cl.shape
    Cout = w.shape[1]
    M = N * D * H * W
    X = x_cl.reshape(M, Cin)
    # columns ordered (kd, kh, kw, cout)
    Wm = jnp.transpose(w, (0, 2, 3, 4, 1)).reshape(Cin, 8 * Cout)
    bm = jnp.tile(b, 8).reshape(1, 8 * Cout)
    tm = _row_tile(M)
    y = pl.pallas_call(
        _matmul_bias_kernel,
        out_shape=jax.ShapeDtypeStruct((M, 8 * Cout), jnp.float32),
        grid=(M // tm,),
        in_specs=[pl.BlockSpec((tm, Cin), lambda i: (i, 0)),
                  pl.BlockSpec((Cin, 8 * Cout), lambda i: (0, 0)),
                  pl.BlockSpec((1, 8 * Cout), lambda i: (0, 0))],
        out_specs=pl.BlockSpec((tm, 8 * Cout), lambda i: (i, 0)),
        compiler_params=pltpu.CompilerParams(
            dimension_semantics=("parallel",)),
    )(X, Wm, bm)
    # TODO(synk): the 2x2x2 interleave below is an XLA transpose; it could be folded into the
    # next conv's window gather (or an output-scatter BlockSpec) to save one HBM round trip,
    # but XLA already fuses it with the pad+concat that follows.
    y = y.reshape(N, D, H, W, 2, 2, 2, Cout)
    y = jnp.transpose(y, (0, 1, 4, 2, 5, 3, 6, 7))
    return y.reshape(N, 2 * D, 2 * H, 2 * W, Cout)


def conv_bn_relu_3d(x_cl, w, gamma, beta, eps=1e-5):
    """Conv3d(3x3x3, pad=1, bias=False) + BatchNorm3d (training-mode batch stats) + ReLU.
    x_cl: (N, D, H, W, Cin);  w: (Cout, Cin, 3, 3, 3) (PyTorch layout)."""
    N, D, H, W, Cin = x_cl.shape
    Cout = w.shape[0]
    x_pad = jnp.pad(x_cl, ((0, 0), (1, 1), (1, 1), (1, 1), (0, 0)))
    # tap-major weight: (27, Cin, Cout), tap t = kd*9 + kh*3 + kw
    w_taps = jnp.transpose(w, (2, 3, 4, 1, 0)).reshape(27, Cin, Cout)

    kernel = functools.partial(_conv_tap_kernel, H=H, W=W)
    y, s, sq = pl.pallas_call(
        kernel,
        out_shape=(jax.ShapeDtypeStruct((N, D, H * W, Cout), jnp.float32),
                   jax.ShapeDtypeStruct((1, Cout), jnp.float32),
                   jax.ShapeDtypeStruct((1, Cout), jnp.float32)),
        grid=(N, D, 3),                               # kd reduction axis last
        in_specs=[
            pl.BlockSpec((1, 1, H + 2, W + 2, Cin),
                         lambda n, d, kd: (n, d + kd, 0, 0, 0)),
            pl.BlockSpec((27, Cin, Cout), lambda n, d, kd: (0, 0, 0)),
        ],
        out_specs=(
            pl.BlockSpec((1, 1, H * W, Cout), lambda n, d, kd: (n, d, 0, 0)),
            pl.BlockSpec((1, Cout), lambda n, d, kd: (0, 0)),
            pl.BlockSpec((1, Cout), lambda n, d, kd: (0, 0)),
        ),
        scratch_shapes=[pltpu.VMEM((H * W, Cout), jnp.float32)],
        compiler_params=pltpu.CompilerParams(
            # stats accumulate across every grid axis -> all axes must be sequential
            dimension_semantics=("arbitrary", "arbitrary", "arbitrary")),
    )(x_pad, w_taps)

    # BatchNorm3d (training mode): biased batch mean/var over (N, D, H, W).
    # TODO(synk): running_mean/running_var buffers are not updated (does not affect the
    # train-mode forward output).
    count = float(N * D * H * W)
    mean = s / count
    var = jnp.maximum(sq / count - mean * mean, 0.0)   # clamp E[x^2]-E[x]^2 cancellation
    scale = gamma.reshape(1, -1) / jnp.sqrt(var + eps)
    shift = beta.reshape(1, -1) - mean * scale

    # normalize + ReLU in one pass over large blocks
    ND, HW = N * D, H * W
    y3 = y.reshape(ND, HW, Cout)
    blk = _largest_divisor(ND, max(1, (4 << 20) // max(1, HW * Cout * 4)))
    y3 = pl.pallas_call(
        _bn_relu_kernel,
        out_shape=jax.ShapeDtypeStruct((ND, HW, Cout), jnp.float32),
        grid=(ND // blk,),
        in_specs=[pl.BlockSpec((blk, HW, Cout), lambda i: (i, 0, 0)),
                  pl.BlockSpec((1, 1, Cout), lambda i: (0, 0, 0)),
                  pl.BlockSpec((1, 1, Cout), lambda i: (0, 0, 0))],
        out_specs=pl.BlockSpec((blk, HW, Cout), lambda i: (i, 0, 0)),
        compiler_params=pltpu.CompilerParams(
            dimension_semantics=("parallel",)),
    )(y3, scale.reshape(1, 1, Cout), shift.reshape(1, 1, Cout))
    return y3.reshape(N, D, H, W, Cout)


@jax.jit
def decoder_block_3d(x_ncdhw, skip_ncdhw, params):
    """Forward of DecoderBlock3d.  Inputs/outputs are NCDHW like PyTorch."""
    x = jnp.transpose(x_ncdhw, (0, 2, 3, 4, 1))               # -> NDHWC
    x = conv_transpose3d_k2s2(x, params["w_up"], params["b_up"])
    if skip_ncdhw is not None:
        skip = jnp.transpose(skip_ncdhw, (0, 2, 3, 4, 1))
        # TODO(synk): trilinear F.interpolate fallback for mismatched spatial shapes not
        # implemented (the k=2,s=2 upsample matches the skip resolution in this setup).
        x = jnp.concatenate([x, skip], axis=-1)                # cat on channel axis
    x = conv_bn_relu_3d(x, params["w1"], params["g1"], params["be1"])
    x = conv_bn_relu_3d(x, params["w2"], params["g2"], params["be2"])
    return jnp.transpose(x, (0, 4, 1, 2, 3))                   # -> NCDHW


# ----------------------------- parameter init -----------------------------

def init_params(in_channels, skip_channels, out_channels, key):
    ks = jax.random.split(key, 4)
    tot = out_channels + skip_channels
    return dict(
        # ConvTranspose3d(in, out, k=2, s=2): weight (Cin, Cout, 2,2,2), bias (Cout,)
        w_up=jax.random.normal(ks[0], (in_channels, out_channels, 2, 2, 2), jnp.float32) * 0.1,
        b_up=jax.random.normal(ks[1], (out_channels,), jnp.float32) * 0.1,
        # Conv3d(tot, out, 3, pad=1, bias=False): weight (Cout, Cin, 3,3,3)
        w1=jax.random.normal(ks[2], (out_channels, tot, 3, 3, 3), jnp.float32) * 0.05,
        g1=jnp.ones((out_channels,), jnp.float32),    # BatchNorm3d default gamma
        be1=jnp.zeros((out_channels,), jnp.float32),  # BatchNorm3d default beta
        w2=jax.random.normal(ks[3], (out_channels, out_channels, 3, 3, 3), jnp.float32) * 0.05,
        g2=jnp.ones((out_channels,), jnp.float32),
        be2=jnp.zeros((out_channels,), jnp.float32),
    )


if __name__ == "__main__":
    in_channels, skip_channels, out_channels = 8, 6, 8
    N, D, H, W = 2, 4, 4, 4                       # low-res input; upsample doubles spatial dims

    key = jax.random.PRNGKey(0)
    kx, ks, kp = jax.random.split(key, 3)
    x = jax.random.normal(kx, (N, in_channels, D, H, W), jnp.float32)
    skip = jax.random.normal(ks, (N, skip_channels, 2 * D, 2 * H, 2 * W), jnp.float32)
    params = init_params(in_channels, skip_channels, out_channels, kp)

    out = decoder_block_3d(x, skip, params)
    out = jax.block_until_ready(out)

    assert out.shape == (N, out_channels, 2 * D, 2 * H, 2 * W), out.shape
    assert bool(jnp.all(jnp.isfinite(out)))
    assert bool(jnp.all(out >= 0.0))              # ReLU output
    print("KERNEL_OK")
</pallas_src>

<mosaic_0001>
module attributes {stable_mosaic.version = 11 : i64} {
  func.func @_matmul_bias_kernel(%arg0: i32, %arg1: memref<128x8xf32, #tpu.memory_space<vmem>>, %arg2: memref<8x64xf32, #tpu.memory_space<vmem>>, %arg3: memref<1x64xf32, #tpu.memory_space<vmem>>, %arg4: memref<128x64xf32, #tpu.memory_space<vmem>>) attributes {dimension_semantics = [#tpu.dimension_semantics<parallel>], iteration_bounds = array<i64: 1>, scalar_prefetch = 0 : i64, scratch_operands = 0 : i64, tpu.core_type = #tpu.core_type<tc>, window_params = [{transform_indices = @transform_0, window_bounds = array<i64: 128, 8>}, {pipeline_mode = #tpu.pipeline_mode<synchronous>, transform_indices = @transform_1, window_bounds = array<i64: 8, 64>}, {pipeline_mode = #tpu.pipeline_mode<synchronous>, transform_indices = @transform_2, window_bounds = array<i64: 1, 64>}, {transform_indices = @transform_3, window_bounds = array<i64: 128, 64>}]} {
    %c0 = arith.constant 0 : index
    %c0_0 = arith.constant 0 : index
    %0 = vector.load %arg1[%c0, %c0_0] : memref<128x8xf32, #tpu.memory_space<vmem>>, vector<128x8xf32>
    %c0_1 = arith.constant 0 : index
    %c0_2 = arith.constant 0 : index
    %1 = vector.load %arg2[%c0_1, %c0_2] : memref<8x64xf32, #tpu.memory_space<vmem>>, vector<8x64xf32>
    %cst = arith.constant dense<0.000000e+00> : vector<128x64xf32>
    %2 = tpu.matmul %0, %1, %cst {dimension_numbers = #tpu.dot_dimension_numbers<[1], [0], [0], [1], [0, 0, 1, 1], [], []>} : vector<128x8xf32>, vector<8x64xf32>, vector<128x64xf32> -> vector<128x64xf32>
    %c0_3 = arith.constant 0 : index
    %c0_4 = arith.constant 0 : index
    %3 = vector.load %arg3[%c0_3, %c0_4] : memref<1x64xf32, #tpu.memory_space<vmem>>, vector<1x64xf32>
    %4 = vector.broadcast %3 : vector<1x64xf32> to vector<128x64xf32>
    %5 = arith.addf %2, %4 : vector<128x64xf32>
    %c0_5 = arith.constant 0 : index
    %c0_6 = arith.constant 0 : index
    %6 = vector.load %arg4[%c0_5, %c0_6] : memref<128x64xf32, #tpu.memory_space<vmem>>, vector<128x64xf32>
    tpu.vector_store %arg4[%c0_5, %c0_6], %5 {strides = array<i32>} : memref<128x64xf32, #tpu.memory_space<vmem>>, vector<128x64xf32>,
    return
  }
  func.func @transform_0(%arg0: i32) -> (i32, i32) {
    %c0_i32 = arith.constant 0 : i32
    %c0_i32_0 = arith.constant 0 : i32
    return %arg0, %c0_i32 : i32, i32
  }
  func.func @transform_1(%arg0: i32) -> (i32, i32) {
    %c0_i32 = arith.constant 0 : i32
    %c0_i32_0 = arith.constant 0 : i32
    %c0_i32_1 = arith.constant 0 : i32
    return %c0_i32, %c0_i32_0 : i32, i32
  }
  func.func @transform_2(%arg0: i32) -> (i32, i32) {
    %c0_i32 = arith.constant 0 : i32
    %c0_i32_0 = arith.constant 0 : i32
    %c0_i32_1 = arith.constant 0 : i32
    return %c0_i32, %c0_i32_0 : i32, i32
  }
  func.func @transform_3(%arg0: i32) -> (i32, i32) {
    %c0_i32 = arith.constant 0 : i32
    %c0_i32_0 = arith.constant 0 : i32
    return %arg0, %c0_i32 : i32, i32
  }
}

module attributes {stable_mosaic.version = 11 : i64} {
  func.func @_conv_tap_kernel(%arg0: i32, %arg1: i32, %arg2: i32, %arg3: memref<1x1x10x10x14xf32, #tpu.memory_space<vmem>>, %arg4: memref<27x14x8xf32, #tpu.memory_space<vmem>>, %arg5: memref<1x1x64x8xf32, #tpu.memory_space<vmem>>, %arg6: memref<1x8xf32, #tpu.memory_space<vmem>>, %arg7: memref<1x8xf32, #tpu.memory_space<vmem>>, %arg8: memref<64x8xf32, #tpu.memory_space<vmem>>) attributes {dimension_semantics = [#tpu.dimension_semantics<arbitrary>, #tpu.dimension_semantics<arbitrary>, #tpu.dimension_semantics<arbitrary>], iteration_bounds = array<i64: 2, 8, 3>, scalar_prefetch = 0 : i64, scratch_operands = 1 : i64, tpu.core_type = #tpu.core_type<tc>, window_params = [{transform_indices = @transform_0, window_bounds = array<i64: 1, 1, 10, 10, 14>}, {pipeline_mode = #tpu.pipeline_mode<synchronous>, transform_indices = @transform_1, window_bounds = array<i64: 27, 14, 8>}, {transform_indices = @transform_2, window_bounds = array<i64: 1, 1, 64, 8>}, {pipeline_mode = #tpu.pipeline_mode<synchronous>, transform_indices = @transform_3, window_bounds = array<i64: 1, 8>}, {pipeline_mode = #tpu.pipeline_mode<synchronous>, transform_indices = @transform_4, window_bounds = array<i64: 1, 8>}]} {
    %c0_i32 = arith.constant 0 : i32
    %0 = arith.cmpi eq, %arg0, %c0_i32 : i32
    %c0_i32_0 = arith.constant 0 : i32
    %1 = arith.cmpi eq, %arg1, %c0_i32_0 : i32
    %2 = arith.andi %0, %1 : i1
    %c0_i32_1 = arith.constant 0 : i32
    %3 = arith.cmpi eq, %arg2, %c0_i32_1 : i32
    %4 = arith.andi %2, %3 : i1
    %5 = arith.extui %4 : i1 to i32
    %c0_i32_2 = arith.constant 0 : i32
    %6 = arith.cmpi ne, %5, %c0_i32_2 : i32
    scf.if %6 {
      %cst_88 = arith.constant 0.000000e+00 : f32
      %105 = vector.broadcast %cst_88 : f32 to vector<1x8xf32>
      %c0_89 = arith.constant 0 : index
      %c0_90 = arith.constant 0 : index
      %106 = vector.load %arg6[%c0_89, %c0_90] : memref<1x8xf32, #tpu.memory_space<vmem>>, vector<1x8xf32>
      tpu.vector_store %arg6[%c0_89, %c0_90], %105 {strides = array<i32>} : memref<1x8xf32, #tpu.memory_space<vmem>>, vector<1x8xf32>,
      %cst_91 = arith.constant 0.000000e+00 : f32
      %107 = vector.broadcast %cst_91 : f32 to vector<1x8xf32>
      %c0_92 = arith.constant 0 : index
      %c0_93 = arith.constant 0 : index
      %108 = vector.load %arg7[%c0_92, %c0_93] : memref<1x8xf32, #tpu.memory_space<vmem>>, vector<1x8xf32>
      tpu.vector_store %arg7[%c0_92, %c0_93], %107 {strides = array<i32>} : memref<1x8xf32, #tpu.memory_space<vmem>>, vector<1x8xf32>,
    } else {
    }
    %c0_i32_3 = arith.constant 0 : i32
    %7 = arith.cmpi eq, %arg2, %c0_i32_3 : i32
    %8 = arith.extui %7 : i1 to i32
    %c0_i32_4 = arith.constant 0 : i32
    %9 = arith.cmpi ne, %8, %c0_i32_4 : i32
    scf.if %9 {
      %cst_88 = arith.constant 0.000000e+00 : f32
      %105 = vector.broadcast %cst_88 : f32 to vector<64x8xf32>
      %c0_89 = arith.constant 0 : index
      %c0_90 = arith.constant 0 : index
      %106 = vector.load %arg8[%c0_89, %c0_90] : memref<64x8xf32, #tpu.memory_space<vmem>>, vector<64x8xf32>
      tpu.vector_store %arg8[%c0_89, %c0_90], %105 {strides = array<i32>} : memref<64x8xf32, #tpu.memory_space<vmem>>, vector<64x8xf32>,
    } else {
    }
    %c0 = arith.constant 0 : index
    %c0_5 = arith.constant 0 : index
    %10 = vector.load %arg8[%c0, %c0_5] : memref<64x8xf32, #tpu.memory_space<vmem>>, vector<64x8xf32>
    %c0_6 = arith.constant 0 : index
    %c0_7 = arith.constant 0 : index
    %c0_8 = arith.constant 0 : index
    %c0_9 = arith.constant 0 : index
    %c0_10 = arith.constant 0 : index
    %11 = vector.load %arg3[%c0_6, %c0_7, %c0_8, %c0_9, %c0_10] : memref<1x1x10x10x14xf32, #tpu.memory_space<vmem>>, vector<1x1x8x8x14xf32>
    %12 = vector.shape_cast %11 : vector<1x1x8x8x14xf32> to vector<8x8x14xf32>
    %13 = vector.shape_cast %12 : vector<8x8x14xf32> to vector<64x14xf32>
    %c9_i32 = arith.constant 9 : i32
    %14 = arith.muli %arg2, %c9_i32 : i32
    %c0_i32_11 = arith.constant 0 : i32
    %15 = arith.addi %14, %c0_i32_11 : i32
    %16 = arith.index_cast %15 : i32 to index
    %c0_12 = arith.constant 0 : index
    %c0_13 = arith.constant 0 : index
    %17 = vector.load %arg4[%16, %c0_12, %c0_13] : memref<27x14x8xf32, #tpu.memory_space<vmem>>, vector<1x14x8xf32>
    %18 = vector.shape_cast %17 : vector<1x14x8xf32> to vector<14x8xf32>
    %cst = arith.constant dense<0.000000e+00> : vector<64x8xf32>
    %19 = tpu.matmul %13, %18, %cst {dimension_numbers = #tpu.dot_dimension_numbers<[1], [0], [0], [1], [0, 0, 1, 1], [], []>} : vector<64x14xf32>, vector<14x8xf32>, vector<64x8xf32> -> vector<64x8xf32>
    %20 = arith.addf %10, %19 : vector<64x8xf32>
    %c0_14 = arith.constant 0 : index
    %c0_15 = arith.constant 0 : index
    %c0_16 = arith.constant 0 : index
    %c1 = arith.constant 1 : index
    %c0_17 = arith.constant 0 : index
    %21 = vector.load %arg3[%c0_14, %c0_15, %c0_16, %c1, %c0_17] : memref<1x1x10x10x14xf32, #tpu.memory_space<vmem>>, vector<1x1x8x8x14xf32>
    %22 = vector.shape_cast %21 : vector<1x1x8x8x14xf32> to vector<8x8x14xf32>
    %23 = vector.shape_cast %22 : vector<8x8x14xf32> to vector<64x14xf32>
    %c9_i32_18 = arith.constant 9 : i32
    %24 = arith.muli %arg2, %c9_i32_18 : i32
    %c1_i32 = arith.constant 1 : i32
    %25 = arith.addi %24, %c1_i32 : i32
    %26 = arith.index_cast %25 : i32 to index
    %c0_19 = arith.constant 0 : index
    %c0_20 = arith.constant 0 : index
    %27 = vector.load %arg4[%26, %c0_19, %c0_20] : memref<27x14x8xf32, #tpu.memory_space<vmem>>, vector<1x14x8xf32>
    %28 = vector.shape_cast %27 : vector<1x14x8xf32> to vector<14x8xf32>
    %cst_21 = arith.constant dense<0.000000e+00> : vector<64x8xf32>
    %29 = tpu.matmul %23, %28, %cst_21 {dimension_numbers = #tpu.dot_dimension_numbers<[1], [0], [0], [1], [0, 0, 1, 1], [], []>} : vector<64x14xf32>, vector<14x8xf32>, vector<64x8xf32> -> vector<64x8xf32>
    %30 = arith.addf %20, %29 : vector<64x8xf32>
    %c0_22 = arith.constant 0 : index
    %c0_23 = arith.constant 0 : index
    %c0_24 = arith.constant 0 : index
    %c2 = arith.constant 2 : index
    %c0_25 = arith.constant 0 : index
    %31 = vector.load %arg3[%c0_22, %c0_23, %c0_24, %c2, %c0_25] : memref<1x1x10x10x14xf32, #tpu.memory_space<vmem>>, vector<1x1x8x8x14xf32>
    %32 = vector.shape_cast %31 : vector<1x1x8x8x14xf32> to vector<8x8x14xf32>
    %33 = vector.shape_cast %32 : vector<8x8x14xf32> to vector<64x14xf32>
    %c9_i32_26 = arith.constant 9 : i32
    %34 = arith.muli %arg2, %c9_i32_26 : i32
    %c2_i32 = arith.constant 2 : i32
    %35 = arith.addi %34, %c2_i32 : i32
    %36 = arith.index_cast %35 : i32 to index
    %c0_27 = arith.constant 0 : index
    %c0_28 = arith.constant 0 : index
    %37 = vector.load %arg4[%36, %c0_27, %c0_28] : memref<27x14x8xf32, #tpu.memory_space<vmem>>, vector<1x14x8xf32>
    %38 = vector.shape_cast %37 : vector<1x14x8xf32> to vector<14x8xf32>
    %cst_29 = arith.constant dense<0.000000e+00> : vector<64x8xf32>
    %39 = tpu.matmul %33, %38, %cst_29 {dimension_numbers = #tpu.dot_dimension_numbers<[1], [0], [0], [1], [0, 0, 1, 1], [], []>} : vector<64x14xf32>, vector<14x8xf32>, vector<64x8xf32> -> vector<64x8xf32>
    %40 = arith.addf %30, %39 : vector<64x8xf32>
    %c0_30 = arith.constant 0 : index
    %c0_31 = arith.constant 0 : index
    %c1_32 = arith.constant 1 : index
    %c0_33 = arith.constant 0 : index
    %c0_34 = arith.constant 0 : index
    %41 = vector.load %arg3[%c0_30, %c0_31, %c1_32, %c0_33, %c0_34] : memref<1x1x10x10x14xf32, #tpu.memory_space<vmem>>, vector<1x1x8x8x14xf32>
    %42 = vector.shape_cast %41 : vector<1x1x8x8x14xf32> to vector<8x8x14xf32>
    %43 = vector.shape_cast %42 : vector<8x8x14xf32> to vector<64x14xf32>
    %c9_i32_35 = arith.constant 9 : i32
    %44 = arith.muli %arg2, %c9_i32_35 : i32
    %c3_i32 = arith.constant 3 : i32
    %45 = arith.addi %44, %c3_i32 : i32
    %46 = arith.index_cast %45 : i32 to index
    %c0_36 = arith.constant 0 : index
    %c0_37 = arith.constant 0 : index
    %47 = vector.load %arg4[%46, %c0_36, %c0_37] : memref<27x14x8xf32, #tpu.memory_space<vmem>>, vector<1x14x8xf32>
    %48 = vector.shape_cast %47 : vector<1x14x8xf32> to vector<14x8xf32>
    %cst_38 = arith.constant dense<0.000000e+00> : vector<64x8xf32>
    %49 = tpu.matmul %43, %48, %cst_38 {dimension_numbers = #tpu.dot_dimension_numbers<[1], [0], [0], [1], [0, 0, 1, 1], [], []>} : vector<64x14xf32>, vector<14x8xf32>, vector<64x8xf32> -> vector<64x8xf32>
    %50 = arith.addf %40, %49 : vector<64x8xf32>
    %c0_39 = arith.constant 0 : index
    %c0_40 = arith.constant 0 : index
    %c1_41 = arith.constant 1 : index
    %c1_42 = arith.constant 1 : index
    %c0_43 = arith.constant 0 : index
    %51 = vector.load %arg3[%c0_39, %c0_40, %c1_41, %c1_42, %c0_43] : memref<1x1x10x10x14xf32, #tpu.memory_space<vmem>>, vector<1x1x8x8x14xf32>
    %52 = vector.shape_cast %51 : vector<1x1x8x8x14xf32> to vector<8x8x14xf32>
    %53 = vector.shape_cast %52 : vector<8x8x14xf32> to vector<64x14xf32>
    %c9_i32_44 = arith.constant 9 : i32
    %54 = arith.muli %arg2, %c9_i32_44 : i32
    %c4_i32 = arith.constant 4 : i32
    %55 = arith.addi %54, %c4_i32 : i32
    %56 = arith.index_cast %55 : i32 to index
    %c0_45 = arith.constant 0 : index
    %c0_46 = arith.constant 0 : index
    %57 = vector.load %arg4[%56, %c0_45, %c0_46] : memref<27x14x8xf32, #tpu.memory_space<vmem>>, vector<1x14x8xf32>
    %58 = vector.shape_cast %57 : vector<1x14x8xf32> to vector<14x8xf32>
    %cst_47 = arith.constant dense<0.000000e+00> : vector<64x8xf32>
    %59 = tpu.matmul %53, %58, %cst_47 {dimension_numbers = #tpu.dot_dimension_numbers<[1], [0], [0], [1], [0, 0, 1, 1], [], []>} : vector<64x14xf32>, vector<14x8xf32>, vector<64x8xf32> -> vector<64x8xf32>
    %60 = arith.addf %50, %59 : vector<64x8xf32>
    %c0_48 = arith.constant 0 : index
    %c0_49 = arith.constant 0 : index
    %c1_50 = arith.constant 1 : index
    %c2_51 = arith.constant 2 : index
    %c0_52 = arith.constant 0 : index
    %61 = vector.load %arg3[%c0_48, %c0_49, %c1_50, %c2_51, %c0_52] : memref<1x1x10x10x14xf32, #tpu.memory_space<vmem>>, vector<1x1x8x8x14xf32>
    %62 = vector.shape_cast %61 : vector<1x1x8x8x14xf32> to vector<8x8x14xf32>
    %63 = vector.shape_cast %62 : vector<8x8x14xf32> to vector<64x14xf32>
    %c9_i32_53 = arith.constant 9 : i32
    %64 = arith.muli %arg2, %c9_i32_53 : i32
    %c5_i32 = arith.constant 5 : i32
    %65 = arith.addi %64, %c5_i32 : i32
    %66 = arith.index_cast %65 : i32 to index
    %c0_54 = arith.constant 0 : index
    %c0_55 = arith.constant 0 : index
    %67 = vector.load %arg4[%66, %c0_54, %c0_55] : memref<27x14x8xf32, #tpu.memory_space<vmem>>, vector<1x14x8xf32>
    %68 = vector.shape_cast %67 : vector<1x14x8xf32> to vector<14x8xf32>
    %cst_56 = arith.constant dense<0.000000e+00> : vector<64x8xf32>
    %69 = tpu.matmul %63, %68, %cst_56 {dimension_numbers = #tpu.dot_dimension_numbers<[1], [0], [0], [1], [0, 0, 1, 1], [], []>} : vector<64x14xf32>, vector<14x8xf32>, vector<64x8xf32> -> vector<64x8xf32>
    %70 = arith.addf %60, %69 : vector<64x8xf32>
    %c0_57 = arith.constant 0 : index
    %c0_58 = arith.constant 0 : index
    %c2_59 = arith.constant 2 : index
    %c0_60 = arith.constant 0 : index
    %c0_61 = arith.constant 0 : index
    %71 = vector.load %arg3[%c0_57, %c0_58, %c2_59, %c0_60, %c0_61] : memref<1x1x10x10x14xf32, #tpu.memory_space<vmem>>, vector<1x1x8x8x14xf32>
    %72 = vector.shape_cast %71 : vector<1x1x8x8x14xf32> to vector<8x8x14xf32>
    %73 = vector.shape_cast %72 : vector<8x8x14xf32> to vector<64x14xf32>
    %c9_i32_62 = arith.constant 9 : i32
    %74 = arith.muli %arg2, %c9_i32_62 : i32
    %c6_i32 = arith.constant 6 : i32
    %75 = arith.addi %74, %c6_i32 : i32
    %76 = arith.index_cast %75 : i32 to index
    %c0_63 = arith.constant 0 : index
    %c0_64 = arith.constant 0 : index
    %77 = vector.load %arg4[%76, %c0_63, %c0_64] : memref<27x14x8xf32, #tpu.memory_space<vmem>>, vector<1x14x8xf32>
    %78 = vector.shape_cast %77 : vector<1x14x8xf32> to vector<14x8xf32>
    %cst_65 = arith.constant dense<0.000000e+00> : vector<64x8xf32>
    %79 = tpu.matmul %73, %78, %cst_65 {dimension_numbers = #tpu.dot_dimension_numbers<[1], [0], [0], [1], [0, 0, 1, 1], [], []>} : vector<64x14xf32>, vector<14x8xf32>, vector<64x8xf32> -> vector<64x8xf32>
    %80 = arith.addf %70, %79 : vector<64x8xf32>
    %c0_66 = arith.constant 0 : index
    %c0_67 = arith.constant 0 : index
    %c2_68 = arith.constant 2 : index
    %c1_69 = arith.constant 1 : index
    %c0_70 = arith.constant 0 : index
    %81 = vector.load %arg3[%c0_66, %c0_67, %c2_68, %c1_69, %c0_70] : memref<1x1x10x10x14xf32, #tpu.memory_space<vmem>>, vector<1x1x8x8x14xf32>
    %82 = vector.shape_cast %81 : vector<1x1x8x8x14xf32> to vector<8x8x14xf32>
    %83 = vector.shape_cast %82 : vector<8x8x14xf32> to vector<64x14xf32>
    %c9_i32_71 = arith.constant 9 : i32
    %84 = arith.muli %arg2, %c9_i32_71 : i32
    %c7_i32 = arith.constant 7 : i32
    %85 = arith.addi %84, %c7_i32 : i32
    %86 = arith.index_cast %85 : i32 to index
    %c0_72 = arith.constant 0 : index
    %c0_73 = arith.constant 0 : index
    %87 = vector.load %arg4[%86, %c0_72, %c0_73] : memref<27x14x8xf32, #tpu.memory_space<vmem>>, vector<1x14x8xf32>
    %88 = vector.shape_cast %87 : vector<1x14x8xf32> to vector<14x8xf32>
    %cst_74 = arith.constant dense<0.000000e+00> : vector<64x8xf32>
    %89 = tpu.matmul %83, %88, %cst_74 {dimension_numbers = #tpu.dot_dimension_numbers<[1], [0], [0], [1], [0, 0, 1, 1], [], []>} : vector<64x14xf32>, vector<14x8xf32>, vector<64x8xf32> -> vector<64x8xf32>
    %90 = arith.addf %80, %89 : vector<64x8xf32>
    %c0_75 = arith.constant 0 : index
    %c0_76 = arith.constant 0 : index
    %c2_77 = arith.constant 2 : index
    %c2_78 = arith.constant 2 : index
    %c0_79 = arith.constant 0 : index
    %91 = vector.load %arg3[%c0_75, %c0_76, %c2_77, %c2_78, %c0_79] : memref<1x1x10x10x14xf32, #tpu.memory_space<vmem>>, vector<1x1x8x8x14xf32>
    %92 = vector.shape_cast %91 : vector<1x1x8x8x14xf32> to vector<8x8x14xf32>
    %93 = vector.shape_cast %92 : vector<8x8x14xf32> to vector<64x14xf32>
    %c9_i32_80 = arith.constant 9 : i32
    %94 = arith.muli %arg2, %c9_i32_80 : i32
    %c8_i32 = arith.constant 8 : i32
    %95 = arith.addi %94, %c8_i32 : i32
    %96 = arith.index_cast %95 : i32 to index
    %c0_81 = arith.constant 0 : index
    %c0_82 = arith.constant 0 : index
    %97 = vector.load %arg4[%96, %c0_81, %c0_82] : memref<27x14x8xf32, #tpu.memory_space<vmem>>, vector<1x14x8xf32>
    %98 = vector.shape_cast %97 : vector<1x14x8xf32> to vector<14x8xf32>
    %cst_83 = arith.constant dense<0.000000e+00> : vector<64x8xf32>
    %99 = tpu.matmul %93, %98, %cst_83 {dimension_numbers = #tpu.dot_dimension_numbers<[1], [0], [0], [1], [0, 0, 1, 1], [], []>} : vector<64x14xf32>, vector<14x8xf32>, vector<64x8xf32> -> vector<64x8xf32>
    %100 = arith.addf %90, %99 : vector<64x8xf32>
    %c0_84 = arith.constant 0 : index
    %c0_85 = arith.constant 0 : index
    %101 = vector.load %arg8[%c0_84, %c0_85] : memref<64x8xf32, #tpu.memory_space<vmem>>, vector<64x8xf32>
    tpu.vector_store %arg8[%c0_84, %c0_85], %100 {strides = array<i32>} : memref<64x8xf32, #tpu.memory_space<vmem>>, vector<64x8xf32>,
    %c2_i32_86 = arith.constant 2 : i32
    %102 = arith.cmpi eq, %arg2, %c2_i32_86 : i32
    %103 = arith.extui %102 : i1 to i32
    %c0_i32_87 = arith.constant 0 : i32
    %104 = arith.cmpi ne, %103, %c0_i32_87 : i32
    scf.if %104 {
      %c0_88 = arith.constant 0 : index
      %c0_89 = arith.constant 0 : index
      %c0_90 = arith.constant 0 : index
      %c0_91 = arith.constant 0 : index
      %105 = vector.load %arg5[%c0_88, %c0_89, %c0_90, %c0_91] : memref<1x1x64x8xf32, #tpu.memory_space<vmem>>, vector<1x1x64x8xf32>
      %106 = vector.shape_cast %105 : vector<1x1x64x8xf32> to vector<64x8xf32>
      %107 = vector.shape_cast %100 : vector<64x8xf32> to vector<1x1x64x8xf32>
      tpu.vector_store %arg5[%c0_88, %c0_89, %c0_90, %c0_91], %107 {strides = array<i32>} : memref<1x1x64x8xf32, #tpu.memory_space<vmem>>, vector<1x1x64x8xf32>,
      %c0_92 = arith.constant 0 : index
      %c0_93 = arith.constant 0 : index
      %108 = vector.load %arg6[%c0_92, %c0_93] : memref<1x8xf32, #tpu.memory_space<vmem>>, vector<1x8xf32>
      %cst_94 = arith.constant dense<0.000000e+00> : vector<8xf32>
      %109 = vector.multi_reduction <add>, %100, %cst_94 [0] : vector<64x8xf32> to vector<8xf32>
      %110 = vector.shape_cast %109 : vector<8xf32> to vector<1x8xf32>
      %111 = arith.addf %108, %110 : vector<1x8xf32>
      %c0_95 = arith.constant 0 : index
      %c0_96 = arith.constant 0 : index
      %112 = vector.load %arg6[%c0_95, %c0_96] : memref<1x8xf32, #tpu.memory_space<vmem>>, vector<1x8xf32>
      tpu.vector_store %arg6[%c0_95, %c0_96], %111 {strides = array<i32>} : memref<1x8xf32, #tpu.memory_space<vmem>>, vector<1x8xf32>,
      %c0_97 = arith.constant 0 : index
      %c0_98 = arith.constant 0 : index
      %113 = vector.load %arg7[%c0_97, %c0_98] : memref<1x8xf32, #tpu.memory_space<vmem>>, vector<1x8xf32>
      %114 = arith.mulf %100, %100 : vector<64x8xf32>
      %cst_99 = arith.constant dense<0.000000e+00> : vector<8xf32>
      %115 = vector.multi_reduction <add>, %114, %cst_99 [0] : vector<64x8xf32> to vector<8xf32>
      %116 = vector.shape_cast %115 : vector<8xf32> to vector<1x8xf32>
      %117 = arith.addf %113, %116 : vector<1x8xf32>
      %c0_100 = arith.constant 0 : index
      %c0_101 = arith.constant 0 : index
      %118 = vector.load %arg7[%c0_100, %c0_101] : memref<1x8xf32, #tpu.memory_space<vmem>>, vector<1x8xf32>
      tpu.vector_store %arg7[%c0_100, %c0_101], %117 {strides = array<i32>} : memref<1x8xf32, #tpu.memory_space<vmem>>, vector<1x8xf32>,
    } else {
    }
    return
  }
  func.func @transform_0(%arg0: i32, %arg1: i32, %arg2: i32) -> (i32, i32, i32, i32, i32) {
    %0 = arith.addi %arg1, %arg2 : i32
    %c0_i32 = arith.constant 0 : i32
    %c0_i32_0 = arith.constant 0 : i32
    %c0_i32_1 = arith.constant 0 : i32
    %c0_i32_2 = arith.constant 0 : i32
    return %arg0, %0, %c0_i32, %c0_i32_0, %c0_i32_1 : i32, i32, i32, i32, i32
  }
  func.func @transform_1(%arg0: i32, %arg1: i32, %arg2: i32) -> (i32, i32, i32) {
    %c0_i32 = arith.constant 0 : i32
    %c0_i32_0 = arith.constant 0 : i32
    %c0_i32_1 = arith.constant 0 : i32
    %c0_i32_2 = arith.constant 0 : i32
    return %c0_i32, %c0_i32_0, %c0_i32_1 : i32, i32, i32
  }
  func.func @transform_2(%arg0: i32, %arg1: i32, %arg2: i32) -> (i32, i32, i32, i32) {
    %c0_i32 = arith.constant 0 : i32
    %c0_i32_0 = arith.constant 0 : i32
    %c0_i32_1 = arith.constant 0 : i32
    return %arg0, %arg1, %c0_i32, %c0_i32_0 : i32, i32, i32, i32
  }
  func.func @transform_3(%arg0: i32, %arg1: i32, %arg2: i32) -> (i32, i32) {
    %c0_i32 = arith.constant 0 : i32
    %c0_i32_0 = arith.constant 0 : i32
    %c0_i32_1 = arith.constant 0 : i32
    return %c0_i32, %c0_i32_0 : i32, i32
  }
  func.func @transform_4(%arg0: i32, %arg1: i32, %arg2: i32) -> (i32, i32) {
    %c0_i32 = arith.constant 0 : i32
    %c0_i32_0 = arith.constant 0 : i32
    %c0_i32_1 = arith.constant 0 : i32
    return %c0_i32, %c0_i32_0 : i32, i32
  }
}

module attributes {stable_mosaic.version = 11 : i64} {
  func.func @_bn_relu_kernel(%arg0: i32, %arg1: memref<16x64x8xf32, #tpu.memory_space<vmem>>, %arg2: memref<1x1x8xf32, #tpu.memory_space<vmem>>, %arg3: memref<1x1x8xf32, #tpu.memory_space<vmem>>, %arg4: memref<16x64x8xf32, #tpu.memory_space<vmem>>) attributes {dimension_semantics = [#tpu.dimension_semantics<parallel>], iteration_bounds = array<i64: 1>, scalar_prefetch = 0 : i64, scratch_operands = 0 : i64, tpu.core_type = #tpu.core_type<tc>, window_params = [{transform_indices = @transform_0, window_bounds = array<i64: 16, 64, 8>}, {pipeline_mode = #tpu.pipeline_mode<synchronous>, transform_indices = @transform_1, window_bounds = array<i64: 1, 1, 8>}, {pipeline_mode = #tpu.pipeline_mode<synchronous>, transform_indices = @transform_2, window_bounds = array<i64: 1, 1, 8>}, {transform_indices = @transform_3, window_bounds = array<i64: 16, 64, 8>}]} {
    %c0 = arith.constant 0 : index
    %c0_0 = arith.constant 0 : index
    %c0_1 = arith.constant 0 : index
    %0 = vector.load %arg1[%c0, %c0_0, %c0_1] : memref<16x64x8xf32, #tpu.memory_space<vmem>>, vector<16x64x8xf32>
    %c0_2 = arith.constant 0 : index
    %c0_3 = arith.constant 0 : index
    %c0_4 = arith.constant 0 : index
    %1 = vector.load %arg2[%c0_2, %c0_3, %c0_4] : memref<1x1x8xf32, #tpu.memory_space<vmem>>, vector<1x1x8xf32>
    %2 = vector.broadcast %1 : vector<1x1x8xf32> to vector<16x64x8xf32>
    %3 = arith.mulf %0, %2 : vector<16x64x8xf32>
    %c0_5 = arith.constant 0 : index
    %c0_6 = arith.constant 0 : index
    %c0_7 = arith.constant 0 : index
    %4 = vector.load %arg3[%c0_5, %c0_6, %c0_7] : memref<1x1x8xf32, #tpu.memory_space<vmem>>, vector<1x1x8xf32>
    %5 = vector.broadcast %4 : vector<1x1x8xf32> to vector<16x64x8xf32>
    %6 = arith.addf %3, %5 : vector<16x64x8xf32>
    %cst = arith.constant 0.000000e+00 : f32
    %7 = vector.broadcast %cst : f32 to vector<16x64x8xf32>
    %8 = arith.maximumf %6, %7 : vector<16x64x8xf32>
    %c0_8 = arith.constant 0 : index
    %c0_9 = arith.constant 0 : index
    %c0_10 = arith.constant 0 : index
    %9 = vector.load %arg4[%c0_8, %c0_9, %c0_10] : memref<16x64x8xf32, #tpu.memory_space<vmem>>, vector<16x64x8xf32>
    tpu.vector_store %arg4[%c0_8, %c0_9, %c0_10], %8 {strides = array<i32>} : memref<16x64x8xf32, #tpu.memory_space<vmem>>, vector<16x64x8xf32>,
    return
  }
  func.func @transform_0(%arg0: i32) -> (i32, i32, i32) {
    %c0_i32 = arith.constant 0 : i32
    %c0_i32_0 = arith.constant 0 : i32
    %c0_i32_1 = arith.constant 0 : i32
    return %arg0, %c0_i32, %c0_i32_0 : i32, i32, i32
  }
  func.func @transform_1(%arg0: i32) -> (i32, i32, i32) {
    %c0_i32 = arith.constant 0 : i32
    %c0_i32_0 = arith.constant 0 : i32
    %c0_i32_1 = arith.constant 0 : i32
    %c0_i32_2 = arith.constant 0 : i32
    return %c0_i32, %c0_i32_0, %c0_i32_1 : i32, i32, i32
  }
  func.func @transform_2(%arg0: i32) -> (i32, i32, i32) {
    %c0_i32 = arith.constant 0 : i32
    %c0_i32_0 = arith.constant 0 : i32
    %c0_i32_1 = arith.constant 0 : i32
    %c0_i32_2 = arith.constant 0 : i32
    return %c0_i32, %c0_i32_0, %c0_i32_1 : i32, i32, i32
  }
  func.func @transform_3(%arg0: i32) -> (i32, i32, i32) {
    %c0_i32 = arith.constant 0 : i32
    %c0_i32_0 = arith.constant 0 : i32
    %c0_i32_1 = arith.constant 0 : i32
    return %arg0, %c0_i32, %c0_i32_0 : i32, i32, i32
  }
}

module attributes {stable_mosaic.version = 11 : i64} {
  func.func @_conv_tap_kernel(%arg0: i32, %arg1: i32, %arg2: i32, %arg3: memref<1x1x10x10x8xf32, #tpu.memory_space<vmem>>, %arg4: memref<27x8x8xf32, #tpu.memory_space<vmem>>, %arg5: memref<1x1x64x8xf32, #tpu.memory_space<vmem>>, %arg6: memref<1x8xf32, #tpu.memory_space<vmem>>, %arg7: memref<1x8xf32, #tpu.memory_space<vmem>>, %arg8: memref<64x8xf32, #tpu.memory_space<vmem>>) attributes {dimension_semantics = [#tpu.dimension_semantics<arbitrary>, #tpu.dimension_semantics<arbitrary>, #tpu.dimension_semantics<arbitrary>], iteration_bounds = array<i64: 2, 8, 3>, scalar_prefetch = 0 : i64, scratch_operands = 1 : i64, tpu.core_type = #tpu.core_type<tc>, window_params = [{transform_indices = @transform_0, window_bounds = array<i64: 1, 1, 10, 10, 8>}, {pipeline_mode = #tpu.pipeline_mode<synchronous>, transform_indices = @transform_1, window_bounds = array<i64: 27, 8, 8>}, {transform_indices = @transform_2, window_bounds = array<i64: 1, 1, 64, 8>}, {pipeline_mode = #tpu.pipeline_mode<synchronous>, transform_indices = @transform_3, window_bounds = array<i64: 1, 8>}, {pipeline_mode = #tpu.pipeline_mode<synchronous>, transform_indices = @transform_4, window_bounds = array<i64: 1, 8>}]} {
    %c0_i32 = arith.constant 0 : i32
    %0 = arith.cmpi eq, %arg0, %c0_i32 : i32
    %c0_i32_0 = arith.constant 0 : i32
    %1 = arith.cmpi eq, %arg1, %c0_i32_0 : i32
    %2 = arith.andi %0, %1 : i1
    %c0_i32_1 = arith.constant 0 : i32
    %3 = arith.cmpi eq, %arg2, %c0_i32_1 : i32
    %4 = arith.andi %2, %3 : i1
    %5 = arith.extui %4 : i1 to i32
    %c0_i32_2 = arith.constant 0 : i32
    %6 = arith.cmpi ne, %5, %c0_i32_2 : i32
    scf.if %6 {
      %cst_88 = arith.constant 0.000000e+00 : f32
      %105 = vector.broadcast %cst_88 : f32 to vector<1x8xf32>
      %c0_89 = arith.constant 0 : index
      %c0_90 = arith.constant 0 : index
      %106 = vector.load %arg6[%c0_89, %c0_90] : memref<1x8xf32, #tpu.memory_space<vmem>>, vector<1x8xf32>
      tpu.vector_store %arg6[%c0_89, %c0_90], %105 {strides = array<i32>} : memref<1x8xf32, #tpu.memory_space<vmem>>, vector<1x8xf32>,
      %cst_91 = arith.constant 0.000000e+00 : f32
      %107 = vector.broadcast %cst_91 : f32 to vector<1x8xf32>
      %c0_92 = arith.constant 0 : index
      %c0_93 = arith.constant 0 : index
      %108 = vector.load %arg7[%c0_92, %c0_93] : memref<1x8xf32, #tpu.memory_space<vmem>>, vector<1x8xf32>
      tpu.vector_store %arg7[%c0_92, %c0_93], %107 {strides = array<i32>} : memref<1x8xf32, #tpu.memory_space<vmem>>, vector<1x8xf32>,
    } else {
    }
    %c0_i32_3 = arith.constant 0 : i32
    %7 = arith.cmpi eq, %arg2, %c0_i32_3 : i32
    %8 = arith.extui %7 : i1 to i32
    %c0_i32_4 = arith.constant 0 : i32
    %9 = arith.cmpi ne, %8, %c0_i32_4 : i32
    scf.if %9 {
      %cst_88 = arith.constant 0.000000e+00 : f32
      %105 = vector.broadcast %cst_88 : f32 to vector<64x8xf32>
      %c0_89 = arith.constant 0 : index
      %c0_90 = arith.constant 0 : index
      %106 = vector.load %arg8[%c0_89, %c0_90] : memref<64x8xf32, #tpu.memory_space<vmem>>, vector<64x8xf32>
      tpu.vector_store %arg8[%c0_89, %c0_90], %105 {strides = array<i32>} : memref<64x8xf32, #tpu.memory_space<vmem>>, vector<64x8xf32>,
    } else {
    }
    %c0 = arith.constant 0 : index
    %c0_5 = arith.constant 0 : index
    %10 = vector.load %arg8[%c0, %c0_5] : memref<64x8xf32, #tpu.memory_space<vmem>>, vector<64x8xf32>
    %c0_6 = arith.constant 0 : index
    %c0_7 = arith.constant 0 : index
    %c0_8 = arith.constant 0 : index
    %c0_9 = arith.constant 0 : index
    %c0_10 = arith.constant 0 : index
    %11 = vector.load %arg3[%c0_6, %c0_7, %c0_8, %c0_9, %c0_10] : memref<1x1x10x10x8xf32, #tpu.memory_space<vmem>>, vector<1x1x8x8x8xf32>
    %12 = vector.shape_cast %11 : vector<1x1x8x8x8xf32> to vector<8x8x8xf32>
    %13 = vector.shape_cast %12 : vector<8x8x8xf32> to vector<64x8xf32>
    %c9_i32 = arith.constant 9 : i32
    %14 = arith.muli %arg2, %c9_i32 : i32
    %c0_i32_11 = arith.constant 0 : i32
    %15 = arith.addi %14, %c0_i32_11 : i32
    %16 = arith.index_cast %15 : i32 to index
    %c0_12 = arith.constant 0 : index
    %c0_13 = arith.constant 0 : index
    %17 = vector.load %arg4[%16, %c0_12, %c0_13] : memref<27x8x8xf32, #tpu.memory_space<vmem>>, vector<1x8x8xf32>
    %18 = vector.shape_cast %17 : vector<1x8x8xf32> to vector<8x8xf32>
    %cst = arith.constant dense<0.000000e+00> : vector<64x8xf32>
    %19 = tpu.matmul %13, %18, %cst {dimension_numbers = #tpu.dot_dimension_numbers<[1], [0], [0], [1], [0, 0, 1, 1], [], []>} : vector<64x8xf32>, vector<8x8xf32>, vector<64x8xf32> -> vector<64x8xf32>
    %20 = arith.addf %10, %19 : vector<64x8xf32>
    %c0_14 = arith.constant 0 : index
    %c0_15 = arith.constant 0 : index
    %c0_16 = arith.constant 0 : index
    %c1 = arith.constant 1 : index
    %c0_17 = arith.constant 0 : index
    %21 = vector.load %arg3[%c0_14, %c0_15, %c0_16, %c1, %c0_17] : memref<1x1x10x10x8xf32, #tpu.memory_space<vmem>>, vector<1x1x8x8x8xf32>
    %22 = vector.shape_cast %21 : vector<1x1x8x8x8xf32> to vector<8x8x8xf32>
    %23 = vector.shape_cast %22 : vector<8x8x8xf32> to vector<64x8xf32>
    %c9_i32_18 = arith.constant 9 : i32
    %24 = arith.muli %arg2, %c9_i32_18 : i32
    %c1_i32 = arith.constant 1 : i32
    %25 = arith.addi %24, %c1_i32 : i32
    %26 = arith.index_cast %25 : i32 to index
    %c0_19 = arith.constant 0 : index
    %c0_20 = arith.constant 0 : index
    %27 = vector.load %arg4[%26, %c0_19, %c0_20] : memref<27x8x8xf32, #tpu.memory_space<vmem>>, vector<1x8x8xf32>
    %28 = vector.shape_cast %27 : vector<1x8x8xf32> to vector<8x8xf32>
    %cst_21 = arith.constant dense<0.000000e+00> : vector<64x8xf32>
    %29 = tpu.matmul %23, %28, %cst_21 {dimension_numbers = #tpu.dot_dimension_numbers<[1], [0], [0], [1], [0, 0, 1, 1], [], []>} : vector<64x8xf32>, vector<8x8xf32>, vector<64x8xf32> -> vector<64x8xf32>
    %30 = arith.addf %20, %29 : vector<64x8xf32>
    %c0_22 = arith.constant 0 : index
    %c0_23 = arith.constant 0 : index
    %c0_24 = arith.constant 0 : index
    %c2 = arith.constant 2 : index
    %c0_25 = arith.constant 0 : index
    %31 = vector.load %arg3[%c0_22, %c0_23, %c0_24, %c2, %c0_25] : memref<1x1x10x10x8xf32, #tpu.memory_space<vmem>>, vector<1x1x8x8x8xf32>
    %32 = vector.shape_cast %31 : vector<1x1x8x8x8xf32> to vector<8x8x8xf32>
    %33 = vector.shape_cast %32 : vector<8x8x8xf32> to vector<64x8xf32>
    %c9_i32_26 = arith.constant 9 : i32
    %34 = arith.muli %arg2, %c9_i32_26 : i32
    %c2_i32 = arith.constant 2 : i32
    %35 = arith.addi %34, %c2_i32 : i32
    %36 = arith.index_cast %35 : i32 to index
    %c0_27 = arith.constant 0 : index
    %c0_28 = arith.constant 0 : index
    %37 = vector.load %arg4[%36, %c0_27, %c0_28] : memref<27x8x8xf32, #tpu.memory_space<vmem>>, vector<1x8x8xf32>
    %38 = vector.shape_cast %37 : vector<1x8x8xf32> to vector<8x8xf32>
    %cst_29 = arith.constant dense<0.000000e+00> : vector<64x8xf32>
    %39 = tpu.matmul %33, %38, %cst_29 {dimension_numbers = #tpu.dot_dimension_numbers<[1], [0], [0], [1], [0, 0, 1, 1], [], []>} : vector<64x8xf32>, vector<8x8xf32>, vector<64x8xf32> -> vector<64x8xf32>
    %40 = arith.addf %30, %39 : vector<64x8xf32>
    %c0_30 = arith.constant 0 : index
    %c0_31 = arith.constant 0 : index
    %c1_32 = arith.constant 1 : index
    %c0_33 = arith.constant 0 : index
    %c0_34 = arith.constant 0 : index
    %41 = vector.load %arg3[%c0_30, %c0_31, %c1_32, %c0_33, %c0_34] : memref<1x1x10x10x8xf32, #tpu.memory_space<vmem>>, vector<1x1x8x8x8xf32>
    %42 = vector.shape_cast %41 : vector<1x1x8x8x8xf32> to vector<8x8x8xf32>
    %43 = vector.shape_cast %42 : vector<8x8x8xf32> to vector<64x8xf32>
    %c9_i32_35 = arith.constant 9 : i32
    %44 = arith.muli %arg2, %c9_i32_35 : i32
    %c3_i32 = arith.constant 3 : i32
    %45 = arith.addi %44, %c3_i32 : i32
    %46 = arith.index_cast %45 : i32 to index
    %c0_36 = arith.constant 0 : index
    %c0_37 = arith.constant 0 : index
    %47 = vector.load %arg4[%46, %c0_36, %c0_37] : memref<27x8x8xf32, #tpu.memory_space<vmem>>, vector<1x8x8xf32>
    %48 = vector.shape_cast %47 : vector<1x8x8xf32> to vector<8x8xf32>
    %cst_38 = arith.constant dense<0.000000e+00> : vector<64x8xf32>
    %49 = tpu.matmul %43, %48, %cst_38 {dimension_numbers = #tpu.dot_dimension_numbers<[1], [0], [0], [1], [0, 0, 1, 1], [], []>} : vector<64x8xf32>, vector<8x8xf32>, vector<64x8xf32> -> vector<64x8xf32>
    %50 = arith.addf %40, %49 : vector<64x8xf32>
    %c0_39 = arith.constant 0 : index
    %c0_40 = arith.constant 0 : index
    %c1_41 = arith.constant 1 : index
    %c1_42 = arith.constant 1 : index
    %c0_43 = arith.constant 0 : index
    %51 = vector.load %arg3[%c0_39, %c0_40, %c1_41, %c1_42, %c0_43] : memref<1x1x10x10x8xf32, #tpu.memory_space<vmem>>, vector<1x1x8x8x8xf32>
    %52 = vector.shape_cast %51 : vector<1x1x8x8x8xf32> to vector<8x8x8xf32>
    %53 = vector.shape_cast %52 : vector<8x8x8xf32> to vector<64x8xf32>
    %c9_i32_44 = arith.constant 9 : i32
    %54 = arith.muli %arg2, %c9_i32_44 : i32
    %c4_i32 = arith.constant 4 : i32
    %55 = arith.addi %54, %c4_i32 : i32
    %56 = arith.index_cast %55 : i32 to index
    %c0_45 = arith.constant 0 : index
    %c0_46 = arith.constant 0 : index
    %57 = vector.load %arg4[%56, %c0_45, %c0_46] : memref<27x8x8xf32, #tpu.memory_space<vmem>>, vector<1x8x8xf32>
    %58 = vector.shape_cast %57 : vector<1x8x8xf32> to vector<8x8xf32>
    %cst_47 = arith.constant dense<0.000000e+00> : vector<64x8xf32>
    %59 = tpu.matmul %53, %58, %cst_47 {dimension_numbers = #tpu.dot_dimension_numbers<[1], [0], [0], [1], [0, 0, 1, 1], [], []>} : vector<64x8xf32>, vector<8x8xf32>, vector<64x8xf32> -> vector<64x8xf32>
    %60 = arith.addf %50, %59 : vector<64x8xf32>
    %c0_48 = arith.constant 0 : index
    %c0_49 = arith.constant 0 : index
    %c1_50 = arith.constant 1 : index
    %c2_51 = arith.constant 2 : index
    %c0_52 = arith.constant 0 : index
    %61 = vector.load %arg3[%c0_48, %c0_49, %c1_50, %c2_51, %c0_52] : memref<1x1x10x10x8xf32, #tpu.memory_space<vmem>>, vector<1x1x8x8x8xf32>
    %62 = vector.shape_cast %61 : vector<1x1x8x8x8xf32> to vector<8x8x8xf32>
    %63 = vector.shape_cast %62 : vector<8x8x8xf32> to vector<64x8xf32>
    %c9_i32_53 = arith.constant 9 : i32
    %64 = arith.muli %arg2, %c9_i32_53 : i32
    %c5_i32 = arith.constant 5 : i32
    %65 = arith.addi %64, %c5_i32 : i32
    %66 = arith.index_cast %65 : i32 to index
    %c0_54 = arith.constant 0 : index
    %c0_55 = arith.constant 0 : index
    %67 = vector.load %arg4[%66, %c0_54, %c0_55] : memref<27x8x8xf32, #tpu.memory_space<vmem>>, vector<1x8x8xf32>
    %68 = vector.shape_cast %67 : vector<1x8x8xf32> to vector<8x8xf32>
    %cst_56 = arith.constant dense<0.000000e+00> : vector<64x8xf32>
    %69 = tpu.matmul %63, %68, %cst_56 {dimension_numbers = #tpu.dot_dimension_numbers<[1], [0], [0], [1], [0, 0, 1, 1], [], []>} : vector<64x8xf32>, vector<8x8xf32>, vector<64x8xf32> -> vector<64x8xf32>
    %70 = arith.addf %60, %69 : vector<64x8xf32>
    %c0_57 = arith.constant 0 : index
    %c0_58 = arith.constant 0 : index
    %c2_59 = arith.constant 2 : index
    %c0_60 = arith.constant 0 : index
    %c0_61 = arith.constant 0 : index
    %71 = vector.load %arg3[%c0_57, %c0_58, %c2_59, %c0_60, %c0_61] : memref<1x1x10x10x8xf32, #tpu.memory_space<vmem>>, vector<1x1x8x8x8xf32>
    %72 = vector.shape_cast %71 : vector<1x1x8x8x8xf32> to vector<8x8x8xf32>
    %73 = vector.shape_cast %72 : vector<8x8x8xf32> to vector<64x8xf32>
    %c9_i32_62 = arith.constant 9 : i32
    %74 = arith.muli %arg2, %c9_i32_62 : i32
    %c6_i32 = arith.constant 6 : i32
    %75 = arith.addi %74, %c6_i32 : i32
    %76 = arith.index_cast %75 : i32 to index
    %c0_63 = arith.constant 0 : index
    %c0_64 = arith.constant 0 : index
    %77 = vector.load %arg4[%76, %c0_63, %c0_64] : memref<27x8x8xf32, #tpu.memory_space<vmem>>, vector<1x8x8xf32>
    %78 = vector.shape_cast %77 : vector<1x8x8xf32> to vector<8x8xf32>
    %cst_65 = arith.constant dense<0.000000e+00> : vector<64x8xf32>
    %79 = tpu.matmul %73, %78, %cst_65 {dimension_numbers = #tpu.dot_dimension_numbers<[1], [0], [0], [1], [0, 0, 1, 1], [], []>} : vector<64x8xf32>, vector<8x8xf32>, vector<64x8xf32> -> vector<64x8xf32>
    %80 = arith.addf %70, %79 : vector<64x8xf32>
    %c0_66 = arith.constant 0 : index
    %c0_67 = arith.constant 0 : index
    %c2_68 = arith.constant 2 : index
    %c1_69 = arith.constant 1 : index
    %c0_70 = arith.constant 0 : index
    %81 = vector.load %arg3[%c0_66, %c0_67, %c2_68, %c1_69, %c0_70] : memref<1x1x10x10x8xf32, #tpu.memory_space<vmem>>, vector<1x1x8x8x8xf32>
    %82 = vector.shape_cast %81 : vector<1x1x8x8x8xf32> to vector<8x8x8xf32>
    %83 = vector.shape_cast %82 : vector<8x8x8xf32> to vector<64x8xf32>
    %c9_i32_71 = arith.constant 9 : i32
    %84 = arith.muli %arg2, %c9_i32_71 : i32
    %c7_i32 = arith.constant 7 : i32
    %85 = arith.addi %84, %c7_i32 : i32
    %86 = arith.index_cast %85 : i32 to index
    %c0_72 = arith.constant 0 : index
    %c0_73 = arith.constant 0 : index
    %87 = vector.load %arg4[%86, %c0_72, %c0_73] : memref<27x8x8xf32, #tpu.memory_space<vmem>>, vector<1x8x8xf32>
    %88 = vector.shape_cast %87 : vector<1x8x8xf32> to vector<8x8xf32>
    %cst_74 = arith.constant dense<0.000000e+00> : vector<64x8xf32>
    %89 = tpu.matmul %83, %88, %cst_74 {dimension_numbers = #tpu.dot_dimension_numbers<[1], [0], [0], [1], [0, 0, 1, 1], [], []>} : vector<64x8xf32>, vector<8x8xf32>, vector<64x8xf32> -> vector<64x8xf32>
    %90 = arith.addf %80, %89 : vector<64x8xf32>
    %c0_75 = arith.constant 0 : index
    %c0_76 = arith.constant 0 : index
    %c2_77 = arith.constant 2 : index
    %c2_78 = arith.constant 2 : index
    %c0_79 = arith.constant 0 : index
    %91 = vector.load %arg3[%c0_75, %c0_76, %c2_77, %c2_78, %c0_79] : memref<1x1x10x10x8xf32, #tpu.memory_space<vmem>>, vector<1x1x8x8x8xf32>
    %92 = vector.shape_cast %91 : vector<1x1x8x8x8xf32> to vector<8x8x8xf32>
    %93 = vector.shape_cast %92 : vector<8x8x8xf32> to vector<64x8xf32>
    %c9_i32_80 = arith.constant 9 : i32
    %94 = arith.muli %arg2, %c9_i32_80 : i32
    %c8_i32 = arith.constant 8 : i32
    %95 = arith.addi %94, %c8_i32 : i32
    %96 = arith.index_cast %95 : i32 to index
    %c0_81 = arith.constant 0 : index
    %c0_82 = arith.constant 0 : index
    %97 = vector.load %arg4[%96, %c0_81, %c0_82] : memref<27x8x8xf32, #tpu.memory_space<vmem>>, vector<1x8x8xf32>
    %98 = vector.shape_cast %97 : vector<1x8x8xf32> to vector<8x8xf32>
    %cst_83 = arith.constant dense<0.000000e+00> : vector<64x8xf32>
    %99 = tpu.matmul %93, %98, %cst_83 {dimension_numbers = #tpu.dot_dimension_numbers<[1], [0], [0], [1], [0, 0, 1, 1], [], []>} : vector<64x8xf32>, vector<8x8xf32>, vector<64x8xf32> -> vector<64x8xf32>
    %100 = arith.addf %90, %99 : vector<64x8xf32>
    %c0_84 = arith.constant 0 : index
    %c0_85 = arith.constant 0 : index
    %101 = vector.load %arg8[%c0_84, %c0_85] : memref<64x8xf32, #tpu.memory_space<vmem>>, vector<64x8xf32>
    tpu.vector_store %arg8[%c0_84, %c0_85], %100 {strides = array<i32>} : memref<64x8xf32, #tpu.memory_space<vmem>>, vector<64x8xf32>,
    %c2_i32_86 = arith.constant 2 : i32
    %102 = arith.cmpi eq, %arg2, %c2_i32_86 : i32
    %103 = arith.extui %102 : i1 to i32
    %c0_i32_87 = arith.constant 0 : i32
    %104 = arith.cmpi ne, %103, %c0_i32_87 : i32
    scf.if %104 {
      %c0_88 = arith.constant 0 : index
      %c0_89 = arith.constant 0 : index
      %c0_90 = arith.constant 0 : index
      %c0_91 = arith.constant 0 : index
      %105 = vector.load %arg5[%c0_88, %c0_89, %c0_90, %c0_91] : memref<1x1x64x8xf32, #tpu.memory_space<vmem>>, vector<1x1x64x8xf32>
      %106 = vector.shape_cast %105 : vector<1x1x64x8xf32> to vector<64x8xf32>
      %107 = vector.shape_cast %100 : vector<64x8xf32> to vector<1x1x64x8xf32>
      tpu.vector_store %arg5[%c0_88, %c0_89, %c0_90, %c0_91], %107 {strides = array<i32>} : memref<1x1x64x8xf32, #tpu.memory_space<vmem>>, vector<1x1x64x8xf32>,
      %c0_92 = arith.constant 0 : index
      %c0_93 = arith.constant 0 : index
      %108 = vector.load %arg6[%c0_92, %c0_93] : memref<1x8xf32, #tpu.memory_space<vmem>>, vector<1x8xf32>
      %cst_94 = arith.constant dense<0.000000e+00> : vector<8xf32>
      %109 = vector.multi_reduction <add>, %100, %cst_94 [0] : vector<64x8xf32> to vector<8xf32>
      %110 = vector.shape_cast %109 : vector<8xf32> to vector<1x8xf32>
      %111 = arith.addf %108, %110 : vector<1x8xf32>
      %c0_95 = arith.constant 0 : index
      %c0_96 = arith.constant 0 : index
      %112 = vector.load %arg6[%c0_95, %c0_96] : memref<1x8xf32, #tpu.memory_space<vmem>>, vector<1x8xf32>
      tpu.vector_store %arg6[%c0_95, %c0_96], %111 {strides = array<i32>} : memref<1x8xf32, #tpu.memory_space<vmem>>, vector<1x8xf32>,
      %c0_97 = arith.constant 0 : index
      %c0_98 = arith.constant 0 : index
      %113 = vector.load %arg7[%c0_97, %c0_98] : memref<1x8xf32, #tpu.memory_space<vmem>>, vector<1x8xf32>
      %114 = arith.mulf %100, %100 : vector<64x8xf32>
      %cst_99 = arith.constant dense<0.000000e+00> : vector<8xf32>
      %115 = vector.multi_reduction <add>, %114, %cst_99 [0] : vector<64x8xf32> to vector<8xf32>
      %116 = vector.shape_cast %115 : vector<8xf32> to vector<1x8xf32>
      %117 = arith.addf %113, %116 : vector<1x8xf32>
      %c0_100 = arith.constant 0 : index
      %c0_101 = arith.constant 0 : index
      %118 = vector.load %arg7[%c0_100, %c0_101] : memref<1x8xf32, #tpu.memory_space<vmem>>, vector<1x8xf32>
      tpu.vector_store %arg7[%c0_100, %c0_101], %117 {strides = array<i32>} : memref<1x8xf32, #tpu.memory_space<vmem>>, vector<1x8xf32>,
    } else {
    }
    return
  }
  func.func @transform_0(%arg0: i32, %arg1: i32, %arg2: i32) -> (i32, i32, i32, i32, i32) {
    %0 = arith.addi %arg1, %arg2 : i32
    %c0_i32 = arith.constant 0 : i32
    %c0_i32_0 = arith.constant 0 : i32
    %c0_i32_1 = arith.constant 0 : i32
    %c0_i32_2 = arith.constant 0 : i32
    return %arg0, %0, %c0_i32, %c0_i32_0, %c0_i32_1 : i32, i32, i32, i32, i32
  }
  func.func @transform_1(%arg0: i32, %arg1: i32, %arg2: i32) -> (i32, i32, i32) {
    %c0_i32 = arith.constant 0 : i32
    %c0_i32_0 = arith.constant 0 : i32
    %c0_i32_1 = arith.constant 0 : i32
    %c0_i32_2 = arith.constant 0 : i32
    return %c0_i32, %c0_i32_0, %c0_i32_1 : i32, i32, i32
  }
  func.func @transform_2(%arg0: i32, %arg1: i32, %arg2: i32) -> (i32, i32, i32, i32) {
    %c0_i32 = arith.constant 0 : i32
    %c0_i32_0 = arith.constant 0 : i32
    %c0_i32_1 = arith.constant 0 : i32
    return %arg0, %arg1, %c0_i32, %c0_i32_0 : i32, i32, i32, i32
  }
  func.func @transform_3(%arg0: i32, %arg1: i32, %arg2: i32) -> (i32, i32) {
    %c0_i32 = arith.constant 0 : i32
    %c0_i32_0 = arith.constant 0 : i32
    %c0_i32_1 = arith.constant 0 : i32
    return %c0_i32, %c0_i32_0 : i32, i32
  }
  func.func @transform_4(%arg0: i32, %arg1: i32, %arg2: i32) -> (i32, i32) {
    %c0_i32 = arith.constant 0 : i32
    %c0_i32_0 = arith.constant 0 : i32
    %c0_i32_1 = arith.constant 0 : i32
    return %c0_i32, %c0_i32_0 : i32, i32
  }
}

</mosaic_0001>

<bundles_post_ra>
// kernel: tile.9
= control target key start
LH: loop header
LB: loop body
LE: loop exit
PB: predicated region body
PF: predicated region fallthrough
CT: control target
= control target key end

     0   :  { %s69_s10 = smov 56   ;;  %s70_s11 = smov 40   ;;  %vm3_vm0 = vcmask 64512   ;;  %vm9_vm1 = vcmask 523712   ;;  %vm15_vm2 = vcmask 458112   ;;  %vm21_vm3 = vcmask 392512   ;;  %s113_s0 = inlined_call_operand.vmem [shape: f32[8,8], index: 0, kind: input, shape index: {}]   ;;  %s114_s1 = inlined_call_operand.vmem [shape: f32[1,64], index: 1, kind: output, shape index: {}]  }
   0x1   :  { %v55_v0 = vld [vmem:[%s113_s0 + $0x7] sm:$0x1]   ;;  %v57_v1 = vld [vmem:[%s113_s0 + $0x5] sm:$0x1]   ;;  %v56_v2 = vld [vmem:[%s113_s0 + $0x6] sm:$0x1]  }
   0x2   :  { %7 = vrot.lane.b32.xlu0 %v55_v0, %s69_s10  ;;  %19 = vrot.lane.b32.xlu1 %v57_v1, %s70_s11  ;;  %v58_v3 = vld [vmem:[%s113_s0 + $0x4] sm:$0x1]   ;;  %v2_v4 = vld [vmem:[%s113_s0] sm:$0x1]   ;;  %s71_s18 = smov 48   ;;  %s72_s19 = smov 32  }
   0x3   :  { %4 = vst.msk [vmem:[#allocation0] sm:$0x1] %vm3_vm0, %v2_v4   ;;  %v59_v5 = vld [vmem:[%s113_s0 + $0x3] sm:$0x1]   ;;  %v60_v6 = vld [vmem:[%s113_s0 + $0x2] sm:$0x1]  }
   0x4   :  { %s73_s24 = smov 24   ;;  %s74_s25 = smov 16   ;;  %v61_v7 = vld [vmem:[%s113_s0 + $0x1] sm:$0x1]   ;;  %vm27_vm4 = vcmask 326912   ;;  %vm33_vm5 = vcmask 261312  }
   0x5   :  { %s75_s0 = smov 8   ;;  %vm39_vm6 = vcmask 195712   ;;  %vm45_vm7 = vcmask 130112  }
   0x6   :  { %13 = vrot.lane.b32.xlu0 %v56_v2, %s71_s18  ;;  %25 = vrot.lane.b32.xlu1 %v58_v3, %s72_s19 }
   0xa   :  { %31 = vrot.lane.b32.xlu0 %v59_v5, %s73_s24  ;;  %37 = vrot.lane.b32.xlu1 %v60_v6, %s74_s25 }
   0xe   :  { %43 = vrot.lane.b32.xlu0 %v61_v7, %s75_s0 }
  0x74   :  { %v8_v8 = vpop.permute.xlu0 %7   ;;  %v20_v9 = vpop.permute.xlu1 %19  }
  0x75   :  { %10 = vst.msk [vmem:[#allocation0] sm:$0x1] %vm9_vm1, %v8_v8  }
  0x78   :  { %v14_v10 = vpop.permute.xlu0 %13   ;;  %v26_v11 = vpop.permute.xlu1 %25  }
  0x79   :  { %16 = vst.msk [vmem:[#allocation0] sm:$0x1] %vm15_vm2, %v14_v10  }
  0x7a   :  { %22 = vst.msk [vmem:[#allocation0] sm:$0x1] %vm21_vm3, %v20_v9  }
  0x7b   :  { %28 = vst.msk [vmem:[#allocation0] sm:$0x1] %vm27_vm4, %v26_v11  }
  0x7c   :  { %v32_v12 = vpop.permute.xlu0 %31   ;;  %v38_v13 = vpop.permute.xlu1 %37  }
  0x7d   :  { %34 = vst.msk [vmem:[#allocation0] sm:$0x1] %vm33_vm5, %v32_v12  }
  0x7e   :  { %40 = vst.msk [vmem:[#allocation0] sm:$0x1] %vm39_vm6, %v38_v13  }
  0x80   :  { %v44_v14 = vpop.permute.xlu0 %43  }
  0x81   :  { %46 = vst.msk [vmem:[#allocation0] sm:$0x1] %vm45_vm7, %v44_v14  }
  0x88   :  { %v51_v15 = vld [vmem:[#allocation0] sm:$0x1] }
  0x89   :  { %54 = vst [vmem:[%s114_s1] sm:$0x1] %v51_v15 }

// kernel: tile.8
= control target key start
LH: loop header
LB: loop body
LE: loop exit
PB: predicated region body
PF: predicated region fallthrough
CT: control target
= control target key end

     0   :  { %2 = vsyncpa [#allocation1], 0  ;;  %s42_s6 = smov [#allocation0]   ;;  %s59_s0 = inlined_call_operand.hbm [shape: f32[8], index: 0, kind: input, shape index: {}]   ;;  %s60_s1 = inlined_call_operand.vmem [shape: f32[8,8], index: 1, kind: output, shape index: {}]  }
   0x1   :  { %s9_s7 = sshll.u32 %s42_s6, 4  ;;  %s10_s7 = int_to_ptr.vmem [resolvable:$true] %s9_s7 }
   0x2   :  { %s28_s8 = scalar_lea.vmem %s10_s7, 16  ;;  %s32_s9 = scalar_lea.vmem %s10_s7, 32 }
   0x3   :  { %p29_p0 = scmp.ne.s32.totalorder %s10_s7, %s28_s8  ;;  %p33_p1 = scmp.lt.s32.totalorder %s10_s7, %s10_s7 }
   0x4   :  { %p34_p2 = scmp.lt.s32.totalorder %s32_s9, %s28_s8 }
   0x6   :  { %p35_p3 = por %p34_p2, %p33_p1 }
   0x8   :  { %p36_p4 = pnand %p35_p3, %p29_p0 }
   0xa   :  { %39 = shalt.err (!%p36_p4)
}
   0xb   :  { %12 = dma.hbm_to_vmem [thread:$0]  %s59_s0, 16, %s10_s7, [#allocation1]  }
   0xc   :  { %40 = dma.done.wait [#allocation1], 16  }
   0xd   :  { %41 = vsyncadd [#allocation1], 4294967280  ;;  %v16_v0 = vld [vmem:[#allocation0] ss:$0 sm:$0xff] }
   0xe   :  { %17 = vst [vmem:[%s60_s1] sm:$0xff] %v16_v0 }
   0xf   :  { %18 = vsyncpa [#allocation1], 1 }

// kernel: decoder_block_3d.5
= control target key start
LH: loop header
LB: loop body
LE: loop exit
PB: predicated region body
PF: predicated region fallthrough
CT: control target
= control target key end

     0   :  { %8 = vsyncpa [#allocation3], 0  ;;  %s355_s12 = smov [#allocation2]   ;;  %s467_s0 = inlined_call_operand.hbm [shape: f32[128,8], index: 0, kind: input, shape index: {}]   ;;  %s468_s1 = inlined_call_operand.vmem [shape: f32[8,64], index: 1, kind: input, shape index: {}]   ;;  %s469_s2 = inlined_call_operand.vmem [shape: f32[1,64], index: 2, kind: input, shape index: {}]   ;;  %s470_s3 = inlined_call_operand.vmem [shape: f32[128,64], index: 3, kind: output, shape index: {}]  }
   0x1   :  { %s14_s13 = sshll.u32 %s355_s12, 4  ;;  %s15_s13 = int_to_ptr.vmem [resolvable:$true] %s14_s13 }
   0x2   :  { %s341_s14 = scalar_lea.vmem %s15_s13, 2048  ;;  %p346_p1 = scmp.lt.s32.totalorder %s15_s13, %s15_s13 }
   0x3   :  { %p342_p0 = scmp.ne.s32.totalorder %s15_s13, %s341_s14  ;;  %p347_p2 = scmp.lt.s32.totalorder %s341_s14, %s341_s14 }
   0x5   :  { %p348_p3 = por %p347_p2, %p346_p1 }
   0x7   :  { %p349_p4 = pnand %p348_p3, %p342_p0 }
   0x9   :  { %352 = shalt.err (!%p349_p4)
}
   0xa   :  { %s356_s15 = smov 128   ;;  %s357_s16 = smov 8  }
   0xb   :  { %20 = dma.hbm_to_vmem [thread:$0]  %s467_s0, 2048, %s15_s13, [#allocation3], %s356_s15, %s356_s15, %s357_s16  }
   0xc   :  { %353 = dma.done.wait [#allocation3], 2048  }
   0xd   :  { %354 = vsyncadd [#allocation3], 4294965248  ;;  %v44_v0 = vld [vmem:[%s468_s1] sm:$0xff]  ;;  %vm52_vm0 = vcmask 64512   ;;  %v29_v3 = vld [vmem:[#allocation2 + $0x8] sm:$0xff]  ;;  %vm246_vm1 = vcmask 523264  }
   0xe   :  { %v28_v1 = vld [vmem:[#allocation2] sm:$0xff]  ;;  %302 = vmatprep.subr.mxu0 %v44_v0  ;;  %328 = vmatprep.subr.mxu1 %v44_v0  ;;  %v37_v4 = vld [vmem:[#allocation2 + $0x48] sm:$0xff]  ;;  %v30_v5 = vld [vmem:[#allocation2 + $0x10] sm:$0xff] }
   0xf   :  { %v36_v2 = vld [vmem:[#allocation2 + $0x40] sm:$0xff]  ;;  %303 = vmatpush3.msra.mxu0 %v44_v0  ;;  %329 = vmatpush3.msra.mxu1 %v44_v0  ;;  %v38_v6 = vld [vmem:[#allocation2 + $0x50] sm:$0xff]  ;;  %v31_v7 = vld [vmem:[#allocation2 + $0x18] sm:$0xff] }
  0x10   :  { %304 = vmatprep.mubr.msk.f32.mxu0 %vm52_vm0, %v28_v1  ;;  %316 = vmatprep.mubr.msk.f32.mxu1 %vm52_vm0, %v36_v2  ;;  %v39_v8 = vld [vmem:[#allocation2 + $0x58] sm:$0xff]  ;;  %v32_v9 = vld [vmem:[#allocation2 + $0x20] sm:$0xff]  ;;  %v33_v11 = vld [vmem:[#allocation2 + $0x28] sm:$0xff] }
  0x11   :  { %305 = vmatmul.mubr.msk.f32.vlgmr.msra.gmra.mxu0 %vm52_vm0, %v29_v3  ;;  %317 = vmatmul.mubr.msk.f32.vlgmr.msra.gmra.mxu1 %vm52_vm0, %v37_v4  ;;  %v40_v10 = vld [vmem:[#allocation2 + $0x60] sm:$0xff]  ;;  %v41_v12 = vld [vmem:[#allocation2 + $0x68] sm:$0xff]  ;;  %v34_v13 = vld [vmem:[#allocation2 + $0x30] sm:$0xff] }
  0x12   :  { %307 = vmatprep.mubr.msk.f32.mxu0 %vm52_vm0, %v30_v5  ;;  %319 = vmatprep.mubr.msk.f32.mxu1 %vm52_vm0, %v38_v6  ;;  %v42_v14 = vld [vmem:[#allocation2 + $0x70] sm:$0xff]  ;;  %v35_v15 = vld [vmem:[#allocation2 + $0x38] sm:$0xff]  ;;  %v268_v17 = vld [vmem:[%s469_s2] ss:$0 sm:$0xff] }
  0x13   :  { %v43_v16 = vld [vmem:[#allocation2 + $0x78] sm:$0xff] }
  0x15   :  { %308 = vmatmul.mubr.msk.f32.gmra.mxu0 %vm52_vm0, %v31_v7  ;;  %320 = vmatmul.mubr.msk.f32.gmra.mxu1 %vm52_vm0, %v39_v8 }
  0x16   :  { %310 = vmatprep.mubr.msk.f32.mxu0 %vm52_vm0, %v32_v9  ;;  %322 = vmatprep.mubr.msk.f32.mxu1 %vm52_vm0, %v40_v10 }
  0x19   :  { %311 = vmatmul.mubr.msk.f32.gmra.mxu0 %vm52_vm0, %v33_v11  ;;  %323 = vmatmul.mubr.msk.f32.gmra.mxu1 %vm52_vm0, %v41_v12 }
  0x1a   :  { %313 = vmatprep.mubr.msk.f32.mxu0 %vm52_vm0, %v34_v13  ;;  %325 = vmatprep.mubr.msk.f32.mxu1 %vm52_vm0, %v42_v14 }
  0x1d   :  { %314 = vmatmul.mubr.msk.f32.gmra.mxu0 %vm52_vm0, %v35_v15  ;;  %326 = vmatmul.mubr.msk.f32.gmra.mxu1 %vm52_vm0, %v43_v16 }
  0xd1   :  { %v306_v18 = vpop.f32.mrf.mxu0  ;;  %v318_v19 = vpop.f32.mrf.mxu1 }
  0xd2   :  { %v173_v20 = vadd.f32 %v306_v18, %v268_v17  ;;  %v213_v21 = vadd.f32 %v318_v19, %v268_v17 }
  0xd3   :  { %v167_v22 = vpop.f32.mrf.mxu0  ;;  %v207_v23 = vpop.f32.mrf.mxu1 }
  0xd4   :  { %248 = vst.msk [vmem:[%s470_s3 + $0x8] sm:$0xff] %vm246_vm1, %v173_v20  ;;  %256 = vst.msk [vmem:[%s470_s3 + $0x48] sm:$0xff] %vm246_vm1, %v213_v21  ;;  %v168_v24 = vadd.f32 %v268_v17, %v167_v22  ;;  %v208_v25 = vadd.f32 %v268_v17, %v207_v23 }
  0xd5   :  { %v309_v26 = vpop.f32.mrf.mxu0  ;;  %v321_v27 = vpop.f32.mrf.mxu1 }
  0xd6   :  { %247 = vst.msk [vmem:[%s470_s3] sm:$0xff] %vm246_vm1, %v168_v24  ;;  %255 = vst.msk [vmem:[%s470_s3 + $0x40] sm:$0xff] %vm246_vm1, %v208_v25  ;;  %v183_v28 = vadd.f32 %v309_v26, %v268_v17  ;;  %v223_v29 = vadd.f32 %v321_v27, %v268_v17 }
  0xd7   :  { %v177_v30 = vpop.f32.mrf.mxu0  ;;  %v217_v31 = vpop.f32.mrf.mxu1 }
  0xd8   :  { %250 = vst.msk [vmem:[%s470_s3 + $0x18] sm:$0xff] %vm246_vm1, %v183_v28  ;;  %258 = vst.msk [vmem:[%s470_s3 + $0x58] sm:$0xff] %vm246_vm1, %v223_v29  ;;  %v178_v32 = vadd.f32 %v268_v17, %v177_v30  ;;  %v218_v33 = vadd.f32 %v268_v17, %v217_v31 }
  0xd9   :  { %v312_v34 = vpop.f32.mrf.mxu0  ;;  %v324_v35 = vpop.f32.mrf.mxu1 }
  0xda   :  { %249 = vst.msk [vmem:[%s470_s3 + $0x10] sm:$0xff] %vm246_vm1, %v178_v32  ;;  %257 = vst.msk [vmem:[%s470_s3 + $0x50] sm:$0xff] %vm246_vm1, %v218_v33  ;;  %v193_v36 = vadd.f32 %v312_v34, %v268_v17  ;;  %v233_v37 = vadd.f32 %v324_v35, %v268_v17 }
  0xdb   :  { %v187_v38 = vpop.f32.mrf.mxu0  ;;  %v227_v39 = vpop.f32.mrf.mxu1 }
  0xdc   :  { %252 = vst.msk [vmem:[%s470_s3 + $0x28] sm:$0xff] %vm246_vm1, %v193_v36  ;;  %260 = vst.msk [vmem:[%s470_s3 + $0x68] sm:$0xff] %vm246_vm1, %v233_v37  ;;  %v188_v40 = vadd.f32 %v268_v17, %v187_v38  ;;  %v228_v41 = vadd.f32 %v268_v17, %v227_v39 }
  0xdd   :  { %v315_v42 = vpop.f32.mrf.mxu0  ;;  %v327_v43 = vpop.f32.mrf.mxu1 }
  0xde   :  { %251 = vst.msk [vmem:[%s470_s3 + $0x20] sm:$0xff] %vm246_vm1, %v188_v40  ;;  %259 = vst.msk [vmem:[%s470_s3 + $0x60] sm:$0xff] %vm246_vm1, %v228_v41  ;;  %v203_v44 = vadd.f32 %v315_v42, %v268_v17  ;;  %v243_v45 = vadd.f32 %v327_v43, %v268_v17 }
  0xdf   :  { %v197_v46 = vpop.f32.mrf.mxu0  ;;  %v237_v47 = vpop.f32.mrf.mxu1 }
  0xe0   :  { %254 = vst.msk [vmem:[%s470_s3 + $0x38] sm:$0xff] %vm246_vm1, %v203_v44  ;;  %262 = vst.msk [vmem:[%s470_s3 + $0x78] sm:$0xff] %vm246_vm1, %v243_v45  ;;  %v198_v48 = vadd.f32 %v268_v17, %v197_v46  ;;  %v238_v49 = vadd.f32 %v268_v17, %v237_v47 }
  0xe2   :  { %253 = vst.msk [vmem:[%s470_s3 + $0x30] sm:$0xff] %vm246_vm1, %v198_v48  ;;  %261 = vst.msk [vmem:[%s470_s3 + $0x70] sm:$0xff] %vm246_vm1, %v238_v49 }
  0xe3   :  { %267 = vsyncpa [#allocation3], 1 }

// kernel: decoder_block_3d.6
= control target key start
LH: loop header
LB: loop body
LE: loop exit
PB: predicated region body
PF: predicated region fallthrough
CT: control target
= control target key end

     0   :  { %s2429_s15 = smov 0   ;;  %s2431_s16 = smov 0   ;;  %s2866_s0 = inlined_call_operand.vmem [shape: f32[2,10,10,10,14], index: 0, kind: input, shape index: {}]   ;;  %s2867_s1 = inlined_call_operand.vmem [shape: f32[27,14,8], index: 1, kind: input, shape index: {}]   ;;  %s2868_s2 = inlined_call_operand.vmem [shape: f32[2,8,64,8], index: 2, kind: output, shape index: {0}]   ;;  %s2869_s3 = inlined_call_operand.vmem [shape: f32[1,8], index: 3, kind: output, shape index: {1}]   ;;  %s2870_s4 = inlined_call_operand.vmem [shape: f32[1,8], index: 4, kind: output, shape index: {2}]  }
   0x1   :  { %s2433_s17 = smov 0   ;;  %s2435_s18 = smov 0  }
   0x2   :  { %s2437_s19 = smov 0   ;;  %s2439_s20 = smov 0  }
   0x3   :  { %s2441_s21 = smov 0  }
   0x4 LB: > { %s27_s22 = sadd.s32 1, %s2388_s18  ;;  %s30_s23 = sadd.s32 1, %s2392_s19  ;;  %s2400_s21 = sphi %s2441_s21, %s15_s21   ;;  %s2396_s20 = sphi %s2439_s20, %s2878_s20   ;;  %s2392_s19 = sphi %s2437_s19, %s2877_s19   ;;  %s2388_s18 = sphi %s2435_s18, %s2876_s18   ;;  %s2384_s17 = sphi %s2433_s17, %s2875_s17   ;;  %s2380_s16 = sphi %s2431_s16, %s2874_s16   ;;  %s2376_s15 = sphi %s2429_s15, %s2873_s15  }
   0x5   : > { %p28_p0 = scmp.ge.s32.totalorder %s27_s22, 3  ;;  %p1885_p1 = scmp.ge.s32.totalorder %s2400_s21, 1 }
   0x6   : > { %p188_p2 = scmp.lt.s32.totalorder %s2400_s21, 49  ;;  %s34_s24 = sadd.s32 1, %s2396_s20 }
   0x7   : > { %s2880_s22 = smov (%p28_p0, %s27_s22), 0  ;;  %s2882_s23 = smov (!%p28_p0, %s30_s23), %s2392_s19 }
   0x8   : > { %p189_p3 = pnand %p1885_p1, %p188_p2  ;;  %p32_p4 = scmp.ge.s32.totalorder %s2882_s23, 8 }
   0x9   : > { %s223_s25 = sadd.s32 (!%p189_p3), %s2376_s15, %s2380_s16  ;;  %p224_p6 = scmp.lt.s32.totalorder (!%p189_p3), %s2384_s17, 1 }
   0xa   : > { %s2884_s23 = smov (%p32_p4, %s2882_s23), 0  ;;  %s2886_s24 = smov (!%p32_p4, %s34_s24), %s2396_s20 }
   0xb   : > { %p36_p5 = scmp.ge.s32.totalorder %s2886_s24, 2  ;;  %192 = sbr.rel (%p189_p3) target bundleno = 352 (0x160), region = 28 }
   0xc   : > { %p226_p7 = scmp.lt.s32.totalorder (!%p189_p3), %s223_s25, 9  ;;  %p236_p8 = scmp.lt.s32.totalorder (!%p189_p3), %s2380_s16, 7 }
   0xd   : > { %s2888_s24 = smov (%p36_p5, %s2886_s24), 0  ;;  %p243_p9 = scmp.eq.s32.totalorder (!%p189_p3), %s2384_s17, 0 }
   0xe   : > { %2871 = sst [smem:[#allocation3_spill]] %s2888_s24  ;;  %p244_p10 = scmp.eq.s32.totalorder (!%p189_p3), %s2380_s16, 0 }
   0xf   : > { %p247_p12 = scmp.eq.s32.totalorder (!%p189_p3), %s2376_s15, 0 }
  0x10   : > { %s225_s26 = scalar_select %p224_p6, %s2384_s17, 1 }
  0x11   : > { %s2890_s25 = smov (!%p226_p7, %s223_s25), 9  ;;  %p245_p11 = pnand %p244_p10, %p243_p9 }
  0x12   : > { %s2287_s27 = smul.u32 200, %s225_s26  ;;  %s1888_s28 = sshll.u32 %s225_s26, 6 }
  0x13   : > { %s2286_s29 = smul.u32 20, %s2890_s25  ;;  %p246_p13 = pneg %p245_p11 }
  0x14   : > { %s237_s30 = scalar_select %p236_p8, %s2380_s16, 7 }
  0x15   : > { %s230_s5 = sadd.s32 %s2287_s27, %s2286_s29  ;;  %p248_p0 = pnand %p247_p12, %p246_p13 }
  0x16   : > { %s1886_s6 = sshll.u32 %s230_s5, 3  ;;  %s1887_s7 = sshll.u32 %s237_s30, 3 }
  0x17   : > { %s2488_s10 = scalar_lea.vmem %s2866_s0, %s1886_s6  ;;  %s240_s11 = sadd.s32 %s1888_s28, %s1887_s7 }
  0x18   : > { %s1889_s12 = sshll.u32 %s240_s11, 3  ;;  %251 = sbr.rel (%p248_p0) target bundleno = 31 (0x1f), region = 32 }
  0x19   : > { %s2493_s24 = scalar_lea.vmem %s2868_s2, %s1889_s12 }
  0x1d   : > { %vm252_vm0 = vcmask 57344   ;;  %v2402_v0 = vmov 0.0  }
  0x1e   : > { %253 = vst.msk [vmem:[%s2869_s3] sm:$0x1] %vm252_vm0, %v2402_v0  ;;  %254 = vst.msk [vmem:[%s2870_s4] sm:$0x1] %vm252_vm0, %v2402_v0 }
  0x1f PF: > { %p1890_p1 = scmp.ne.s32.totalorder %s2376_s15, 0 }
  0x21   : > { %257 = sbr.rel (%p1890_p1) target bundleno = 43 (0x2b), region = 36 }
  0x26   : > { %vm258_vm1 = vcmask 64512   ;;  %v2403_v1 = vmov 0.0  }
  0x27   : > { %259 = vst.msk [vmem:[#allocation2] sm:$0xff] %vm258_vm1, %v2403_v1  ;;  %260 = vst.msk [vmem:[#allocation2 + $0x8] sm:$0xff] %vm258_vm1, %v2403_v1 }
  0x28   : > { %261 = vst.msk [vmem:[#allocation2 + $0x10] sm:$0xff] %vm258_vm1, %v2403_v1  ;;  %262 = vst.msk [vmem:[#allocation2 + $0x18] sm:$0xff] %vm258_vm1, %v2403_v1 }
  0x29   : > { %263 = vst.msk [vmem:[#allocation2 + $0x20] sm:$0xff] %vm258_vm1, %v2403_v1  ;;  %264 = vst.msk [vmem:[#allocation2 + $0x28] sm:$0xff] %vm258_vm1, %v2403_v1 }
  0x2a   : > { %265 = vst.msk [vmem:[#allocation2 + $0x30] sm:$0xff] %vm258_vm1, %v2403_v1  ;;  %266 = vst.msk [vmem:[#allocation2 + $0x38] sm:$0xff] %vm258_vm1, %v2403_v1 }
  0x2b PF: > { %s1891_s27 = smul.u32 144, %s2376_s15  ;;  %v2505_v2 = vld [vmem:[%s2488_s10 + $0x40] sm:$0xff]  ;;  %vm288_vm2 = vcmask 113664   ;;  %vm313_vm3 = vcmask 1045504   ;;  %v2523_v6 = vld [vmem:[%s2488_s10 + $0x50] sm:$0xff]  ;;  %vm1656_vm4 = vcmask 64512  }
  0x2c   : > { %v275_v3 = vld [vmem:[%s2488_s10] sm:$0xff]  ;;  %2148 = vmatprep.mubr.msk.f32.mxu1 %vm288_vm2, %v2505_v2  ;;  %v2527_v8 = vld [vmem:[%s2488_s10 + $0x10] sm:$0xff]  ;;  %p2045_p2 = scmp.ne.s32.totalorder %s2376_s15, 2 }
  0x2d   : > { %2142 = vmatprep.mubr.msk.f32.mxu0 %vm288_vm2, %v275_v3  ;;  %s2514_s30 = scalar_lea.vmem %s2867_s1, %s1891_s27  ;;  %v2531_v10 = vld [vmem:[%s2488_s10 + $0x60] sm:$0xff]  ;;  %v2543_v12 = vld [vmem:[%s2488_s10 + $0x70] sm:$0xff] }
  0x2e   : > { %v287_v4 = vld [vmem:[%s2514_s30 + $0x8] sm:$0x3f]  ;;  %v286_v5 = vld [vmem:[%s2514_s30] sm:$0xff]  ;;  %v1903_v7 = vld [vmem:[%s2514_s30 + $0x18] sm:$0x3f] }
  0x2f   : > { %2282 = vmatprep.subr.msk.mxu1 %vm313_vm3, %v287_v4  ;;  %2138 = vmatprep.subr.msk.mxu0 %vm313_vm3, %v287_v4  ;;  %v1915_v9 = vld [vmem:[%s2514_s30 + $0x28] sm:$0x3f]  ;;  %v2537_v11 = vld [vmem:[%s2488_s10 + $0x20] sm:$0xff]  ;;  %v1902_v13 = vld [vmem:[%s2514_s30 + $0x10] sm:$0xff] }
  0x30   : > { %2284 = vmatpush3.msk.msra.mxu1 %vm313_vm3, %v287_v4  ;;  %2139 = vmatpush3.msk.msra.mxu0 %vm313_vm3, %v287_v4  ;;  %v2550_v14 = vld [vmem:[%s2488_s10 + $0x30] sm:$0xff]  ;;  %v1914_v15 = vld [vmem:[%s2514_s30 + $0x20] sm:$0xff]  ;;  %v1935_v19 = vld [vmem:[%s2514_s30 + $0x38] sm:$0x3f] }
  0x31   : > { %2283 = vmatprep.subr.mxu1 %v286_v5  ;;  %2140 = vmatprep.subr.mxu0 %v286_v5  ;;  %v430_v16 = vld [vmem:[%s2488_s10 + $0x1] sm:$0xff]  ;;  %v431_v18 = vld [vmem:[%s2488_s10 + $0x11] sm:$0xff] }
  0x32   : > { %2285 = vmatpush3.msra.mxu1 %v286_v5  ;;  %2141 = vmatpush3.msra.mxu0 %v286_v5  ;;  %v583_v17 = vld [vmem:[%s2488_s10 + $0x2] sm:$0xff]  ;;  %v2566_v20 = vld [vmem:[%s2488_s10 + $0x12] sm:$0xff] }
  0x33   : > { %2149 = vmatmul.mubr.msk.f32.vlgmr.msra.gmra.mxu1 %vm288_vm2, %v2523_v6  ;;  %2154 = vmatprep.subr.msk.mxu1 %vm313_vm3, %v1903_v7  ;;  %v1955_v21 = vld [vmem:[%s2514_s30 + $0x48] sm:$0x3f]  ;;  %v2582_v24 = vld [vmem:[%s2488_s10 + $0x31] sm:$0xff]  ;;  %v1954_v29 = vld [vmem:[%s2514_s30 + $0x40] sm:$0xff] }
  0x34   : > { %2143 = vmatmul.mubr.msk.f32.vlgmr.msra.gmra.mxu0 %vm288_vm2, %v2527_v8  ;;  %2155 = vmatpush3.msk.msra.mxu1 %vm313_vm3, %v1903_v7  ;;  %v2571_v22 = vld [vmem:[%s2488_s10 + $0x21] sm:$0xff]  ;;  %v1934_v25 = vld [vmem:[%s2514_s30 + $0x30] sm:$0xff]  ;;  %v1975_v30 = vld [vmem:[%s2514_s30 + $0x58] sm:$0x3f] }
  0x35   : > { %2170 = vmatprep.subr.msk.mxu0 %vm313_vm3, %v1915_v9  ;;  %2151 = vmatprep.mubr.msk.f32.mxu1 %vm288_vm2, %v2531_v10  ;;  %v2576_v23 = vld [vmem:[%s2488_s10 + $0x22] sm:$0xff]  ;;  %v2589_v26 = vld [vmem:[%s2488_s10 + $0x32] sm:$0xff] }
  0x36   : > { %2171 = vmatpush3.msk.msra.mxu0 %vm313_vm3, %v1915_v9  ;;  %2145 = vmatprep.mubr.msk.f32.mxu0 %vm288_vm2, %v2537_v11  ;;  %v2592_v27 = vld [vmem:[%s2488_s10 + $0x41] sm:$0xff]  ;;  %v2609_v31 = vld [vmem:[%s2488_s10 + $0x51] sm:$0xff] }
  0x37   : > { %2152 = vmatmul.mubr.msk.f32.gmra.mxu1 %vm288_vm2, %v2543_v12  ;;  %2156 = vmatprep.subr.mxu1 %v1902_v13  ;;  %v2598_v28 = vld [vmem:[%s2488_s10 + $0x42] sm:$0xff]  ;;  %v2614_v32 = vld [vmem:[%s2488_s10 + $0x52] sm:$0xff] }
  0x38   : > { %2146 = vmatmul.mubr.msk.f32.gmra.mxu0 %vm288_vm2, %v2550_v14  ;;  %2157 = vmatpush3.msra.mxu1 %v1902_v13  ;;  %v2617_v33 = vld [vmem:[%s2488_s10 + $0x61] sm:$0xff]  ;;  %v2631_v36 = vld [vmem:[%s2488_s10 + $0x71] sm:$0xff] }
  0x39   : > { %2172 = vmatprep.subr.mxu0 %v1914_v15  ;;  %2158 = vmatprep.mubr.msk.f32.mxu1 %vm288_vm2, %v430_v16  ;;  %v2620_v34 = vld [vmem:[%s2488_s10 + $0x62] sm:$0xff]  ;;  %v2636_v37 = vld [vmem:[%s2488_s10 + $0x72] sm:$0xff] }
  0x3a   : > { %2173 = vmatpush3.msra.mxu0 %v1914_v15  ;;  %2174 = vmatprep.mubr.msk.f32.mxu0 %vm288_vm2, %v583_v17  ;;  %v1995_v35 = vld [vmem:[%s2514_s30 + $0x68] sm:$0x3f]  ;;  %v1974_v38 = vld [vmem:[%s2514_s30 + $0x50] sm:$0xff]  ;;  %v1994_v39 = vld [vmem:[%s2514_s30 + $0x60] sm:$0xff] }
  0x3b   : > { %2159 = vmatmul.mubr.msk.f32.vlgmr.msra.gmra.mxu1 %vm288_vm2, %v431_v18  ;;  %2186 = vmatprep.subr.msk.mxu1 %vm313_vm3, %v1935_v19  ;;  %v2015_v40 = vld [vmem:[%s2514_s30 + $0x78] sm:$0x3f]  ;;  %v2035_v41 = vld [vmem:[%s2514_s30 + $0x88] sm:$0x3f]  ;;  %v1932_v42 = vld [vmem:[%s2488_s10 + $0x80] sm:$0xff] }
  0x3c   : > { %2175 = vmatmul.mubr.msk.f32.vlgmr.msra.gmra.mxu0 %vm288_vm2, %v2566_v20  ;;  %2187 = vmatpush3.msk.msra.mxu1 %vm313_vm3, %v1935_v19  ;;  %v1952_v43 = vld [vmem:[%s2488_s10 + $0x81] sm:$0xff]  ;;  %v2014_v44 = vld [vmem:[%s2514_s30 + $0x70] sm:$0xff] }
  0x3d   : > { %2202 = vmatprep.subr.msk.mxu0 %vm313_vm3, %v1955_v21  ;;  %2161 = vmatprep.mubr.msk.f32.mxu1 %vm288_vm2, %v2571_v22  ;;  %v2034_v45 = vld [vmem:[%s2514_s30 + $0x80] sm:$0xff]  ;;  %v1992_v47 = vld [vmem:[%s2488_s10 + $0x90] sm:$0xff] }
  0x3e   : > { %2203 = vmatpush3.msk.msra.mxu0 %vm313_vm3, %v1955_v21  ;;  %2177 = vmatprep.mubr.msk.f32.mxu0 %vm288_vm2, %v2576_v23  ;;  %v1972_v46 = vld [vmem:[%s2488_s10 + $0x82] sm:$0xff]  ;;  %v2012_v48 = vld [vmem:[%s2488_s10 + $0x91] sm:$0xff] }
  0x3f   : > { %2162 = vmatmul.mubr.msk.f32.gmra.mxu1 %vm288_vm2, %v2582_v24  ;;  %2188 = vmatprep.subr.mxu1 %v1934_v25  ;;  %v2032_v49 = vld [vmem:[%s2488_s10 + $0x92] sm:$0xff] }
  0x40   : > { %2178 = vmatmul.mubr.msk.f32.gmra.mxu0 %vm288_vm2, %v2589_v26  ;;  %2164 = vmatprep.mubr.msk.f32.mxu1 %vm288_vm2, %v2592_v27 }
  0x41   : > { %2180 = vmatprep.mubr.msk.f32.mxu0 %vm288_vm2, %v2598_v28  ;;  %2189 = vmatpush3.msra.mxu1 %v1934_v25 }
  0x42   : > { %2204 = vmatprep.subr.mxu0 %v1954_v29  ;;  %2218 = vmatprep.subr.msk.mxu1 %vm313_vm3, %v1975_v30 }
  0x43   : > { %2165 = vmatmul.mubr.msk.f32.gmra.mxu1 %vm288_vm2, %v2609_v31  ;;  %2205 = vmatpush3.msra.mxu0 %v1954_v29 }
  0x44   : > { %2181 = vmatmul.mubr.msk.f32.gmra.mxu0 %vm288_vm2, %v2614_v32  ;;  %2167 = vmatprep.mubr.msk.f32.mxu1 %vm288_vm2, %v2617_v33 }
  0x45   : > { %2183 = vmatprep.mubr.msk.f32.mxu0 %vm288_vm2, %v2620_v34  ;;  %2234 = vmatprep.subr.msk.mxu0 %vm313_vm3, %v1995_v35 }
  0x47   : > { %2168 = vmatmul.mubr.msk.f32.gmra.mxu1 %vm288_vm2, %v2631_v36 }
  0x48   : > { %2184 = vmatmul.mubr.msk.f32.gmra.mxu0 %vm288_vm2, %v2636_v37  ;;  %2190 = vmatprep.mubr.msk.f32.mxu1 %vm288_vm2, %v2527_v8 }
  0x49   : > { %2206 = vmatprep.mubr.msk.f32.mxu0 %vm288_vm2, %v431_v18 }
  0x4b   : > { %2191 = vmatmul.mubr.msk.f32.vlgmr.msra.gmra.mxu1 %vm288_vm2, %v2537_v11 }
  0x4c   : > { %2207 = vmatmul.mubr.msk.f32.vlgmr.msra.gmra.mxu0 %vm288_vm2, %v2571_v22  ;;  %2219 = vmatpush3.msk.msra.mxu1 %vm313_vm3, %v1975_v30 }
  0x4d   : > { %2193 = vmatprep.mubr.msk.f32.mxu1 %vm288_vm2, %v2550_v14  ;;  %2235 = vmatpush3.msk.msra.mxu0 %vm313_vm3, %v1995_v35 }
  0x4e   : > { %2209 = vmatprep.mubr.msk.f32.mxu0 %vm288_vm2, %v2582_v24  ;;  %2220 = vmatprep.subr.mxu1 %v1974_v38 }
  0x4f   : > { %2194 = vmatmul.mubr.msk.f32.gmra.mxu1 %vm288_vm2, %v2505_v2  ;;  %2236 = vmatprep.subr.mxu0 %v1994_v39 }
  0x50   : > { %2210 = vmatmul.mubr.msk.f32.gmra.mxu0 %vm288_vm2, %v2592_v27  ;;  %2196 = vmatprep.mubr.msk.f32.mxu1 %vm288_vm2, %v2523_v6 }
  0x51   : > { %2212 = vmatprep.mubr.msk.f32.mxu0 %vm288_vm2, %v2609_v31  ;;  %2221 = vmatpush3.msra.mxu1 %v1974_v38 }
  0x52   : > { %2237 = vmatpush3.msra.mxu0 %v1994_v39  ;;  %2250 = vmatprep.subr.msk.mxu1 %vm313_vm3, %v2015_v40  ;;  %v271_v39 = vld [vmem:[#allocation2 + $0x20] sm:$0xff] }
  0x53   : > { %2197 = vmatmul.mubr.msk.f32.gmra.mxu1 %vm288_vm2, %v2531_v10  ;;  %2266 = vmatprep.subr.msk.mxu0 %vm313_vm3, %v2035_v41 }
  0x54   : > { %2213 = vmatmul.mubr.msk.f32.gmra.mxu0 %vm288_vm2, %v2617_v33  ;;  %2199 = vmatprep.mubr.msk.f32.mxu1 %vm288_vm2, %v2543_v12 }
  0x55   : > { %2215 = vmatprep.mubr.msk.f32.mxu0 %vm288_vm2, %v2631_v36 }
  0x57   : > { %2200 = vmatmul.mubr.msk.f32.gmra.mxu1 %vm288_vm2, %v1932_v42 }
  0x58   : > { %2216 = vmatmul.mubr.msk.f32.gmra.mxu0 %vm288_vm2, %v1952_v43  ;;  %2222 = vmatprep.mubr.msk.f32.mxu1 %vm288_vm2, %v2566_v20  ;;  %v268_v20 = vld [vmem:[#allocation2 + $0x8] sm:$0xff] }
  0x59   : > { %2238 = vmatprep.mubr.msk.f32.mxu0 %vm288_vm2, %v2537_v11 }
  0x5b   : > { %2223 = vmatmul.mubr.msk.f32.vlgmr.msra.gmra.mxu1 %vm288_vm2, %v2576_v23 }
  0x5c   : > { %2239 = vmatmul.mubr.msk.f32.vlgmr.msra.gmra.mxu0 %vm288_vm2, %v2550_v14  ;;  %2251 = vmatpush3.msk.msra.mxu1 %vm313_vm3, %v2015_v40 }
  0x5d   : > { %2225 = vmatprep.mubr.msk.f32.mxu1 %vm288_vm2, %v2589_v26  ;;  %2267 = vmatpush3.msk.msra.mxu0 %vm313_vm3, %v2035_v41 }
  0x5e   : > { %2241 = vmatprep.mubr.msk.f32.mxu0 %vm288_vm2, %v2505_v2  ;;  %2252 = vmatprep.subr.mxu1 %v2014_v44 }
  0x5f   : > { %2226 = vmatmul.mubr.msk.f32.gmra.mxu1 %vm288_vm2, %v2598_v28  ;;  %2268 = vmatprep.subr.mxu0 %v2034_v45 }
  0x60   : > { %2242 = vmatmul.mubr.msk.f32.gmra.mxu0 %vm288_vm2, %v2523_v6  ;;  %2228 = vmatprep.mubr.msk.f32.mxu1 %vm288_vm2, %v2614_v32 }
  0x61   : > { %2244 = vmatprep.mubr.msk.f32.mxu0 %vm288_vm2, %v2531_v10  ;;  %2253 = vmatpush3.msra.mxu1 %v2014_v44 }
  0x62   : > { %2269 = vmatpush3.msra.mxu0 %v2034_v45 }
  0x63   : > { %2229 = vmatmul.mubr.msk.f32.gmra.mxu1 %vm288_vm2, %v2620_v34 }
  0x64   : > { %2245 = vmatmul.mubr.msk.f32.gmra.mxu0 %vm288_vm2, %v2543_v12  ;;  %2231 = vmatprep.mubr.msk.f32.mxu1 %vm288_vm2, %v2636_v37 }
  0x65   : > { %2247 = vmatprep.mubr.msk.f32.mxu0 %vm288_vm2, %v1932_v42 }
  0x67   : > { %2232 = vmatmul.mubr.msk.f32.gmra.mxu1 %vm288_vm2, %v1972_v46 }
  0x68   : > { %2248 = vmatmul.mubr.msk.f32.gmra.mxu0 %vm288_vm2, %v1992_v47  ;;  %2254 = vmatprep.mubr.msk.f32.mxu1 %vm288_vm2, %v2571_v22 }
  0x69   : > { %2270 = vmatprep.mubr.msk.f32.mxu0 %vm288_vm2, %v2576_v23  ;;  %v267_v23 = vld [vmem:[#allocation2] sm:$0xff] }
  0x6b   : > { %2255 = vmatmul.mubr.msk.f32.vlgmr.msra.gmra.mxu1 %vm288_vm2, %v2582_v24 }
  0x6c   : > { %2271 = vmatmul.mubr.msk.f32.vlgmr.msra.gmra.mxu0 %vm288_vm2, %v2589_v26  ;;  %2257 = vmatprep.mubr.msk.f32.mxu1 %vm288_vm2, %v2592_v27  ;;  %v270_v27 = vld [vmem:[#allocation2 + $0x18] sm:$0xff] }
  0x6d   : > { %2273 = vmatprep.mubr.msk.f32.mxu0 %vm288_vm2, %v2598_v28 }
  0x6f   : > { %2258 = vmatmul.mubr.msk.f32.gmra.mxu1 %vm288_vm2, %v2609_v31 }
  0x70   : > { %2274 = vmatmul.mubr.msk.f32.gmra.mxu0 %vm288_vm2, %v2614_v32  ;;  %2260 = vmatprep.mubr.msk.f32.mxu1 %vm288_vm2, %v2617_v33  ;;  %v269_v32 = vld [vmem:[#allocation2 + $0x10] sm:$0xff] }
  0x71   : > { %2276 = vmatprep.mubr.msk.f32.mxu0 %vm288_vm2, %v2620_v34 }
  0x73   : > { %2261 = vmatmul.mubr.msk.f32.gmra.mxu1 %vm288_vm2, %v2631_v36 }
  0x74   : > { %2277 = vmatmul.mubr.msk.f32.gmra.mxu0 %vm288_vm2, %v2636_v37  ;;  %2263 = vmatprep.mubr.msk.f32.mxu1 %vm288_vm2, %v1952_v43  ;;  %v272_v37 = vld [vmem:[#allocation2 + $0x28] sm:$0xff] }
  0x75   : > { %2279 = vmatprep.mubr.msk.f32.mxu0 %vm288_vm2, %v1972_v46  ;;  %v274_v46 = vld [vmem:[#allocation2 + $0x38] sm:$0xff] }
  0x77   : > { %2264 = vmatmul.mubr.msk.f32.gmra.mxu1 %vm288_vm2, %v2012_v48 }
  0x78   : > { %2280 = vmatmul.mubr.msk.f32.gmra.mxu0 %vm288_vm2, %v2032_v49 }
  0xf3   : > { %v2150_v50 = vpop.f32.mrf.mxu1 }
  0xf4   : > { %v2144_v51 = vpop.f32.mrf.mxu0  ;;  %v427_v45 = vadd.f32 %v2150_v50, %v272_v37 }
  0xf5   : > { %v2747_v52 = vpop.f32.mrf.mxu1  ;;  %v423_v25 = vadd.f32 %v2144_v51, %v268_v20 }
  0xf6   : > { %v383_v53 = vpop.f32.mrf.mxu0 }
  0xf7   : > { %v2749_v54 = vpop.f32.mrf.mxu1  ;;  %v422_v29 = vadd.f32 %v383_v53, %v267_v23  ;;  %v426_v53 = vadd.f32 %v2747_v52, %v271_v39 }
  0xf8   : > { %v2147_v55 = vpop.f32.mrf.mxu0 }
  0xf9   : > { %v2751_v56 = vpop.f32.mrf.mxu1  ;;  %v425_v34 = vadd.f32 %v2147_v55, %v270_v27  ;;  %v273_v55 = vld [vmem:[#allocation2 + $0x30] sm:$0xff] }
  0xfa   : > { %v393_v57 = vpop.f32.mrf.mxu0 }
  0xfb   : > { %v2160_v58 = vpop.f32.mrf.mxu1  ;;  %v424_v40 = vadd.f32 %v393_v57, %v269_v32  ;;  %v429_v57 = vadd.f32 %v2749_v54, %v274_v46 }
  0xfc   : > { %v2176_v59 = vpop.f32.mrf.mxu0  ;;  %v576_v30 = vadd.f32 %v2160_v58, %v423_v25 }
  0xfd   : > { %v536_v60 = vpop.f32.mrf.mxu1 }
  0xfe   : > { %v689_v61 = vpop.f32.mrf.mxu0  ;;  %v575_v35 = vadd.f32 %v536_v60, %v422_v29  ;;  %v729_v41 = vadd.f32 %v2176_v59, %v576_v30 }
  0xff   : > { %v2163_v62 = vpop.f32.mrf.mxu1 }
 0x100   : > { %v2179_v63 = vpop.f32.mrf.mxu0  ;;  %v578_v42 = vadd.f32 %v2163_v62, %v425_v34  ;;  %v728_v47 = vadd.f32 %v689_v61, %v575_v35  ;;  %v428_v61 = vadd.f32 %v2751_v56, %v273_v55 }
 0x101   : > { %v546_v0 = vpop.f32.mrf.mxu1 }
 0x102   : > { %v699_v1 = vpop.f32.mrf.mxu0  ;;  %v577_v48 = vadd.f32 %v546_v0, %v424_v40  ;;  %v731_v60 = vadd.f32 %v2179_v63, %v578_v42 }
 0x103   : > { %v2166_v2 = vpop.f32.mrf.mxu1 }
 0x104   : > { %v2753_v3 = vpop.f32.mrf.mxu0  ;;  %v580_v20 = vadd.f32 %v2166_v2, %v427_v45  ;;  %v730_v27 = vadd.f32 %v699_v1, %v577_v48 }
 0x105   : > { %v556_v4 = vpop.f32.mrf.mxu1 }
 0x106   : > { %v2755_v5 = vpop.f32.mrf.mxu0  ;;  %v579_v59 = vadd.f32 %v556_v4, %v426_v53  ;;  %v733_v52 = vadd.f32 %v2753_v3, %v580_v20 }
 0x107   : > { %v2169_v6 = vpop.f32.mrf.mxu1 }
 0x108   : > { %v2757_v7 = vpop.f32.mrf.mxu0  ;;  %v582_v0 = vadd.f32 %v2169_v6, %v429_v57 }
 0x109   : > { %v2759_v8 = vpop.f32.mrf.mxu1 }
 0x10a   : > { %v2761_v9 = vpop.f32.mrf.mxu0  ;;  %v581_v54 = vadd.f32 %v2759_v8, %v428_v61  ;;  %v735_v37 = vadd.f32 %v2757_v7, %v582_v0 }
 0x10b   : > { %v2192_v10 = vpop.f32.mrf.mxu1 }
 0x10c   : > { %v2208_v11 = vpop.f32.mrf.mxu0  ;;  %v883_v49 = vadd.f32 %v2192_v10, %v729_v41 }
 0x10d   : > { %v843_v12 = vpop.f32.mrf.mxu1 }
 0x10e   : > { %v996_v13 = vpop.f32.mrf.mxu0  ;;  %v882_v23 = vadd.f32 %v843_v12, %v728_v47  ;;  %v1036_v29 = vadd.f32 %v2208_v11, %v883_v49  ;;  %v732_v12 = vadd.f32 %v2755_v5, %v579_v59 }
 0x10f   : > { %v2195_v14 = vpop.f32.mrf.mxu1 }
 0x110   : > { %v2211_v15 = vpop.f32.mrf.mxu0  ;;  %v885_v50 = vadd.f32 %v2195_v14, %v731_v60  ;;  %v1035_v32 = vadd.f32 %v996_v13, %v882_v23 }
 0x111   : > { %v853_v16 = vpop.f32.mrf.mxu1 }
 0x112   : > { %v2763_v17 = vpop.f32.mrf.mxu0  ;;  %v884_v34 = vadd.f32 %v853_v16, %v730_v27  ;;  %v1038_v35 = vadd.f32 %v2211_v15, %v885_v50 }
 0x113   : > { %v2198_v18 = vpop.f32.mrf.mxu1 }
 0x114   : > { %v2765_v19 = vpop.f32.mrf.mxu0  ;;  %v887_v1 = vadd.f32 %v2198_v18, %v733_v52  ;;  %v1037_v39 = vadd.f32 %v2763_v17, %v884_v34 }
 0x115   : > { %v863_v21 = vpop.f32.mrf.mxu1 }
 0x116   : > { %v2767_v22 = vpop.f32.mrf.mxu0  ;;  %v886_v56 = vadd.f32 %v863_v21, %v732_v12  ;;  %v1040_v8 = vadd.f32 %v2765_v19, %v887_v1 }
 0x117   : > { %v2769_v24 = vpop.f32.mrf.mxu1 }
 0x118   : > { %v2771_v26 = vpop.f32.mrf.mxu0  ;;  %v889_v5 = vadd.f32 %v2769_v24, %v735_v37  ;;  %v1039_v7 = vadd.f32 %v2767_v22, %v886_v56 }
 0x119   : > { %v2773_v28 = vpop.f32.mrf.mxu1 }
 0x11a   : > { %v2775_v31 = vpop.f32.mrf.mxu0  ;;  %v1042_v24 = vadd.f32 %v2771_v26, %v889_v5 }
 0x11b   : > { %v2224_v33 = vpop.f32.mrf.mxu1 }
 0x11c   : > { %v2240_v36 = vpop.f32.mrf.mxu0  ;;  %v1189_v63 = vadd.f32 %v2224_v33, %v1036_v29  ;;  %v734_v33 = vadd.f32 %v2761_v9, %v581_v54 }
 0x11d   : > { %v1149_v38 = vpop.f32.mrf.mxu1 }
 0x11e   : > { %v1303_v43 = vpop.f32.mrf.mxu0  ;;  %v1188_v11 = vadd.f32 %v1149_v38, %v1035_v32  ;;  %v1343_v3 = vadd.f32 %v2240_v36, %v1189_v63  ;;  %v888_v21 = vadd.f32 %v2773_v28, %v734_v33 }
 0x11f   : > { %v2227_v44 = vpop.f32.mrf.mxu1 }
 0x120   : > { %v2243_v51 = vpop.f32.mrf.mxu0  ;;  %v1191_v13 = vadd.f32 %v2227_v44, %v1038_v35  ;;  %v1342_v15 = vadd.f32 %v1303_v43, %v1188_v11  ;;  %v1041_v22 = vadd.f32 %v2775_v31, %v888_v21 }
 0x121   : > { %v1159_v58 = vpop.f32.mrf.mxu1 }
 0x122   : > { %v1313_v25 = vpop.f32.mrf.mxu0  ;;  %v1190_v18 = vadd.f32 %v1159_v58, %v1037_v39  ;;  %v1345_v36 = vadd.f32 %v2243_v51, %v1191_v13 }
 0x123   : > { %v2230_v62 = vpop.f32.mrf.mxu1 }
 0x124   : > { %v2246_v30 = vpop.f32.mrf.mxu0  ;;  %v1193_v42 = vadd.f32 %v2230_v62, %v1040_v8  ;;  %v1344_v47 = vadd.f32 %v1313_v25, %v1190_v18 }
 0x125   : > { %v1169_v10 = vpop.f32.mrf.mxu1 }
 0x126   : > { %v1323_v2 = vpop.f32.mrf.mxu0  ;;  %v1192_v19 = vadd.f32 %v1169_v10, %v1039_v7  ;;  %v1347_v53 = vadd.f32 %v2246_v30, %v1193_v42 }
 0x127   : > { %v2233_v4 = vpop.f32.mrf.mxu1 }
 0x128   : > { %v2249_v14 = vpop.f32.mrf.mxu0  ;;  %v1195_v58 = vadd.f32 %v2233_v4, %v1042_v24  ;;  %v1346_v26 = vadd.f32 %v1323_v2, %v1192_v19 }
 0x129   : > { %v1179_v6 = vpop.f32.mrf.mxu1 }
 0x12a   : > { %v1333_v16 = vpop.f32.mrf.mxu0  ;;  %v1194_v23 = vadd.f32 %v1179_v6, %v1041_v22  ;;  %v1349_v27 = vadd.f32 %v2249_v14, %v1195_v58 }
 0x12b   : > { %v2256_v40 = vpop.f32.mrf.mxu1 }
 0x12c   : > { %v1496_v38 = vadd.f32 %v2256_v40, %v1343_v3  ;;  %v2272_v41 = vpop.f32.mrf.mxu0  ;;  %v1348_v61 = vadd.f32 %v1333_v16, %v1194_v23 }
 0x12d   : > { %v1456_v17 = vpop.f32.mrf.mxu1 }
 0x12e   : > { %v1649_v44 = vadd.f32 %v2272_v41, %v1496_v38  ;;  %v1495_v45 = vadd.f32 %v1456_v17, %v1342_v15  ;;  %v1609_v9 = vpop.f32.mrf.mxu0 }
 0x12f   : > { %v2259_v46 = vpop.f32.mrf.mxu1 }
 0x130   : > { %1658 = vst.msk [vmem:[#allocation2 + $0x8] sm:$0xff] %vm1656_vm4, %v1649_v44  ;;  %v1648_v43 = vadd.f32 %v1609_v9, %v1495_v45  ;;  %v1498_v48 = vadd.f32 %v2259_v46, %v1345_v36  ;;  %v2275_v49 = vpop.f32.mrf.mxu0 }
 0x131   : > { %v1466_v28 = vpop.f32.mrf.mxu1 }
 0x132   : > { %1657 = vst.msk [vmem:[#allocation2] sm:$0xff] %vm1656_vm4, %v1648_v43  ;;  %v1651_v51 = vadd.f32 %v2275_v49, %v1498_v48  ;;  %v1497_v55 = vadd.f32 %v1466_v28, %v1344_v47  ;;  %v1619_v60 = vpop.f32.mrf.mxu0 }
 0x133   : > { %v2262_v20 = vpop.f32.mrf.mxu1 }
 0x134   : > { %1660 = vst.msk [vmem:[#allocation2 + $0x18] sm:$0xff] %vm1656_vm4, %v1651_v51  ;;  %v1650_v25 = vadd.f32 %v1619_v60, %v1497_v55  ;;  %v1500_v57 = vadd.f32 %v2262_v20, %v1347_v53  ;;  %v2278_v59 = vpop.f32.mrf.mxu0 }
 0x135   : > { %v1476_v62 = vpop.f32.mrf.mxu1 }
 0x136   : > { %1659 = vst.msk [vmem:[#allocation2 + $0x10] sm:$0xff] %vm1656_vm4, %v1650_v25  ;;  %v1653_v31 = vadd.f32 %v2278_v59, %v1500_v57  ;;  %v1499_v29 = vadd.f32 %v1476_v62, %v1346_v26  ;;  %v1629_v50 = vpop.f32.mrf.mxu0 }
 0x137   : > { %v2265_v30 = vpop.f32.mrf.mxu1 }
 0x138   : > { %1662 = vst.msk [vmem:[#allocation2 + $0x28] sm:$0xff] %vm1656_vm4, %v1653_v31  ;;  %v1652_v0 = vadd.f32 %v1629_v50, %v1499_v29  ;;  %v1502_v10 = vadd.f32 %v2265_v30, %v1349_v27  ;;  %v2281_v52 = vpop.f32.mrf.mxu0 }
 0x139   : > { %v1486_v32 = vpop.f32.mrf.mxu1 }
 0x13a   : > { %1661 = vst.msk [vmem:[#allocation2 + $0x20] sm:$0xff] %vm1656_vm4, %v1652_v0  ;;  %v1655_v34 = vadd.f32 %v2281_v52, %v1502_v10  ;;  %v1501_v63 = vadd.f32 %v1486_v32, %v1348_v61  ;;  %v1639_v2 = vpop.f32.mrf.mxu0  ;;  %1668 = sbr.rel (%p2045_p2) target bundleno = 352 (0x160), region = 40 }
 0x13c   : > { %1664 = vst.msk [vmem:[#allocation2 + $0x38] sm:$0xff] %vm1656_vm4, %v1655_v34  ;;  %v1654_v12 = vadd.f32 %v1639_v2, %v1501_v63 }
 0x13e   : > { %1663 = vst.msk [vmem:[#allocation2 + $0x30] sm:$0xff] %vm1656_vm4, %v1654_v12 }
 0x13f   : > { %1669 = vst.msk [vmem:[%s2493_s24] sm:$0xff] %vm1656_vm4, %v1648_v43  ;;  %1670 = vst.msk [vmem:[%s2493_s24 + $0x8] sm:$0xff] %vm1656_vm4, %v1649_v44  ;;  %v1678_v54 = vsel %vm1656_vm4, %v1648_v43, 0.0  ;;  %v1679_v4 = vsel %vm1656_vm4, %v1649_v44, 0.0  ;;  %v1681_v35 = vsel %vm1656_vm4, %v1650_v25, 0.0  ;;  %v1683_v11 = vsel %vm1656_vm4, %v1651_v51, 0.0 }
 0x140   : > { %1671 = vst.msk [vmem:[%s2493_s24 + $0x10] sm:$0xff] %vm1656_vm4, %v1650_v25  ;;  %1672 = vst.msk [vmem:[%s2493_s24 + $0x18] sm:$0xff] %vm1656_vm4, %v1651_v51  ;;  %v1680_v1 = vadd.f32 %v1679_v4, %v1678_v54  ;;  %v1703_v14 = vmul.f32 %v1648_v43, %v1648_v43  ;;  %v1704_v37 = vmul.f32 %v1649_v44, %v1649_v44  ;;  %v1685_v3 = vsel %vm1656_vm4, %v1652_v0, 0.0  ;;  %v1677_v23 = vld [vmem:[%s2869_s3] sm:$0x1] }
 0x141   : > { %1673 = vst.msk [vmem:[%s2493_s24 + $0x20] sm:$0xff] %vm1656_vm4, %v1652_v0  ;;  %1674 = vst.msk [vmem:[%s2493_s24 + $0x28] sm:$0xff] %vm1656_vm4, %v1653_v31  ;;  %v1705_v6 = vmul.f32 %v1650_v25, %v1650_v25  ;;  %v1706_v39 = vmul.f32 %v1651_v51, %v1651_v51  ;;  %v1707_v33 = vmul.f32 %v1652_v0, %v1652_v0  ;;  %v1687_v8 = vsel %vm1656_vm4, %v1653_v31, 0.0 }
 0x142   : > { %1675 = vst.msk [vmem:[%s2493_s24 + $0x30] sm:$0xff] %vm1656_vm4, %v1654_v12  ;;  %1676 = vst.msk [vmem:[%s2493_s24 + $0x38] sm:$0xff] %vm1656_vm4, %v1655_v34  ;;  %v1682_v56 = vadd.f32 %v1681_v35, %v1680_v1  ;;  %v1711_v13 = vsel %vm1656_vm4, %v1703_v14, 0.0  ;;  %v1712_v5 = vsel %vm1656_vm4, %v1704_v37, 0.0  ;;  %v1708_v38 = vmul.f32 %v1653_v31, %v1653_v31  ;;  %v1702_v31 = vld [vmem:[%s2870_s4] sm:$0x1] }
 0x143   : > { %v1714_v40 = vsel %vm1656_vm4, %v1705_v6, 0.0  ;;  %v1713_v15 = vadd.f32 %v1712_v5, %v1711_v13  ;;  %v1716_v41 = vsel %vm1656_vm4, %v1706_v39, 0.0  ;;  %v1689_v7 = vsel %vm1656_vm4, %v1654_v12, 0.0 }
 0x144   : > { %v1684_v16 = vadd.f32 %v1683_v11, %v1682_v56  ;;  %v1709_v36 = vmul.f32 %v1654_v12, %v1654_v12  ;;  %v1718_v42 = vsel %vm1656_vm4, %v1707_v33, 0.0  ;;  %v1691_v44 = vsel %vm1656_vm4, %v1655_v34, 0.0 }
 0x145   : > { %v1715_v21 = vadd.f32 %v1714_v40, %v1713_v15  ;;  %v1710_v24 = vmul.f32 %v1655_v34, %v1655_v34  ;;  %v1720_v46 = vsel %vm1656_vm4, %v1708_v38, 0.0  ;;  %vm1700_vm5 = vcmask 57344  }
 0x146   : > { %v1686_v18 = vadd.f32 %v1685_v3, %v1684_v16  ;;  %v1722_v43 = vsel %vm1656_vm4, %v1709_v36, 0.0 }
 0x147   : > { %v1717_v45 = vadd.f32 %v1716_v41, %v1715_v21  ;;  %v1724_v22 = vsel %vm1656_vm4, %v1710_v24, 0.0 }
 0x148   : > { %v1688_v17 = vadd.f32 %v1687_v8, %v1686_v18 }
 0x149   : > { %v1719_v47 = vadd.f32 %v1718_v42, %v1717_v45 }
 0x14a   : > { %v1690_v9 = vadd.f32 %v1689_v7, %v1688_v17 }
 0x14b   : > { %v1721_v48 = vadd.f32 %v1720_v46, %v1719_v47 }
 0x14c   : > { %v1692_v19 = vadd.f32 %v1691_v44, %v1690_v9 }
 0x14d   : > { %v1723_v28 = vadd.f32 %v1722_v43, %v1721_v48 }
 0x14e   : > { %v1693_v49 = vrot.slane %v1692_v19, 4 }
 0x14f   : > { %v1725_v58 = vadd.f32 %v1724_v22, %v1723_v28 }
 0x150   : > { %v1694_v53 = vadd.f32 %v1693_v49, %v1692_v19 }
 0x151   : > { %v1726_v55 = vrot.slane %v1725_v58, 4 }
 0x152   : > { %v1695_v51 = vrot.slane %v1694_v53, 2 }
 0x153   : > { %v1727_v20 = vadd.f32 %v1726_v55, %v1725_v58 }
 0x154   : > { %v1696_v60 = vadd.f32 %v1695_v51, %v1694_v53 }
 0x155   : > { %v1728_v25 = vrot.slane %v1727_v20, 2 }
 0x156   : > { %v1697_v26 = vrot.slane %v1696_v60, 1 }
 0x157   : > { %v1729_v59 = vadd.f32 %v1728_v25, %v1727_v20 }
 0x158   : > { %v1698_v57 = vadd.f32 %v1697_v26, %v1696_v60 }
 0x159   : > { %v1730_v27 = vrot.slane %v1729_v59, 1 }
 0x15a   : > { %v1699_v62 = vadd.f32 %v1698_v57, %v1677_v23 }
 0x15b   : > { %v1731_v29 = vadd.f32 %v1730_v27, %v1729_v59 }
 0x15c   : > { %1701 = vst.msk [vmem:[%s2869_s3] sm:$0x1] %vm1700_vm5, %v1699_v62 }
 0x15d   : > { %v1732_v50 = vadd.f32 %v1731_v29, %v1702_v31 }
 0x15f   : > { %1733 = vst.msk [vmem:[%s2870_s4] sm:$0x1] %vm1700_vm5, %v1732_v50 }
 0x160 PF: > { %s15_s21 = sadd.s32 1, %s2400_s21   ;;  %s2872_s11 = sld [smem:[#allocation3_spill]] }
 0x161   : > { %p12_p3 = scmp.ge.s32.totalorder %s15_s21, 50   ;;  %s2873_s15 = smov %s2388_s18 }
 0x162   : > { %s2874_s16 = smov %s2392_s19  ;;  %s2875_s17 = smov %s2396_s20 }
 0x163   : > { %s2876_s18 = smov %s2880_s22  ;;  %s2877_s19 = smov %s2884_s23 }
 0x164   :  { %14 = sbr.rel (!%p12_p3) target bundleno = 4 (0x4), region = 97 }
 0x166   : > { %s2878_s20 = smov %s2872_s11 }

// kernel: decoder_block_3d.7
= control target key start
LH: loop header
LB: loop body
LE: loop exit
PB: predicated region body
PF: predicated region fallthrough
CT: control target
= control target key end

     0   :  { %vm540_vm0 = vcmask 64512   ;;  %s1869_s0 = inlined_call_operand.vmem [shape: f32[16,64,8], index: 0, kind: input, shape index: {}]   ;;  %s1870_s1 = inlined_call_operand.vmem [shape: f32[1,1,8], index: 1, kind: input, shape index: {}]   ;;  %s1871_s2 = inlined_call_operand.vmem [shape: f32[1,1,8], index: 2, kind: input, shape index: {}]   ;;  %s1872_s3 = inlined_call_operand.vmem [shape: f32[16,64,8], index: 3, kind: output, shape index: {}]  }
   0x1   :  { %v14_v0 = vld [vmem:[%s1869_s0] sm:$0xff]  ;;  %v15_v4 = vld [vmem:[%s1869_s0 + $0x8] sm:$0xff]  ;;  %v16_v5 = vld [vmem:[%s1869_s0 + $0x10] sm:$0xff] }
   0x2   :  { %v703_v1 = vld [vmem:[%s1870_s1] ss:$0 sm:$0xff]  ;;  %v17_v6 = vld [vmem:[%s1869_s0 + $0x18] sm:$0xff]  ;;  %v19_v11 = vld [vmem:[%s1869_s0 + $0x28] sm:$0xff] }
   0x3   :  { %v708_v2 = vld [vmem:[%s1871_s2] ss:$0 sm:$0xff]  ;;  %v149_v3 = vmul.f32 %v703_v1, %v14_v0  ;;  %v150_v7 = vmul.f32 %v703_v1, %v15_v4  ;;  %v151_v8 = vmul.f32 %v703_v1, %v16_v5  ;;  %v152_v9 = vmul.f32 %v703_v1, %v17_v6  ;;  %v20_v12 = vld [vmem:[%s1869_s0 + $0x30] sm:$0xff]  ;;  %v21_v17 = vld [vmem:[%s1869_s0 + $0x38] sm:$0xff] }
   0x4   :  { %v18_v10 = vld [vmem:[%s1869_s0 + $0x20] sm:$0xff]  ;;  %v154_v15 = vmul.f32 %v703_v1, %v19_v11  ;;  %v155_v16 = vmul.f32 %v703_v1, %v20_v12  ;;  %v156_v21 = vmul.f32 %v703_v1, %v21_v17  ;;  %v23_v27 = vld [vmem:[%s1869_s0 + $0x48] sm:$0xff]  ;;  %v24_v28 = vld [vmem:[%s1869_s0 + $0x50] sm:$0xff] }
   0x5   :  { %v284_v13 = vadd.f32 %v708_v2, %v149_v3  ;;  %v153_v14 = vmul.f32 %v703_v1, %v18_v10  ;;  %v285_v18 = vadd.f32 %v708_v2, %v150_v7  ;;  %v286_v19 = vadd.f32 %v708_v2, %v151_v8  ;;  %v22_v22 = vld [vmem:[%s1869_s0 + $0x40] sm:$0xff]  ;;  %v25_v29 = vld [vmem:[%s1869_s0 + $0x58] sm:$0xff]  ;;  %v27_v35 = vld [vmem:[%s1869_s0 + $0x68] sm:$0xff] }
   0x6   :  { %v287_v20 = vadd.f32 %v708_v2, %v152_v9  ;;  %v289_v25 = vadd.f32 %v708_v2, %v154_v15  ;;  %v290_v26 = vadd.f32 %v708_v2, %v155_v16  ;;  %v291_v33 = vadd.f32 %v708_v2, %v156_v21  ;;  %v26_v34 = vld [vmem:[%s1869_s0 + $0x60] sm:$0xff]  ;;  %v28_v36 = vld [vmem:[%s1869_s0 + $0x70] sm:$0xff]  ;;  %v29_v41 = vld [vmem:[%s1869_s0 + $0x78] sm:$0xff] }
   0x7   :  { %v412_v23 = vmax.f32 %v284_v13, 0.0  ;;  %v288_v24 = vadd.f32 %v708_v2, %v153_v14  ;;  %v413_v30 = vmax.f32 %v285_v18, 0.0  ;;  %v414_v31 = vmax.f32 %v286_v19, 0.0  ;;  %v30_v54 = vld [vmem:[%s1869_s0 + $0x80] sm:$0xff]  ;;  %v31_v59 = vld [vmem:[%s1869_s0 + $0x88] sm:$0xff]  ;;  %v32_v60 = vld [vmem:[%s1869_s0 + $0x90] sm:$0xff] }
   0x8   :  { %v415_v32 = vmax.f32 %v287_v20, 0.0  ;;  %v417_v38 = vmax.f32 %v289_v25, 0.0  ;;  %v418_v39 = vmax.f32 %v290_v26, 0.0  ;;  %v157_v40 = vmul.f32 %v703_v1, %v22_v22  ;;  %v33_v61 = vld [vmem:[%s1869_s0 + $0x98] sm:$0xff]  ;;  %v34_v4 = vld [vmem:[%s1869_s0 + $0xa0] sm:$0xff]  ;;  %v35_v5 = vld [vmem:[%s1869_s0 + $0xa8] sm:$0xff] }
   0x9   :  { %541 = vst.msk [vmem:[%s1872_s3] sm:$0xff] %vm540_vm0, %v412_v23  ;;  %v416_v37 = vmax.f32 %v288_v24, 0.0  ;;  %542 = vst.msk [vmem:[%s1872_s3 + $0x8] sm:$0xff] %vm540_vm0, %v413_v30  ;;  %v419_v42 = vmax.f32 %v291_v33, 0.0  ;;  %v158_v43 = vmul.f32 %v703_v1, %v23_v27  ;;  %v159_v44 = vmul.f32 %v703_v1, %v24_v28  ;;  %v36_v6 = vld [vmem:[%s1869_s0 + $0xb0] sm:$0xff]  ;;  %v37_v11 = vld [vmem:[%s1869_s0 + $0xb8] sm:$0xff] }
   0xa   :  { %543 = vst.msk [vmem:[%s1872_s3 + $0x10] sm:$0xff] %vm540_vm0, %v414_v31  ;;  %544 = vst.msk [vmem:[%s1872_s3 + $0x18] sm:$0xff] %vm540_vm0, %v415_v32  ;;  %v160_v45 = vmul.f32 %v703_v1, %v25_v29  ;;  %v292_v46 = vadd.f32 %v708_v2, %v157_v40  ;;  %v161_v47 = vmul.f32 %v703_v1, %v26_v34  ;;  %v38_v24 = vld [vmem:[%s1869_s0 + $0xc0] sm:$0xff]  ;;  %v39_v29 = vld [vmem:[%s1869_s0 + $0xc8] sm:$0xff] }
   0xb   :  { %545 = vst.msk [vmem:[%s1872_s3 + $0x20] sm:$0xff] %vm540_vm0, %v416_v37  ;;  %546 = vst.msk [vmem:[%s1872_s3 + $0x28] sm:$0xff] %vm540_vm0, %v417_v38  ;;  %v162_v48 = vmul.f32 %v703_v1, %v27_v35  ;;  %v163_v49 = vmul.f32 %v703_v1, %v28_v36  ;;  %v293_v50 = vadd.f32 %v708_v2, %v158_v43  ;;  %v40_v30 = vld [vmem:[%s1869_s0 + $0xd0] sm:$0xff]  ;;  %v41_v31 = vld [vmem:[%s1869_s0 + $0xd8] sm:$0xff] }
   0xc   :  { %547 = vst.msk [vmem:[%s1872_s3 + $0x30] sm:$0xff] %vm540_vm0, %v418_v39  ;;  %548 = vst.msk [vmem:[%s1872_s3 + $0x38] sm:$0xff] %vm540_vm0, %v419_v42  ;;  %v294_v51 = vadd.f32 %v708_v2, %v159_v44  ;;  %v295_v52 = vadd.f32 %v708_v2, %v160_v45  ;;  %v164_v53 = vmul.f32 %v703_v1, %v29_v41  ;;  %v420_v55 = vmax.f32 %v292_v46, 0.0  ;;  %v42_v36 = vld [vmem:[%s1869_s0 + $0xe0] sm:$0xff]  ;;  %v43_v37 = vld [vmem:[%s1869_s0 + $0xe8] sm:$0xff] }
   0xd   :  { %v296_v56 = vadd.f32 %v708_v2, %v161_v47  ;;  %v297_v57 = vadd.f32 %v708_v2, %v162_v48  ;;  %v298_v58 = vadd.f32 %v708_v2, %v163_v49  ;;  %v421_v62 = vmax.f32 %v293_v50, 0.0  ;;  %v44_v38 = vld [vmem:[%s1869_s0 + $0xf0] sm:$0xff]  ;;  %v45_v43 = vld [vmem:[%s1869_s0 + $0xf8] sm:$0xff] }
   0xe   :  { %v422_v63 = vmax.f32 %v294_v51, 0.0  ;;  %v423_v0 = vmax.f32 %v295_v52, 0.0  ;;  %v299_v3 = vadd.f32 %v708_v2, %v164_v53  ;;  %549 = vst.msk [vmem:[%s1872_s3 + $0x40] sm:$0xff] %vm540_vm0, %v420_v55  ;;  %v165_v10 = vmul.f32 %v703_v1, %v30_v54 }
   0xf   :  { %v424_v7 = vmax.f32 %v296_v56, 0.0  ;;  %v425_v8 = vmax.f32 %v297_v57, 0.0  ;;  %v426_v9 = vmax.f32 %v298_v58, 0.0  ;;  %550 = vst.msk [vmem:[%s1872_s3 + $0x48] sm:$0xff] %vm540_vm0, %v421_v62  ;;  %v166_v13 = vmul.f32 %v703_v1, %v31_v59  ;;  %v46_v56 = vld [vmem:[%s1869_s0 + $0x100] sm:$0xff]  ;;  %v48_v62 = vld [vmem:[%s1869_s0 + $0x110] sm:$0xff] }
  0x10   :  { %551 = vst.msk [vmem:[%s1872_s3 + $0x50] sm:$0xff] %vm540_vm0, %v422_v63  ;;  %552 = vst.msk [vmem:[%s1872_s3 + $0x58] sm:$0xff] %vm540_vm0, %v423_v0  ;;  %v427_v12 = vmax.f32 %v299_v3, 0.0  ;;  %v167_v14 = vmul.f32 %v703_v1, %v32_v60  ;;  %v168_v15 = vmul.f32 %v703_v1, %v33_v61  ;;  %v300_v16 = vadd.f32 %v708_v2, %v165_v10  ;;  %v47_v61 = vld [vmem:[%s1869_s0 + $0x108] sm:$0xff]  ;;  %v49_v63 = vld [vmem:[%s1869_s0 + $0x118] sm:$0xff] }
  0x11   :  { %553 = vst.msk [vmem:[%s1872_s3 + $0x60] sm:$0xff] %vm540_vm0, %v424_v7  ;;  %554 = vst.msk [vmem:[%s1872_s3 + $0x68] sm:$0xff] %vm540_vm0, %v425_v8  ;;  %v169_v17 = vmul.f32 %v703_v1, %v34_v4  ;;  %v170_v18 = vmul.f32 %v703_v1, %v35_v5  ;;  %v171_v19 = vmul.f32 %v703_v1, %v36_v6  ;;  %v50_v6 = vld [vmem:[%s1869_s0 + $0x120] sm:$0xff]  ;;  %v51_v7 = vld [vmem:[%s1869_s0 + $0x128] sm:$0xff] }
  0x12   :  { %555 = vst.msk [vmem:[%s1872_s3 + $0x70] sm:$0xff] %vm540_vm0, %v426_v9  ;;  %556 = vst.msk [vmem:[%s1872_s3 + $0x78] sm:$0xff] %vm540_vm0, %v427_v12  ;;  %v301_v20 = vadd.f32 %v708_v2, %v166_v13  ;;  %v302_v21 = vadd.f32 %v708_v2, %v167_v14  ;;  %v303_v22 = vadd.f32 %v708_v2, %v168_v15  ;;  %v428_v25 = vmax.f32 %v300_v16, 0.0  ;;  %v52_v8 = vld [vmem:[%s1869_s0 + $0x130] sm:$0xff]  ;;  %v53_v13 = vld [vmem:[%s1869_s0 + $0x138] sm:$0xff] }
  0x13   :  { %v172_v23 = vmul.f32 %v703_v1, %v37_v11  ;;  %v304_v26 = vadd.f32 %v708_v2, %v169_v17  ;;  %v305_v27 = vadd.f32 %v708_v2, %v170_v18  ;;  %v306_v28 = vadd.f32 %v708_v2, %v171_v19 }
  0x14   :  { %v429_v32 = vmax.f32 %v301_v20, 0.0  ;;  %v430_v33 = vmax.f32 %v302_v21, 0.0  ;;  %v431_v34 = vmax.f32 %v303_v22, 0.0  ;;  %557 = vst.msk [vmem:[%s1872_s3 + $0x80] sm:$0xff] %vm540_vm0, %v428_v25  ;;  %v173_v42 = vmul.f32 %v703_v1, %v38_v24 }
  0x15   :  { %v307_v35 = vadd.f32 %v708_v2, %v172_v23  ;;  %v432_v39 = vmax.f32 %v304_v26, 0.0  ;;  %v433_v40 = vmax.f32 %v305_v27, 0.0  ;;  %v434_v41 = vmax.f32 %v306_v28, 0.0  ;;  %v54_v26 = vld [vmem:[%s1869_s0 + $0x140] sm:$0xff] }
  0x16   :  { %558 = vst.msk [vmem:[%s1872_s3 + $0x88] sm:$0xff] %vm540_vm0, %v429_v32  ;;  %559 = vst.msk [vmem:[%s1872_s3 + $0x90] sm:$0xff] %vm540_vm0, %v430_v33  ;;  %v174_v45 = vmul.f32 %v703_v1, %v39_v29  ;;  %v175_v46 = vmul.f32 %v703_v1, %v40_v30  ;;  %v176_v47 = vmul.f32 %v703_v1, %v41_v31  ;;  %v55_v31 = vld [vmem:[%s1869_s0 + $0x148] sm:$0xff]  ;;  %v56_v32 = vld [vmem:[%s1869_s0 + $0x150] sm:$0xff] }
  0x17   :  { %560 = vst.msk [vmem:[%s1872_s3 + $0x98] sm:$0xff] %vm540_vm0, %v431_v34  ;;  %v435_v44 = vmax.f32 %v307_v35, 0.0  ;;  %561 = vst.msk [vmem:[%s1872_s3 + $0xa0] sm:$0xff] %vm540_vm0, %v432_v39  ;;  %v308_v48 = vadd.f32 %v708_v2, %v173_v42  ;;  %v177_v49 = vmul.f32 %v703_v1, %v42_v36  ;;  %v178_v50 = vmul.f32 %v703_v1, %v43_v37  ;;  %v57_v33 = vld [vmem:[%s1869_s0 + $0x158] sm:$0xff]  ;;  %v59_v39 = vld [vmem:[%s1869_s0 + $0x168] sm:$0xff] }
  0x18   :  { %562 = vst.msk [vmem:[%s1872_s3 + $0xa8] sm:$0xff] %vm540_vm0, %v433_v40  ;;  %563 = vst.msk [vmem:[%s1872_s3 + $0xb0] sm:$0xff] %vm540_vm0, %v434_v41  ;;  %v179_v51 = vmul.f32 %v703_v1, %v44_v38  ;;  %v309_v52 = vadd.f32 %v708_v2, %v174_v45  ;;  %v310_v53 = vadd.f32 %v708_v2, %v175_v46  ;;  %v58_v38 = vld [vmem:[%s1869_s0 + $0x160] sm:$0xff]  ;;  %v60_v40 = vld [vmem:[%s1869_s0 + $0x170] sm:$0xff] }
  0x19   :  { %564 = vst.msk [vmem:[%s1872_s3 + $0xb8] sm:$0xff] %vm540_vm0, %v435_v44  ;;  %v311_v54 = vadd.f32 %v708_v2, %v176_v47  ;;  %v180_v55 = vmul.f32 %v703_v1, %v45_v43  ;;  %v436_v57 = vmax.f32 %v308_v48, 0.0  ;;  %v312_v58 = vadd.f32 %v708_v2, %v177_v49  ;;  %v61_v45 = vld [vmem:[%s1869_s0 + $0x178] sm:$0xff] }
  0x1a   :  { %v313_v59 = vadd.f32 %v708_v2, %v178_v50  ;;  %v314_v60 = vadd.f32 %v708_v2, %v179_v51  ;;  %v437_v0 = vmax.f32 %v309_v52, 0.0  ;;  %v438_v3 = vmax.f32 %v310_v53, 0.0 }
  0x1b   :  { %v439_v4 = vmax.f32 %v311_v54, 0.0  ;;  %v315_v5 = vadd.f32 %v708_v2, %v180_v55  ;;  %565 = vst.msk [vmem:[%s1872_s3 + $0xc0] sm:$0xff] %vm540_vm0, %v436_v57  ;;  %v440_v9 = vmax.f32 %v312_v58, 0.0  ;;  %v181_v12 = vmul.f32 %v703_v1, %v46_v56  ;;  %v62_v58 = vld [vmem:[%s1869_s0 + $0x180] sm:$0xff] }
  0x1c   :  { %v441_v10 = vmax.f32 %v313_v59, 0.0  ;;  %v442_v11 = vmax.f32 %v314_v60, 0.0  ;;  %566 = vst.msk [vmem:[%s1872_s3 + $0xc8] sm:$0xff] %vm540_vm0, %v437_v0  ;;  %567 = vst.msk [vmem:[%s1872_s3 + $0xd0] sm:$0xff] %vm540_vm0, %v438_v3  ;;  %v182_v15 = vmul.f32 %v703_v1, %v47_v61  ;;  %v183_v16 = vmul.f32 %v703_v1, %v48_v62  ;;  %v64_v0 = vld [vmem:[%s1869_s0 + $0x190] sm:$0xff]  ;;  %v65_v3 = vld [vmem:[%s1869_s0 + $0x198] sm:$0xff] }
  0x1d   :  { %568 = vst.msk [vmem:[%s1872_s3 + $0xd8] sm:$0xff] %vm540_vm0, %v439_v4  ;;  %v443_v14 = vmax.f32 %v315_v5, 0.0  ;;  %v184_v17 = vmul.f32 %v703_v1, %v49_v63  ;;  %569 = vst.msk [vmem:[%s1872_s3 + $0xe0] sm:$0xff] %vm540_vm0, %v440_v9  ;;  %v316_v18 = vadd.f32 %v708_v2, %v181_v12  ;;  %v185_v19 = vmul.f32 %v703_v1, %v50_v6  ;;  %v63_v63 = vld [vmem:[%s1869_s0 + $0x188] sm:$0xff] }
  0x1e   :  { %570 = vst.msk [vmem:[%s1872_s3 + $0xe8] sm:$0xff] %vm540_vm0, %v441_v10  ;;  %571 = vst.msk [vmem:[%s1872_s3 + $0xf0] sm:$0xff] %vm540_vm0, %v442_v11  ;;  %v186_v20 = vmul.f32 %v703_v1, %v51_v7  ;;  %v187_v21 = vmul.f32 %v703_v1, %v52_v8  ;;  %v317_v22 = vadd.f32 %v708_v2, %v182_v15  ;;  %v66_v8 = vld [vmem:[%s1869_s0 + $0x1a0] sm:$0xff]  ;;  %v67_v9 = vld [vmem:[%s1869_s0 + $0x1a8] sm:$0xff] }
  0x1f   :  { %572 = vst.msk [vmem:[%s1872_s3 + $0xf8] sm:$0xff] %vm540_vm0, %v443_v14  ;;  %v318_v23 = vadd.f32 %v708_v2, %v183_v16  ;;  %v319_v24 = vadd.f32 %v708_v2, %v184_v17  ;;  %v188_v25 = vmul.f32 %v703_v1, %v53_v13  ;;  %v444_v27 = vmax.f32 %v316_v18, 0.0  ;;  %v68_v10 = vld [vmem:[%s1869_s0 + $0x1b0] sm:$0xff]  ;;  %v69_v15 = vld [vmem:[%s1869_s0 + $0x1b8] sm:$0xff] }
  0x20   :  { %v320_v28 = vadd.f32 %v708_v2, %v185_v19  ;;  %v321_v29 = vadd.f32 %v708_v2, %v186_v20  ;;  %v322_v30 = vadd.f32 %v708_v2, %v187_v21  ;;  %v445_v34 = vmax.f32 %v317_v22, 0.0 }
  0x21   :  { %v446_v35 = vmax.f32 %v318_v23, 0.0  ;;  %v447_v36 = vmax.f32 %v319_v24, 0.0  ;;  %v323_v37 = vadd.f32 %v708_v2, %v188_v25  ;;  %573 = vst.msk [vmem:[%s1872_s3 + $0x100] sm:$0xff] %vm540_vm0, %v444_v27  ;;  %v189_v44 = vmul.f32 %v703_v1, %v54_v26 }
  0x22   :  { %v448_v41 = vmax.f32 %v320_v28, 0.0  ;;  %v449_v42 = vmax.f32 %v321_v29, 0.0  ;;  %v450_v43 = vmax.f32 %v322_v30, 0.0  ;;  %574 = vst.msk [vmem:[%s1872_s3 + $0x108] sm:$0xff] %vm540_vm0, %v445_v34  ;;  %v190_v47 = vmul.f32 %v703_v1, %v55_v31  ;;  %v70_v28 = vld [vmem:[%s1869_s0 + $0x1c0] sm:$0xff]  ;;  %v72_v34 = vld [vmem:[%s1869_s0 + $0x1d0] sm:$0xff] }
  0x23   :  { %575 = vst.msk [vmem:[%s1872_s3 + $0x110] sm:$0xff] %vm540_vm0, %v446_v35  ;;  %576 = vst.msk [vmem:[%s1872_s3 + $0x118] sm:$0xff] %vm540_vm0, %v447_v36  ;;  %v451_v46 = vmax.f32 %v323_v37, 0.0  ;;  %v191_v48 = vmul.f32 %v703_v1, %v56_v32  ;;  %v192_v49 = vmul.f32 %v703_v1, %v57_v33  ;;  %v324_v50 = vadd.f32 %v708_v2, %v189_v44  ;;  %v71_v33 = vld [vmem:[%s1869_s0 + $0x1c8] sm:$0xff]  ;;  %v73_v35 = vld [vmem:[%s1869_s0 + $0x1d8] sm:$0xff] }
  0x24   :  { %577 = vst.msk [vmem:[%s1872_s3 + $0x120] sm:$0xff] %vm540_vm0, %v448_v41  ;;  %578 = vst.msk [vmem:[%s1872_s3 + $0x128] sm:$0xff] %vm540_vm0, %v449_v42  ;;  %v193_v51 = vmul.f32 %v703_v1, %v58_v38  ;;  %v194_v52 = vmul.f32 %v703_v1, %v59_v39  ;;  %v195_v53 = vmul.f32 %v703_v1, %v60_v40  ;;  %v74_v40 = vld [vmem:[%s1869_s0 + $0x1e0] sm:$0xff]  ;;  %v75_v41 = vld [vmem:[%s1869_s0 + $0x1e8] sm:$0xff] }
  0x25   :  { %579 = vst.msk [vmem:[%s1872_s3 + $0x130] sm:$0xff] %vm540_vm0, %v450_v43  ;;  %580 = vst.msk [vmem:[%s1872_s3 + $0x138] sm:$0xff] %vm540_vm0, %v451_v46  ;;  %v325_v54 = vadd.f32 %v708_v2, %v190_v47  ;;  %v326_v55 = vadd.f32 %v708_v2, %v191_v48  ;;  %v327_v56 = vadd.f32 %v708_v2, %v192_v49  ;;  %v452_v59 = vmax.f32 %v324_v50, 0.0  ;;  %v76_v42 = vld [vmem:[%s1869_s0 + $0x1f0] sm:$0xff]  ;;  %v77_v47 = vld [vmem:[%s1869_s0 + $0x1f8] sm:$0xff] }
  0x26   :  { %v196_v57 = vmul.f32 %v703_v1, %v61_v45  ;;  %v328_v60 = vadd.f32 %v708_v2, %v193_v51  ;;  %v329_v61 = vadd.f32 %v708_v2, %v194_v52  ;;  %v330_v62 = vadd.f32 %v708_v2, %v195_v53 }
  0x27   :  { %v453_v4 = vmax.f32 %v325_v54, 0.0  ;;  %v454_v5 = vmax.f32 %v326_v55, 0.0  ;;  %v455_v6 = vmax.f32 %v327_v56, 0.0  ;;  %581 = vst.msk [vmem:[%s1872_s3 + $0x140] sm:$0xff] %vm540_vm0, %v452_v59  ;;  %v197_v14 = vmul.f32 %v703_v1, %v62_v58 }
  0x28   :  { %v331_v7 = vadd.f32 %v708_v2, %v196_v57  ;;  %v456_v11 = vmax.f32 %v328_v60, 0.0  ;;  %v457_v12 = vmax.f32 %v329_v61, 0.0  ;;  %v458_v13 = vmax.f32 %v330_v62, 0.0  ;;  %v78_v60 = vld [vmem:[%s1869_s0 + $0x200] sm:$0xff] }
  0x29   :  { %582 = vst.msk [vmem:[%s1872_s3 + $0x148] sm:$0xff] %vm540_vm0, %v453_v4  ;;  %583 = vst.msk [vmem:[%s1872_s3 + $0x150] sm:$0xff] %vm540_vm0, %v454_v5  ;;  %v198_v17 = vmul.f32 %v703_v1, %v63_v63  ;;  %v199_v18 = vmul.f32 %v703_v1, %v64_v0  ;;  %v200_v19 = vmul.f32 %v703_v1, %v65_v3  ;;  %v79_v3 = vld [vmem:[%s1869_s0 + $0x208] sm:$0xff]  ;;  %v80_v4 = vld [vmem:[%s1869_s0 + $0x210] sm:$0xff] }
  0x2a   :  { %584 = vst.msk [vmem:[%s1872_s3 + $0x158] sm:$0xff] %vm540_vm0, %v455_v6  ;;  %v459_v16 = vmax.f32 %v331_v7, 0.0  ;;  %585 = vst.msk [vmem:[%s1872_s3 + $0x160] sm:$0xff] %vm540_vm0, %v456_v11  ;;  %v332_v20 = vadd.f32 %v708_v2, %v197_v14  ;;  %v201_v21 = vmul.f32 %v703_v1, %v66_v8  ;;  %v202_v22 = vmul.f32 %v703_v1, %v67_v9  ;;  %v81_v5 = vld [vmem:[%s1869_s0 + $0x218] sm:$0xff]  ;;  %v83_v11 = vld [vmem:[%s1869_s0 + $0x228] sm:$0xff] }
  0x2b   :  { %586 = vst.msk [vmem:[%s1872_s3 + $0x168] sm:$0xff] %vm540_vm0, %v457_v12  ;;  %587 = vst.msk [vmem:[%s1872_s3 + $0x170] sm:$0xff] %vm540_vm0, %v458_v13  ;;  %v203_v23 = vmul.f32 %v703_v1, %v68_v10  ;;  %v333_v24 = vadd.f32 %v708_v2, %v198_v17  ;;  %v334_v25 = vadd.f32 %v708_v2, %v199_v18  ;;  %v82_v10 = vld [vmem:[%s1869_s0 + $0x220] sm:$0xff]  ;;  %v84_v12 = vld [vmem:[%s1869_s0 + $0x230] sm:$0xff] }
  0x2c   :  { %588 = vst.msk [vmem:[%s1872_s3 + $0x178] sm:$0xff] %vm540_vm0, %v459_v16  ;;  %v335_v26 = vadd.f32 %v708_v2, %v200_v19  ;;  %v204_v27 = vmul.f32 %v703_v1, %v69_v15  ;;  %v460_v29 = vmax.f32 %v332_v20, 0.0  ;;  %v336_v30 = vadd.f32 %v708_v2, %v201_v21  ;;  %v85_v17 = vld [vmem:[%s1869_s0 + $0x238] sm:$0xff] }
  0x2d   :  { %v337_v31 = vadd.f32 %v708_v2, %v202_v22  ;;  %v338_v32 = vadd.f32 %v708_v2, %v203_v23  ;;  %v461_v36 = vmax.f32 %v333_v24, 0.0  ;;  %v462_v37 = vmax.f32 %v334_v25, 0.0 }
  0x2e   :  { %v463_v38 = vmax.f32 %v335_v26, 0.0  ;;  %v339_v39 = vadd.f32 %v708_v2, %v204_v27  ;;  %589 = vst.msk [vmem:[%s1872_s3 + $0x180] sm:$0xff] %vm540_vm0, %v460_v29  ;;  %v464_v43 = vmax.f32 %v336_v30, 0.0  ;;  %v205_v46 = vmul.f32 %v703_v1, %v70_v28  ;;  %v86_v30 = vld [vmem:[%s1869_s0 + $0x240] sm:$0xff] }
  0x2f   :  { %v465_v44 = vmax.f32 %v337_v31, 0.0  ;;  %v466_v45 = vmax.f32 %v338_v32, 0.0  ;;  %590 = vst.msk [vmem:[%s1872_s3 + $0x188] sm:$0xff] %vm540_vm0, %v461_v36  ;;  %591 = vst.msk [vmem:[%s1872_s3 + $0x190] sm:$0xff] %vm540_vm0, %v462_v37  ;;  %v206_v49 = vmul.f32 %v703_v1, %v71_v33  ;;  %v207_v50 = vmul.f32 %v703_v1, %v72_v34  ;;  %v88_v36 = vld [vmem:[%s1869_s0 + $0x250] sm:$0xff]  ;;  %v89_v37 = vld [vmem:[%s1869_s0 + $0x258] sm:$0xff] }
  0x30   :  { %592 = vst.msk [vmem:[%s1872_s3 + $0x198] sm:$0xff] %vm540_vm0, %v463_v38  ;;  %v467_v48 = vmax.f32 %v339_v39, 0.0  ;;  %v208_v51 = vmul.f32 %v703_v1, %v73_v35  ;;  %593 = vst.msk [vmem:[%s1872_s3 + $0x1a0] sm:$0xff] %vm540_vm0, %v464_v43  ;;  %v340_v52 = vadd.f32 %v708_v2, %v205_v46  ;;  %v209_v53 = vmul.f32 %v703_v1, %v74_v40  ;;  %v87_v35 = vld [vmem:[%s1869_s0 + $0x248] sm:$0xff] }
  0x31   :  { %594 = vst.msk [vmem:[%s1872_s3 + $0x1a8] sm:$0xff] %vm540_vm0, %v465_v44  ;;  %595 = vst.msk [vmem:[%s1872_s3 + $0x1b0] sm:$0xff] %vm540_vm0, %v466_v45  ;;  %v210_v54 = vmul.f32 %v703_v1, %v75_v41  ;;  %v211_v55 = vmul.f32 %v703_v1, %v76_v42  ;;  %v341_v56 = vadd.f32 %v708_v2, %v206_v49  ;;  %v90_v42 = vld [vmem:[%s1869_s0 + $0x260] sm:$0xff]  ;;  %v91_v43 = vld [vmem:[%s1869_s0 + $0x268] sm:$0xff] }
  0x32   :  { %596 = vst.msk [vmem:[%s1872_s3 + $0x1b8] sm:$0xff] %vm540_vm0, %v467_v48  ;;  %v342_v57 = vadd.f32 %v708_v2, %v207_v50  ;;  %v343_v58 = vadd.f32 %v708_v2, %v208_v51  ;;  %v212_v59 = vmul.f32 %v703_v1, %v77_v47  ;;  %v468_v61 = vmax.f32 %v340_v52, 0.0  ;;  %v92_v44 = vld [vmem:[%s1869_s0 + $0x270] sm:$0xff]  ;;  %v93_v49 = vld [vmem:[%s1869_s0 + $0x278] sm:$0xff] }
  0x33   :  { %v344_v62 = vadd.f32 %v708_v2, %v209_v53  ;;  %v345_v63 = vadd.f32 %v708_v2, %v210_v54  ;;  %v346_v0 = vadd.f32 %v708_v2, %v211_v55  ;;  %v469_v6 = vmax.f32 %v341_v56, 0.0 }
  0x34   :  { %v470_v7 = vmax.f32 %v342_v57, 0.0  ;;  %v471_v8 = vmax.f32 %v343_v58, 0.0  ;;  %v347_v9 = vadd.f32 %v708_v2, %v212_v59  ;;  %597 = vst.msk [vmem:[%s1872_s3 + $0x1c0] sm:$0xff] %vm540_vm0, %v468_v61  ;;  %v213_v16 = vmul.f32 %v703_v1, %v78_v60 }
  0x35   :  { %v472_v13 = vmax.f32 %v344_v62, 0.0  ;;  %v473_v14 = vmax.f32 %v345_v63, 0.0  ;;  %v474_v15 = vmax.f32 %v346_v0, 0.0  ;;  %598 = vst.msk [vmem:[%s1872_s3 + $0x1c8] sm:$0xff] %vm540_vm0, %v469_v6  ;;  %v214_v19 = vmul.f32 %v703_v1, %v79_v3  ;;  %v94_v62 = vld [vmem:[%s1869_s0 + $0x280] sm:$0xff]  ;;  %v96_v6 = vld [vmem:[%s1869_s0 + $0x290] sm:$0xff] }
  0x36   :  { %599 = vst.msk [vmem:[%s1872_s3 + $0x1d0] sm:$0xff] %vm540_vm0, %v470_v7  ;;  %600 = vst.msk [vmem:[%s1872_s3 + $0x1d8] sm:$0xff] %vm540_vm0, %v471_v8  ;;  %v475_v18 = vmax.f32 %v347_v9, 0.0  ;;  %v215_v20 = vmul.f32 %v703_v1, %v80_v4  ;;  %v216_v21 = vmul.f32 %v703_v1, %v81_v5  ;;  %v348_v22 = vadd.f32 %v708_v2, %v213_v16  ;;  %v95_v5 = vld [vmem:[%s1869_s0 + $0x288] sm:$0xff]  ;;  %v97_v7 = vld [vmem:[%s1869_s0 + $0x298] sm:$0xff] }
  0x37   :  { %601 = vst.msk [vmem:[%s1872_s3 + $0x1e0] sm:$0xff] %vm540_vm0, %v472_v13  ;;  %602 = vst.msk [vmem:[%s1872_s3 + $0x1e8] sm:$0xff] %vm540_vm0, %v473_v14  ;;  %v217_v23 = vmul.f32 %v703_v1, %v82_v10  ;;  %v218_v24 = vmul.f32 %v703_v1, %v83_v11  ;;  %v219_v25 = vmul.f32 %v703_v1, %v84_v12  ;;  %v98_v12 = vld [vmem:[%s1869_s0 + $0x2a0] sm:$0xff]  ;;  %v99_v13 = vld [vmem:[%s1869_s0 + $0x2a8] sm:$0xff] }
  0x38   :  { %603 = vst.msk [vmem:[%s1872_s3 + $0x1f0] sm:$0xff] %vm540_vm0, %v474_v15  ;;  %604 = vst.msk [vmem:[%s1872_s3 + $0x1f8] sm:$0xff] %vm540_vm0, %v475_v18  ;;  %v349_v26 = vadd.f32 %v708_v2, %v214_v19  ;;  %v350_v27 = vadd.f32 %v708_v2, %v215_v20  ;;  %v351_v28 = vadd.f32 %v708_v2, %v216_v21  ;;  %v476_v31 = vmax.f32 %v348_v22, 0.0  ;;  %v100_v14 = vld [vmem:[%s1869_s0 + $0x2b0] sm:$0xff]  ;;  %v101_v19 = vld [vmem:[%s1869_s0 + $0x2b8] sm:$0xff] }
  0x39   :  { %v220_v29 = vmul.f32 %v703_v1, %v85_v17  ;;  %v352_v32 = vadd.f32 %v708_v2, %v217_v23  ;;  %v353_v33 = vadd.f32 %v708_v2, %v218_v24  ;;  %v354_v34 = vadd.f32 %v708_v2, %v219_v25 }
  0x3a   :  { %v477_v38 = vmax.f32 %v349_v26, 0.0  ;;  %v478_v39 = vmax.f32 %v350_v27, 0.0  ;;  %v479_v40 = vmax.f32 %v351_v28, 0.0  ;;  %605 = vst.msk [vmem:[%s1872_s3 + $0x200] sm:$0xff] %vm540_vm0, %v476_v31  ;;  %v221_v48 = vmul.f32 %v703_v1, %v86_v30 }
  0x3b   :  { %v355_v41 = vadd.f32 %v708_v2, %v220_v29  ;;  %v480_v45 = vmax.f32 %v352_v32, 0.0  ;;  %v481_v46 = vmax.f32 %v353_v33, 0.0  ;;  %v482_v47 = vmax.f32 %v354_v34, 0.0  ;;  %v102_v32 = vld [vmem:[%s1869_s0 + $0x2c0] sm:$0xff] }
  0x3c   :  { %606 = vst.msk [vmem:[%s1872_s3 + $0x208] sm:$0xff] %vm540_vm0, %v477_v38  ;;  %607 = vst.msk [vmem:[%s1872_s3 + $0x210] sm:$0xff] %vm540_vm0, %v478_v39  ;;  %v222_v51 = vmul.f32 %v703_v1, %v87_v35  ;;  %v223_v52 = vmul.f32 %v703_v1, %v88_v36  ;;  %v224_v53 = vmul.f32 %v703_v1, %v89_v37  ;;  %v103_v37 = vld [vmem:[%s1869_s0 + $0x2c8] sm:$0xff]  ;;  %v104_v38 = vld [vmem:[%s1869_s0 + $0x2d0] sm:$0xff] }
  0x3d   :  { %608 = vst.msk [vmem:[%s1872_s3 + $0x218] sm:$0xff] %vm540_vm0, %v479_v40  ;;  %v483_v50 = vmax.f32 %v355_v41, 0.0  ;;  %609 = vst.msk [vmem:[%s1872_s3 + $0x220] sm:$0xff] %vm540_vm0, %v480_v45  ;;  %v356_v54 = vadd.f32 %v708_v2, %v221_v48  ;;  %v225_v55 = vmul.f32 %v703_v1, %v90_v42  ;;  %v226_v56 = vmul.f32 %v703_v1, %v91_v43  ;;  %v105_v39 = vld [vmem:[%s1869_s0 + $0x2d8] sm:$0xff]  ;;  %v107_v45 = vld [vmem:[%s1869_s0 + $0x2e8] sm:$0xff] }
  0x3e   :  { %610 = vst.msk [vmem:[%s1872_s3 + $0x228] sm:$0xff] %vm540_vm0, %v481_v46  ;;  %611 = vst.msk [vmem:[%s1872_s3 + $0x230] sm:$0xff] %vm540_vm0, %v482_v47  ;;  %v227_v57 = vmul.f32 %v703_v1, %v92_v44  ;;  %v357_v58 = vadd.f32 %v708_v2, %v222_v51  ;;  %v358_v59 = vadd.f32 %v708_v2, %v223_v52  ;;  %v106_v44 = vld [vmem:[%s1869_s0 + $0x2e0] sm:$0xff]  ;;  %v108_v46 = vld [vmem:[%s1869_s0 + $0x2f0] sm:$0xff] }
  0x3f   :  { %612 = vst.msk [vmem:[%s1872_s3 + $0x238] sm:$0xff] %vm540_vm0, %v483_v50  ;;  %v359_v60 = vadd.f32 %v708_v2, %v224_v53  ;;  %v228_v61 = vmul.f32 %v703_v1, %v93_v49  ;;  %v484_v63 = vmax.f32 %v356_v54, 0.0  ;;  %v360_v0 = vadd.f32 %v708_v2, %v225_v55  ;;  %v109_v51 = vld [vmem:[%s1869_s0 + $0x2f8] sm:$0xff] }
  0x40   :  { %v361_v3 = vadd.f32 %v708_v2, %v226_v56  ;;  %v362_v4 = vadd.f32 %v708_v2, %v227_v57  ;;  %v485_v8 = vmax.f32 %v357_v58, 0.0  ;;  %v486_v9 = vmax.f32 %v358_v59, 0.0 }
  0x41   :  { %v487_v10 = vmax.f32 %v359_v60, 0.0  ;;  %v363_v11 = vadd.f32 %v708_v2, %v228_v61  ;;  %613 = vst.msk [vmem:[%s1872_s3 + $0x240] sm:$0xff] %vm540_vm0, %v484_v63  ;;  %v488_v15 = vmax.f32 %v360_v0, 0.0  ;;  %v229_v18 = vmul.f32 %v703_v1, %v94_v62  ;;  %v110_v0 = vld [vmem:[%s1869_s0 + $0x300] sm:$0xff] }
  0x42   :  { %v489_v16 = vmax.f32 %v361_v3, 0.0  ;;  %v490_v17 = vmax.f32 %v362_v4, 0.0  ;;  %614 = vst.msk [vmem:[%s1872_s3 + $0x248] sm:$0xff] %vm540_vm0, %v485_v8  ;;  %615 = vst.msk [vmem:[%s1872_s3 + $0x250] sm:$0xff] %vm540_vm0, %v486_v9  ;;  %v230_v21 = vmul.f32 %v703_v1, %v95_v5  ;;  %v231_v22 = vmul.f32 %v703_v1, %v96_v6  ;;  %v112_v8 = vld [vmem:[%s1869_s0 + $0x310] sm:$0xff]  ;;  %v113_v9 = vld [vmem:[%s1869_s0 + $0x318] sm:$0xff] }
  0x43   :  { %616 = vst.msk [vmem:[%s1872_s3 + $0x258] sm:$0xff] %vm540_vm0, %v487_v10  ;;  %v491_v20 = vmax.f32 %v363_v11, 0.0  ;;  %v232_v23 = vmul.f32 %v703_v1, %v97_v7  ;;  %617 = vst.msk [vmem:[%s1872_s3 + $0x260] sm:$0xff] %vm540_vm0, %v488_v15  ;;  %v364_v24 = vadd.f32 %v708_v2, %v229_v18  ;;  %v233_v25 = vmul.f32 %v703_v1, %v98_v12  ;;  %v111_v7 = vld [vmem:[%s1869_s0 + $0x308] sm:$0xff] }
  0x44   :  { %618 = vst.msk [vmem:[%s1872_s3 + $0x268] sm:$0xff] %vm540_vm0, %v489_v16  ;;  %619 = vst.msk [vmem:[%s1872_s3 + $0x270] sm:$0xff] %vm540_vm0, %v490_v17  ;;  %v234_v26 = vmul.f32 %v703_v1, %v99_v13  ;;  %v235_v27 = vmul.f32 %v703_v1, %v100_v14  ;;  %v365_v28 = vadd.f32 %v708_v2, %v230_v21  ;;  %v114_v14 = vld [vmem:[%s1869_s0 + $0x320] sm:$0xff]  ;;  %v115_v15 = vld [vmem:[%s1869_s0 + $0x328] sm:$0xff] }
  0x45   :  { %620 = vst.msk [vmem:[%s1872_s3 + $0x278] sm:$0xff] %vm540_vm0, %v491_v20  ;;  %v366_v29 = vadd.f32 %v708_v2, %v231_v22  ;;  %v367_v30 = vadd.f32 %v708_v2, %v232_v23  ;;  %v236_v31 = vmul.f32 %v703_v1, %v101_v19  ;;  %v492_v33 = vmax.f32 %v364_v24, 0.0  ;;  %v116_v16 = vld [vmem:[%s1869_s0 + $0x330] sm:$0xff]  ;;  %v117_v21 = vld [vmem:[%s1869_s0 + $0x338] sm:$0xff] }
  0x46   :  { %v368_v34 = vadd.f32 %v708_v2, %v233_v25  ;;  %v369_v35 = vadd.f32 %v708_v2, %v234_v26  ;;  %v370_v36 = vadd.f32 %v708_v2, %v235_v27  ;;  %v493_v40 = vmax.f32 %v365_v28, 0.0 }
  0x47   :  { %v494_v41 = vmax.f32 %v366_v29, 0.0  ;;  %v495_v42 = vmax.f32 %v367_v30, 0.0  ;;  %v371_v43 = vadd.f32 %v708_v2, %v236_v31  ;;  %621 = vst.msk [vmem:[%s1872_s3 + $0x280] sm:$0xff] %vm540_vm0, %v492_v33  ;;  %v237_v50 = vmul.f32 %v703_v1, %v102_v32 }
  0x48   :  { %v496_v47 = vmax.f32 %v368_v34, 0.0  ;;  %v497_v48 = vmax.f32 %v369_v35, 0.0  ;;  %v498_v49 = vmax.f32 %v370_v36, 0.0  ;;  %622 = vst.msk [vmem:[%s1872_s3 + $0x288] sm:$0xff] %vm540_vm0, %v493_v40  ;;  %v238_v53 = vmul.f32 %v703_v1, %v103_v37  ;;  %v118_v34 = vld [vmem:[%s1869_s0 + $0x340] sm:$0xff]  ;;  %v120_v40 = vld [vmem:[%s1869_s0 + $0x350] sm:$0xff] }
  0x49   :  { %623 = vst.msk [vmem:[%s1872_s3 + $0x290] sm:$0xff] %vm540_vm0, %v494_v41  ;;  %624 = vst.msk [vmem:[%s1872_s3 + $0x298] sm:$0xff] %vm540_vm0, %v495_v42  ;;  %v499_v52 = vmax.f32 %v371_v43, 0.0  ;;  %v239_v54 = vmul.f32 %v703_v1, %v104_v38  ;;  %v240_v55 = vmul.f32 %v703_v1, %v105_v39  ;;  %v372_v56 = vadd.f32 %v708_v2, %v237_v50  ;;  %v119_v39 = vld [vmem:[%s1869_s0 + $0x348] sm:$0xff] }
  0x4a   :  { %625 = vst.msk [vmem:[%s1872_s3 + $0x2a0] sm:$0xff] %vm540_vm0, %v496_v47  ;;  %626 = vst.msk [vmem:[%s1872_s3 + $0x2a8] sm:$0xff] %vm540_vm0, %v497_v48  ;;  %v241_v57 = vmul.f32 %v703_v1, %v106_v44  ;;  %v242_v58 = vmul.f32 %v703_v1, %v107_v45  ;;  %v243_v59 = vmul.f32 %v703_v1, %v108_v46  ;;  %v1625_v44 = vld [vmem:[%s1871_s2] ss:$0 sm:$0xff]  ;;  %v123_v46 = vld [vmem:[%s1869_s0 + $0x368] sm:$0xff] }
  0x4b   :  { %627 = vst.msk [vmem:[%s1872_s3 + $0x2b0] sm:$0xff] %vm540_vm0, %v498_v49  ;;  %628 = vst.msk [vmem:[%s1872_s3 + $0x2b8] sm:$0xff] %vm540_vm0, %v499_v52  ;;  %v373_v60 = vadd.f32 %v708_v2, %v238_v53  ;;  %v374_v61 = vadd.f32 %v708_v2, %v239_v54  ;;  %v375_v62 = vadd.f32 %v708_v2, %v240_v55  ;;  %v500_v3 = vmax.f32 %v372_v56, 0.0  ;;  %v122_v45 = vld [vmem:[%s1869_s0 + $0x360] sm:$0xff]  ;;  %v124_v47 = vld [vmem:[%s1869_s0 + $0x370] sm:$0xff] }
  0x4c   :  { %v244_v63 = vmul.f32 %v703_v1, %v109_v51  ;;  %v376_v4 = vadd.f32 %v708_v2, %v241_v57  ;;  %v377_v5 = vadd.f32 %v708_v2, %v242_v58  ;;  %v378_v6 = vadd.f32 %v708_v2, %v243_v59  ;;  %v1644_v51 = vld [vmem:[%s1870_s1] ss:$0 sm:$0xff]  ;;  %v125_v53 = vld [vmem:[%s1869_s0 + $0x378] sm:$0xff] }
  0x4d   :  { %v501_v10 = vmax.f32 %v373_v60, 0.0  ;;  %v502_v11 = vmax.f32 %v374_v61, 0.0  ;;  %v503_v12 = vmax.f32 %v375_v62, 0.0  ;;  %629 = vst.msk [vmem:[%s1872_s3 + $0x2c0] sm:$0xff] %vm540_vm0, %v500_v3  ;;  %v245_v20 = vmul.f32 %v703_v1, %v110_v0 }
  0x4e   :  { %v379_v13 = vadd.f32 %v708_v2, %v244_v63  ;;  %v504_v17 = vmax.f32 %v376_v4, 0.0  ;;  %v505_v18 = vmax.f32 %v377_v5, 0.0  ;;  %v506_v19 = vmax.f32 %v378_v6, 0.0  ;;  %v126_v4 = vld [vmem:[%s1869_s0 + $0x380] sm:$0xff] }
  0x4f   :  { %630 = vst.msk [vmem:[%s1872_s3 + $0x2c8] sm:$0xff] %vm540_vm0, %v501_v10  ;;  %631 = vst.msk [vmem:[%s1872_s3 + $0x2d0] sm:$0xff] %vm540_vm0, %v502_v11  ;;  %v246_v23 = vmul.f32 %v703_v1, %v111_v7  ;;  %v247_v24 = vmul.f32 %v703_v1, %v112_v8  ;;  %v248_v25 = vmul.f32 %v703_v1, %v113_v9  ;;  %v127_v9 = vld [vmem:[%s1869_s0 + $0x388] sm:$0xff]  ;;  %v128_v10 = vld [vmem:[%s1869_s0 + $0x390] sm:$0xff] }
  0x50   :  { %632 = vst.msk [vmem:[%s1872_s3 + $0x2d8] sm:$0xff] %vm540_vm0, %v503_v12  ;;  %v507_v22 = vmax.f32 %v379_v13, 0.0  ;;  %633 = vst.msk [vmem:[%s1872_s3 + $0x2e0] sm:$0xff] %vm540_vm0, %v504_v17  ;;  %v380_v26 = vadd.f32 %v708_v2, %v245_v20  ;;  %v249_v27 = vmul.f32 %v703_v1, %v114_v14  ;;  %v250_v28 = vmul.f32 %v703_v1, %v115_v15  ;;  %v129_v11 = vld [vmem:[%s1869_s0 + $0x398] sm:$0xff]  ;;  %v131_v17 = vld [vmem:[%s1869_s0 + $0x3a8] sm:$0xff] }
  0x51   :  { %634 = vst.msk [vmem:[%s1872_s3 + $0x2e8] sm:$0xff] %vm540_vm0, %v505_v18  ;;  %635 = vst.msk [vmem:[%s1872_s3 + $0x2f0] sm:$0xff] %vm540_vm0, %v506_v19  ;;  %v251_v29 = vmul.f32 %v703_v1, %v116_v16  ;;  %v381_v30 = vadd.f32 %v708_v2, %v246_v23  ;;  %v382_v31 = vadd.f32 %v708_v2, %v247_v24  ;;  %v130_v16 = vld [vmem:[%s1869_s0 + $0x3a0] sm:$0xff]  ;;  %v132_v18 = vld [vmem:[%s1869_s0 + $0x3b0] sm:$0xff] }
  0x52   :  { %636 = vst.msk [vmem:[%s1872_s3 + $0x2f8] sm:$0xff] %vm540_vm0, %v507_v22  ;;  %v383_v32 = vadd.f32 %v708_v2, %v248_v25  ;;  %v252_v33 = vmul.f32 %v703_v1, %v117_v21  ;;  %v508_v35 = vmax.f32 %v380_v26, 0.0  ;;  %v384_v36 = vadd.f32 %v708_v2, %v249_v27  ;;  %v121_v1 = vld [vmem:[%s1869_s0 + $0x358] sm:$0xff] }
  0x53   :  { %v385_v37 = vadd.f32 %v708_v2, %v250_v28  ;;  %v386_v38 = vadd.f32 %v708_v2, %v251_v29  ;;  %v509_v41 = vmax.f32 %v381_v30, 0.0  ;;  %v510_v42 = vmax.f32 %v382_v31, 0.0  ;;  %v133_v23 = vld [vmem:[%s1869_s0 + $0x3b8] sm:$0xff] }
  0x54   :  { %v511_v43 = vmax.f32 %v383_v32, 0.0  ;;  %v387_v2 = vadd.f32 %v1625_v44, %v252_v33  ;;  %637 = vst.msk [vmem:[%s1872_s3 + $0x300] sm:$0xff] %vm540_vm0, %v508_v35  ;;  %v512_v48 = vmax.f32 %v384_v36, 0.0  ;;  %v253_v52 = vmul.f32 %v1644_v51, %v118_v34  ;;  %v134_v36 = vld [vmem:[%s1869_s0 + $0x3c0] sm:$0xff] }
  0x55   :  { %v513_v49 = vmax.f32 %v385_v37, 0.0  ;;  %v514_v50 = vmax.f32 %v386_v38, 0.0  ;;  %638 = vst.msk [vmem:[%s1872_s3 + $0x308] sm:$0xff] %vm540_vm0, %v509_v41  ;;  %639 = vst.msk [vmem:[%s1872_s3 + $0x310] sm:$0xff] %vm540_vm0, %v510_v42  ;;  %v254_v55 = vmul.f32 %v1644_v51, %v119_v39  ;;  %v255_v56 = vmul.f32 %v1644_v51, %v120_v40  ;;  %v136_v41 = vld [vmem:[%s1869_s0 + $0x3d0] sm:$0xff]  ;;  %v137_v42 = vld [vmem:[%s1869_s0 + $0x3d8] sm:$0xff] }
  0x56   :  { %640 = vst.msk [vmem:[%s1872_s3 + $0x318] sm:$0xff] %vm540_vm0, %v511_v43  ;;  %v515_v54 = vmax.f32 %v387_v2, 0.0  ;;  %v256_v57 = vmul.f32 %v1644_v51, %v121_v1  ;;  %641 = vst.msk [vmem:[%s1872_s3 + $0x320] sm:$0xff] %vm540_vm0, %v512_v48  ;;  %v388_v58 = vadd.f32 %v1625_v44, %v253_v52  ;;  %v257_v59 = vmul.f32 %v1644_v51, %v122_v45  ;;  %v135_v1 = vld [vmem:[%s1869_s0 + $0x3c8] sm:$0xff] }
  0x57   :  { %642 = vst.msk [vmem:[%s1872_s3 + $0x328] sm:$0xff] %vm540_vm0, %v513_v49  ;;  %643 = vst.msk [vmem:[%s1872_s3 + $0x330] sm:$0xff] %vm540_vm0, %v514_v50  ;;  %v258_v60 = vmul.f32 %v1644_v51, %v123_v46  ;;  %v259_v61 = vmul.f32 %v1644_v51, %v124_v47  ;;  %v389_v62 = vadd.f32 %v1625_v44, %v254_v55  ;;  %v138_v47 = vld [vmem:[%s1869_s0 + $0x3e0] sm:$0xff]  ;;  %v139_v48 = vld [vmem:[%s1869_s0 + $0x3e8] sm:$0xff] }
  0x58   :  { %644 = vst.msk [vmem:[%s1872_s3 + $0x338] sm:$0xff] %vm540_vm0, %v515_v54  ;;  %v390_v63 = vadd.f32 %v1625_v44, %v255_v56  ;;  %v391_v0 = vadd.f32 %v1625_v44, %v256_v57  ;;  %v260_v3 = vmul.f32 %v1644_v51, %v125_v53  ;;  %v516_v5 = vmax.f32 %v388_v58, 0.0  ;;  %v140_v49 = vld [vmem:[%s1869_s0 + $0x3f0] sm:$0xff]  ;;  %v141_v55 = vld [vmem:[%s1869_s0 + $0x3f8] sm:$0xff] }
  0x59   :  { %v392_v6 = vadd.f32 %v1625_v44, %v257_v59  ;;  %v393_v7 = vadd.f32 %v1625_v44, %v258_v60  ;;  %v394_v8 = vadd.f32 %v1625_v44, %v259_v61  ;;  %v517_v12 = vmax.f32 %v389_v62, 0.0 }
  0x5a   :  { %v518_v13 = vmax.f32 %v390_v63, 0.0  ;;  %v519_v14 = vmax.f32 %v391_v0, 0.0  ;;  %v395_v15 = vadd.f32 %v1625_v44, %v260_v3  ;;  %645 = vst.msk [vmem:[%s1872_s3 + $0x340] sm:$0xff] %vm540_vm0, %v516_v5  ;;  %v261_v22 = vmul.f32 %v1644_v51, %v126_v4 }
  0x5b   :  { %v520_v19 = vmax.f32 %v392_v6, 0.0  ;;  %v521_v20 = vmax.f32 %v393_v7, 0.0  ;;  %v522_v21 = vmax.f32 %v394_v8, 0.0  ;;  %646 = vst.msk [vmem:[%s1872_s3 + $0x348] sm:$0xff] %vm540_vm0, %v517_v12  ;;  %v262_v25 = vmul.f32 %v1644_v51, %v127_v9 }
  0x5c   :  { %647 = vst.msk [vmem:[%s1872_s3 + $0x350] sm:$0xff] %vm540_vm0, %v518_v13  ;;  %648 = vst.msk [vmem:[%s1872_s3 + $0x358] sm:$0xff] %vm540_vm0, %v519_v14  ;;  %v523_v24 = vmax.f32 %v395_v15, 0.0  ;;  %v263_v26 = vmul.f32 %v1644_v51, %v128_v10  ;;  %v264_v27 = vmul.f32 %v1644_v51, %v129_v11  ;;  %v396_v28 = vadd.f32 %v1625_v44, %v261_v22 }
  0x5d   :  { %649 = vst.msk [vmem:[%s1872_s3 + $0x360] sm:$0xff] %vm540_vm0, %v520_v19  ;;  %650 = vst.msk [vmem:[%s1872_s3 + $0x368] sm:$0xff] %vm540_vm0, %v521_v20  ;;  %v265_v29 = vmul.f32 %v1644_v51, %v130_v16  ;;  %v266_v30 = vmul.f32 %v1644_v51, %v131_v17  ;;  %v267_v31 = vmul.f32 %v1644_v51, %v132_v18 }
  0x5e   :  { %651 = vst.msk [vmem:[%s1872_s3 + $0x370] sm:$0xff] %vm540_vm0, %v522_v21  ;;  %652 = vst.msk [vmem:[%s1872_s3 + $0x378] sm:$0xff] %vm540_vm0, %v523_v24  ;;  %v397_v32 = vadd.f32 %v1625_v44, %v262_v25  ;;  %v398_v33 = vadd.f32 %v1625_v44, %v263_v26  ;;  %v399_v34 = vadd.f32 %v1625_v44, %v264_v27  ;;  %v524_v37 = vmax.f32 %v396_v28, 0.0 }
  0x5f   :  { %v268_v35 = vmul.f32 %v1644_v51, %v133_v23  ;;  %v400_v38 = vadd.f32 %v1625_v44, %v265_v29  ;;  %v401_v39 = vadd.f32 %v1625_v44, %v266_v30  ;;  %v402_v40 = vadd.f32 %v1625_v44, %v267_v31 }
  0x60   :  { %v525_v43 = vmax.f32 %v397_v32, 0.0  ;;  %v526_v2 = vmax.f32 %v398_v33, 0.0  ;;  %v527_v45 = vmax.f32 %v399_v34, 0.0  ;;  %653 = vst.msk [vmem:[%s1872_s3 + $0x380] sm:$0xff] %vm540_vm0, %v524_v37  ;;  %v269_v54 = vmul.f32 %v1644_v51, %v134_v36 }
  0x61   :  { %v403_v46 = vadd.f32 %v1625_v44, %v268_v35  ;;  %v528_v50 = vmax.f32 %v400_v38, 0.0  ;;  %v529_v52 = vmax.f32 %v401_v39, 0.0  ;;  %v530_v53 = vmax.f32 %v402_v40, 0.0 }
  0x62   :  { %654 = vst.msk [vmem:[%s1872_s3 + $0x388] sm:$0xff] %vm540_vm0, %v525_v43  ;;  %655 = vst.msk [vmem:[%s1872_s3 + $0x390] sm:$0xff] %vm540_vm0, %v526_v2  ;;  %v270_v57 = vmul.f32 %v1644_v51, %v135_v1  ;;  %v271_v58 = vmul.f32 %v1644_v51, %v136_v41  ;;  %v272_v59 = vmul.f32 %v1644_v51, %v137_v42 }
  0x63   :  { %656 = vst.msk [vmem:[%s1872_s3 + $0x398] sm:$0xff] %vm540_vm0, %v527_v45  ;;  %v531_v56 = vmax.f32 %v403_v46, 0.0  ;;  %657 = vst.msk [vmem:[%s1872_s3 + $0x3a0] sm:$0xff] %vm540_vm0, %v528_v50  ;;  %v404_v60 = vadd.f32 %v1625_v44, %v269_v54  ;;  %v273_v61 = vmul.f32 %v1644_v51, %v138_v47  ;;  %v274_v62 = vmul.f32 %v1644_v51, %v139_v48 }
  0x64   :  { %658 = vst.msk [vmem:[%s1872_s3 + $0x3a8] sm:$0xff] %vm540_vm0, %v529_v52  ;;  %659 = vst.msk [vmem:[%s1872_s3 + $0x3b0] sm:$0xff] %vm540_vm0, %v530_v53  ;;  %v275_v63 = vmul.f32 %v1644_v51, %v140_v49  ;;  %v405_v0 = vadd.f32 %v1625_v44, %v270_v57  ;;  %v406_v3 = vadd.f32 %v1625_v44, %v271_v58 }
  0x65   :  { %660 = vst.msk [vmem:[%s1872_s3 + $0x3b8] sm:$0xff] %vm540_vm0, %v531_v56  ;;  %v407_v4 = vadd.f32 %v1625_v44, %v272_v59  ;;  %v276_v5 = vmul.f32 %v1644_v51, %v141_v55  ;;  %v532_v6 = vmax.f32 %v404_v60, 0.0  ;;  %v408_v7 = vadd.f32 %v1625_v44, %v273_v61 }
  0x66   :  { %v409_v8 = vadd.f32 %v1625_v44, %v274_v62  ;;  %v410_v9 = vadd.f32 %v1625_v44, %v275_v63  ;;  %v533_v10 = vmax.f32 %v405_v0, 0.0  ;;  %v534_v11 = vmax.f32 %v406_v3, 0.0 }
  0x67   :  { %v535_v12 = vmax.f32 %v407_v4, 0.0  ;;  %v411_v13 = vadd.f32 %v1625_v44, %v276_v5  ;;  %661 = vst.msk [vmem:[%s1872_s3 + $0x3c0] sm:$0xff] %vm540_vm0, %v532_v6  ;;  %v536_v14 = vmax.f32 %v408_v7, 0.0 }
  0x68   :  { %v537_v15 = vmax.f32 %v409_v8, 0.0  ;;  %v538_v51 = vmax.f32 %v410_v9, 0.0  ;;  %662 = vst.msk [vmem:[%s1872_s3 + $0x3c8] sm:$0xff] %vm540_vm0, %v533_v10  ;;  %663 = vst.msk [vmem:[%s1872_s3 + $0x3d0] sm:$0xff] %vm540_vm0, %v534_v11 }
  0x69   :  { %664 = vst.msk [vmem:[%s1872_s3 + $0x3d8] sm:$0xff] %vm540_vm0, %v535_v12  ;;  %v539_v44 = vmax.f32 %v411_v13, 0.0  ;;  %665 = vst.msk [vmem:[%s1872_s3 + $0x3e0] sm:$0xff] %vm540_vm0, %v536_v14 }
  0x6a   :  { %666 = vst.msk [vmem:[%s1872_s3 + $0x3e8] sm:$0xff] %vm540_vm0, %v537_v15  ;;  %667 = vst.msk [vmem:[%s1872_s3 + $0x3f0] sm:$0xff] %vm540_vm0, %v538_v51 }
  0x6b   :  { %668 = vst.msk [vmem:[%s1872_s3 + $0x3f8] sm:$0xff] %vm540_vm0, %v539_v44 }

// kernel: decoder_block_3d.8
= control target key start
LH: loop header
LB: loop body
LE: loop exit
PB: predicated region body
PF: predicated region fallthrough
CT: control target
= control target key end

     0   :  { %s2345_s15 = smov 0   ;;  %s2347_s16 = smov 0   ;;  %s2720_s0 = inlined_call_operand.vmem [shape: f32[2,10,10,10,8], index: 0, kind: input, shape index: {}]   ;;  %s2721_s1 = inlined_call_operand.vmem [shape: f32[27,8,8], index: 1, kind: input, shape index: {}]   ;;  %s2722_s2 = inlined_call_operand.vmem [shape: f32[2,8,64,8], index: 2, kind: output, shape index: {0}]   ;;  %s2723_s3 = inlined_call_operand.vmem [shape: f32[1,8], index: 3, kind: output, shape index: {1}]   ;;  %s2724_s4 = inlined_call_operand.vmem [shape: f32[1,8], index: 4, kind: output, shape index: {2}]  }
   0x1   :  { %s2349_s17 = smov 0   ;;  %s2351_s18 = smov 0  }
   0x2   :  { %s2353_s19 = smov 0   ;;  %s2355_s20 = smov 0  }
   0x3   :  { %s2357_s21 = smov 0  }
   0x4 LB: > { %s27_s22 = sadd.s32 1, %s2304_s18  ;;  %s30_s23 = sadd.s32 1, %s2308_s19  ;;  %s2316_s21 = sphi %s2357_s21, %s15_s21   ;;  %s2312_s20 = sphi %s2355_s20, %s2732_s20   ;;  %s2308_s19 = sphi %s2353_s19, %s2731_s19   ;;  %s2304_s18 = sphi %s2351_s18, %s2730_s18   ;;  %s2300_s17 = sphi %s2349_s17, %s2729_s17   ;;  %s2296_s16 = sphi %s2347_s16, %s2728_s16   ;;  %s2292_s15 = sphi %s2345_s15, %s2727_s15  }
   0x5   : > { %p28_p0 = scmp.ge.s32.totalorder %s27_s22, 3  ;;  %p1847_p1 = scmp.ge.s32.totalorder %s2316_s21, 1 }
   0x6   : > { %p188_p2 = scmp.lt.s32.totalorder %s2316_s21, 49  ;;  %s34_s24 = sadd.s32 1, %s2312_s20 }
   0x7   : > { %s2734_s22 = smov (%p28_p0, %s27_s22), 0  ;;  %s2736_s23 = smov (!%p28_p0, %s30_s23), %s2308_s19 }
   0x8   : > { %p189_p3 = pnand %p1847_p1, %p188_p2  ;;  %p32_p4 = scmp.ge.s32.totalorder %s2736_s23, 8 }
   0x9   : > { %s223_s25 = sadd.s32 (!%p189_p3), %s2292_s15, %s2296_s16  ;;  %p224_p6 = scmp.lt.s32.totalorder (!%p189_p3), %s2300_s17, 1 }
   0xa   : > { %s2738_s23 = smov (%p32_p4, %s2736_s23), 0  ;;  %s2740_s24 = smov (!%p32_p4, %s34_s24), %s2312_s20 }
   0xb   : > { %p36_p5 = scmp.ge.s32.totalorder %s2740_s24, 2  ;;  %192 = sbr.rel (%p189_p3) target bundleno = 350 (0x15e), region = 28 }
   0xc   : > { %p226_p7 = scmp.lt.s32.totalorder (!%p189_p3), %s223_s25, 9  ;;  %p236_p8 = scmp.lt.s32.totalorder (!%p189_p3), %s2296_s16, 7 }
   0xd   : > { %s2742_s24 = smov (%p36_p5, %s2740_s24), 0  ;;  %p243_p9 = scmp.eq.s32.totalorder (!%p189_p3), %s2300_s17, 0 }
   0xe   : > { %2725 = sst [smem:[#allocation3_spill]] %s2742_s24  ;;  %p244_p10 = scmp.eq.s32.totalorder (!%p189_p3), %s2296_s16, 0 }
   0xf   : > { %p247_p12 = scmp.eq.s32.totalorder (!%p189_p3), %s2292_s15, 0 }
  0x10   : > { %s225_s26 = scalar_select %p224_p6, %s2300_s17, 1 }
  0x11   : > { %s2744_s25 = smov (!%p226_p7, %s223_s25), 9  ;;  %p245_p11 = pnand %p244_p10, %p243_p9 }
  0x12   : > { %s2203_s27 = smul.u32 200, %s225_s26  ;;  %s1850_s28 = sshll.u32 %s225_s26, 6 }
  0x13   : > { %s2202_s29 = smul.u32 20, %s2744_s25  ;;  %p246_p13 = pneg %p245_p11 }
  0x14   : > { %s237_s30 = scalar_select %p236_p8, %s2296_s16, 7 }
  0x15   : > { %s230_s5 = sadd.s32 %s2203_s27, %s2202_s29  ;;  %p248_p0 = pnand %p247_p12, %p246_p13 }
  0x16   : > { %s1848_s6 = sshll.u32 %s230_s5, 3  ;;  %s1849_s7 = sshll.u32 %s237_s30, 3 }
  0x17   : > { %s2404_s10 = scalar_lea.vmem %s2720_s0, %s1848_s6  ;;  %s240_s11 = sadd.s32 %s1850_s28, %s1849_s7 }
  0x18   : > { %s1851_s12 = sshll.u32 %s240_s11, 3  ;;  %251 = sbr.rel (%p248_p0) target bundleno = 31 (0x1f), region = 32 }
  0x19   : > { %s2409_s24 = scalar_lea.vmem %s2722_s2, %s1851_s12 }
  0x1d   : > { %vm252_vm0 = vcmask 57344   ;;  %v2318_v0 = vmov 0.0  }
  0x1e   : > { %253 = vst.msk [vmem:[%s2723_s3] sm:$0x1] %vm252_vm0, %v2318_v0  ;;  %254 = vst.msk [vmem:[%s2724_s4] sm:$0x1] %vm252_vm0, %v2318_v0 }
  0x1f PF: > { %p1852_p1 = scmp.ne.s32.totalorder %s2292_s15, 0 }
  0x21   : > { %257 = sbr.rel (%p1852_p1) target bundleno = 43 (0x2b), region = 36 }
  0x26   : > { %vm258_vm1 = vcmask 64512   ;;  %v2319_v1 = vmov 0.0  }
  0x27   : > { %259 = vst.msk [vmem:[#allocation2] sm:$0xff] %vm258_vm1, %v2319_v1  ;;  %260 = vst.msk [vmem:[#allocation2 + $0x8] sm:$0xff] %vm258_vm1, %v2319_v1 }
  0x28   : > { %261 = vst.msk [vmem:[#allocation2 + $0x10] sm:$0xff] %vm258_vm1, %v2319_v1  ;;  %262 = vst.msk [vmem:[#allocation2 + $0x18] sm:$0xff] %vm258_vm1, %v2319_v1 }
  0x29   : > { %263 = vst.msk [vmem:[#allocation2 + $0x20] sm:$0xff] %vm258_vm1, %v2319_v1  ;;  %264 = vst.msk [vmem:[#allocation2 + $0x28] sm:$0xff] %vm258_vm1, %v2319_v1 }
  0x2a   : > { %265 = vst.msk [vmem:[#allocation2 + $0x30] sm:$0xff] %vm258_vm1, %v2319_v1  ;;  %266 = vst.msk [vmem:[#allocation2 + $0x38] sm:$0xff] %vm258_vm1, %v2319_v1 }
  0x2b PF: > { %s1853_s27 = smul.u32 72, %s2292_s15  ;;  %v2421_v2 = vld [vmem:[%s2404_s10 + $0x40] sm:$0xff]  ;;  %vm287_vm2 = vcmask 64512   ;;  %v2434_v5 = vld [vmem:[%s2404_s10 + $0x50] sm:$0xff]  ;;  %p1990_p2 = scmp.ne.s32.totalorder %s2292_s15, 2 }
  0x2c   : > { %v275_v3 = vld [vmem:[%s2404_s10] sm:$0xff]  ;;  %2082 = vmatprep.mubr.msk.f32.mxu1 %vm287_vm2, %v2421_v2  ;;  %v276_v7 = vld [vmem:[%s2404_s10 + $0x10] sm:$0xff] }
  0x2d   : > { %2076 = vmatprep.mubr.msk.f32.mxu0 %vm287_vm2, %v275_v3  ;;  %s2430_s30 = scalar_lea.vmem %s2721_s1, %s1853_s27  ;;  %v2440_v9 = vld [vmem:[%s2404_s10 + $0x60] sm:$0xff]  ;;  %v2449_v11 = vld [vmem:[%s2404_s10 + $0x70] sm:$0xff] }
  0x2e   : > { %v286_v4 = vld [vmem:[%s2430_s30] sm:$0xff]  ;;  %v1863_v6 = vld [vmem:[%s2430_s30 + $0x8] sm:$0xff]  ;;  %v1873_v8 = vld [vmem:[%s2430_s30 + $0x10] sm:$0xff] }
  0x2f   : > { %2200 = vmatprep.subr.mxu1 %v286_v4  ;;  %2074 = vmatprep.subr.mxu0 %v286_v4  ;;  %v2445_v10 = vld [vmem:[%s2404_s10 + $0x20] sm:$0xff]  ;;  %v1891_v12 = vld [vmem:[%s2430_s30 + $0x18] sm:$0xff]  ;;  %v2455_v13 = vld [vmem:[%s2404_s10 + $0x30] sm:$0xff] }
  0x30   : > { %2201 = vmatpush3.msra.mxu1 %v286_v4  ;;  %2075 = vmatpush3.msra.mxu0 %v286_v4  ;;  %v425_v14 = vld [vmem:[%s2404_s10 + $0x1] sm:$0xff]  ;;  %v426_v17 = vld [vmem:[%s2404_s10 + $0x11] sm:$0xff] }
  0x31   : > { %2083 = vmatmul.mubr.msk.f32.vlgmr.msra.gmra.mxu1 %vm287_vm2, %v2434_v5  ;;  %2088 = vmatprep.subr.mxu1 %v1863_v6  ;;  %v574_v15 = vld [vmem:[%s2404_s10 + $0x2] sm:$0xff]  ;;  %v575_v18 = vld [vmem:[%s2404_s10 + $0x12] sm:$0xff] }
  0x32   : > { %2077 = vmatmul.mubr.msk.f32.vlgmr.msra.gmra.mxu0 %vm287_vm2, %v276_v7  ;;  %2089 = vmatpush3.msra.mxu1 %v1863_v6  ;;  %v1909_v16 = vld [vmem:[%s2430_s30 + $0x20] sm:$0xff]  ;;  %v1927_v21 = vld [vmem:[%s2430_s30 + $0x28] sm:$0xff]  ;;  %v2480_v22 = vld [vmem:[%s2404_s10 + $0x31] sm:$0xff] }
  0x33   : > { %2102 = vmatprep.subr.mxu0 %v1873_v8  ;;  %2085 = vmatprep.mubr.msk.f32.mxu1 %vm287_vm2, %v2440_v9  ;;  %v2471_v19 = vld [vmem:[%s2404_s10 + $0x21] sm:$0xff]  ;;  %v1945_v23 = vld [vmem:[%s2430_s30 + $0x30] sm:$0xff]  ;;  %v1963_v33 = vld [vmem:[%s2430_s30 + $0x38] sm:$0xff] }
  0x34   : > { %2103 = vmatpush3.msra.mxu0 %v1873_v8  ;;  %2079 = vmatprep.mubr.msk.f32.mxu0 %vm287_vm2, %v2445_v10  ;;  %v2475_v20 = vld [vmem:[%s2404_s10 + $0x22] sm:$0xff]  ;;  %v2486_v24 = vld [vmem:[%s2404_s10 + $0x32] sm:$0xff] }
  0x35   : > { %2086 = vmatmul.mubr.msk.f32.gmra.mxu1 %vm287_vm2, %v2449_v11  ;;  %2116 = vmatprep.subr.mxu1 %v1891_v12  ;;  %v2489_v25 = vld [vmem:[%s2404_s10 + $0x41] sm:$0xff]  ;;  %v2503_v27 = vld [vmem:[%s2404_s10 + $0x51] sm:$0xff] }
  0x36   : > { %2080 = vmatmul.mubr.msk.f32.gmra.mxu0 %vm287_vm2, %v2455_v13  ;;  %2090 = vmatprep.mubr.msk.f32.mxu1 %vm287_vm2, %v425_v14  ;;  %v2494_v26 = vld [vmem:[%s2404_s10 + $0x42] sm:$0xff]  ;;  %v579_v28 = vld [vmem:[%s2404_s10 + $0x52] sm:$0xff] }
  0x37   : > { %2104 = vmatprep.mubr.msk.f32.mxu0 %vm287_vm2, %v574_v15  ;;  %2130 = vmatprep.subr.mxu0 %v1909_v16  ;;  %v431_v29 = vld [vmem:[%s2404_s10 + $0x61] sm:$0xff]  ;;  %v432_v31 = vld [vmem:[%s2404_s10 + $0x71] sm:$0xff] }
  0x38   : > { %v580_v30 = vld [vmem:[%s2404_s10 + $0x62] sm:$0xff]  ;;  %v581_v32 = vld [vmem:[%s2404_s10 + $0x72] sm:$0xff] }
  0x39   : > { %2091 = vmatmul.mubr.msk.f32.vlgmr.msra.gmra.mxu1 %vm287_vm2, %v426_v17  ;;  %v1981_v34 = vld [vmem:[%s2430_s30 + $0x40] sm:$0xff]  ;;  %v1943_v38 = vld [vmem:[%s2404_s10 + $0x90] sm:$0xff] }
  0x3a   : > { %2105 = vmatmul.mubr.msk.f32.vlgmr.msra.gmra.mxu0 %vm287_vm2, %v575_v18  ;;  %2117 = vmatpush3.msra.mxu1 %v1891_v12  ;;  %v1889_v35 = vld [vmem:[%s2404_s10 + $0x80] sm:$0xff]  ;;  %v1961_v39 = vld [vmem:[%s2404_s10 + $0x91] sm:$0xff] }
  0x3b   : > { %2093 = vmatprep.mubr.msk.f32.mxu1 %vm287_vm2, %v2471_v19  ;;  %2131 = vmatpush3.msra.mxu0 %v1909_v16  ;;  %v1907_v36 = vld [vmem:[%s2404_s10 + $0x81] sm:$0xff]  ;;  %v1979_v40 = vld [vmem:[%s2404_s10 + $0x92] sm:$0xff] }
  0x3c   : > { %2107 = vmatprep.mubr.msk.f32.mxu0 %vm287_vm2, %v2475_v20  ;;  %2144 = vmatprep.subr.mxu1 %v1927_v21  ;;  %v1925_v37 = vld [vmem:[%s2404_s10 + $0x82] sm:$0xff] }
  0x3d   : > { %2094 = vmatmul.mubr.msk.f32.gmra.mxu1 %vm287_vm2, %v2480_v22  ;;  %2158 = vmatprep.subr.mxu0 %v1945_v23  ;;  %v267_v14 = vld [vmem:[#allocation2] sm:$0xff] }
  0x3e   : > { %2108 = vmatmul.mubr.msk.f32.gmra.mxu0 %vm287_vm2, %v2486_v24  ;;  %2096 = vmatprep.mubr.msk.f32.mxu1 %vm287_vm2, %v2489_v25 }
  0x3f   : > { %2110 = vmatprep.mubr.msk.f32.mxu0 %vm287_vm2, %v2494_v26 }
  0x41   : > { %2097 = vmatmul.mubr.msk.f32.gmra.mxu1 %vm287_vm2, %v2503_v27 }
  0x42   : > { %2111 = vmatmul.mubr.msk.f32.gmra.mxu0 %vm287_vm2, %v579_v28  ;;  %2099 = vmatprep.mubr.msk.f32.mxu1 %vm287_vm2, %v431_v29 }
  0x43   : > { %2113 = vmatprep.mubr.msk.f32.mxu0 %vm287_vm2, %v580_v30 }
  0x45   : > { %2100 = vmatmul.mubr.msk.f32.gmra.mxu1 %vm287_vm2, %v432_v31 }
  0x46   : > { %2114 = vmatmul.mubr.msk.f32.gmra.mxu0 %vm287_vm2, %v581_v32  ;;  %2118 = vmatprep.mubr.msk.f32.mxu1 %vm287_vm2, %v276_v7 }
  0x47   : > { %2132 = vmatprep.mubr.msk.f32.mxu0 %vm287_vm2, %v426_v17 }
  0x49   : > { %2119 = vmatmul.mubr.msk.f32.vlgmr.msra.gmra.mxu1 %vm287_vm2, %v2445_v10 }
  0x4a   : > { %2133 = vmatmul.mubr.msk.f32.vlgmr.msra.gmra.mxu0 %vm287_vm2, %v2471_v19  ;;  %2145 = vmatpush3.msra.mxu1 %v1927_v21 }
  0x4b   : > { %2121 = vmatprep.mubr.msk.f32.mxu1 %vm287_vm2, %v2455_v13  ;;  %2159 = vmatpush3.msra.mxu0 %v1945_v23  ;;  %v269_v23 = vld [vmem:[#allocation2 + $0x10] sm:$0xff] }
  0x4c   : > { %2135 = vmatprep.mubr.msk.f32.mxu0 %vm287_vm2, %v2480_v22  ;;  %2172 = vmatprep.subr.mxu1 %v1963_v33 }
  0x4d   : > { %2122 = vmatmul.mubr.msk.f32.gmra.mxu1 %vm287_vm2, %v2421_v2  ;;  %2186 = vmatprep.subr.mxu0 %v1981_v34 }
  0x4e   : > { %2136 = vmatmul.mubr.msk.f32.gmra.mxu0 %vm287_vm2, %v2489_v25  ;;  %2124 = vmatprep.mubr.msk.f32.mxu1 %vm287_vm2, %v2434_v5 }
  0x4f   : > { %2138 = vmatprep.mubr.msk.f32.mxu0 %vm287_vm2, %v2503_v27 }
  0x51   : > { %2125 = vmatmul.mubr.msk.f32.gmra.mxu1 %vm287_vm2, %v2440_v9 }
  0x52   : > { %2139 = vmatmul.mubr.msk.f32.gmra.mxu0 %vm287_vm2, %v431_v29  ;;  %2127 = vmatprep.mubr.msk.f32.mxu1 %vm287_vm2, %v2449_v11 }
  0x53   : > { %2141 = vmatprep.mubr.msk.f32.mxu0 %vm287_vm2, %v432_v31 }
  0x55   : > { %2128 = vmatmul.mubr.msk.f32.gmra.mxu1 %vm287_vm2, %v1889_v35 }
  0x56   : > { %2142 = vmatmul.mubr.msk.f32.gmra.mxu0 %vm287_vm2, %v1907_v36  ;;  %2146 = vmatprep.mubr.msk.f32.mxu1 %vm287_vm2, %v575_v18  ;;  %v270_v18 = vld [vmem:[#allocation2 + $0x18] sm:$0xff] }
  0x57   : > { %2160 = vmatprep.mubr.msk.f32.mxu0 %vm287_vm2, %v2445_v10 }
  0x59   : > { %2147 = vmatmul.mubr.msk.f32.vlgmr.msra.gmra.mxu1 %vm287_vm2, %v2475_v20 }
  0x5a   : > { %2161 = vmatmul.mubr.msk.f32.vlgmr.msra.gmra.mxu0 %vm287_vm2, %v2455_v13  ;;  %2173 = vmatpush3.msra.mxu1 %v1963_v33 }
  0x5b   : > { %2149 = vmatprep.mubr.msk.f32.mxu1 %vm287_vm2, %v2486_v24  ;;  %2187 = vmatpush3.msra.mxu0 %v1981_v34 }
  0x5c   : > { %2163 = vmatprep.mubr.msk.f32.mxu0 %vm287_vm2, %v2421_v2 }
  0x5d   : > { %2150 = vmatmul.mubr.msk.f32.gmra.mxu1 %vm287_vm2, %v2494_v26 }
  0x5e   : > { %2164 = vmatmul.mubr.msk.f32.gmra.mxu0 %vm287_vm2, %v2434_v5  ;;  %2152 = vmatprep.mubr.msk.f32.mxu1 %vm287_vm2, %v579_v28 }
  0x5f   : > { %2166 = vmatprep.mubr.msk.f32.mxu0 %vm287_vm2, %v2440_v9 }
  0x61   : > { %2153 = vmatmul.mubr.msk.f32.gmra.mxu1 %vm287_vm2, %v580_v30 }
  0x62   : > { %2167 = vmatmul.mubr.msk.f32.gmra.mxu0 %vm287_vm2, %v2449_v11  ;;  %2155 = vmatprep.mubr.msk.f32.mxu1 %vm287_vm2, %v581_v32  ;;  %v268_v11 = vld [vmem:[#allocation2 + $0x8] sm:$0xff] }
  0x63   : > { %2169 = vmatprep.mubr.msk.f32.mxu0 %vm287_vm2, %v1889_v35 }
  0x65   : > { %2156 = vmatmul.mubr.msk.f32.gmra.mxu1 %vm287_vm2, %v1925_v37 }
  0x66   : > { %2170 = vmatmul.mubr.msk.f32.gmra.mxu0 %vm287_vm2, %v1943_v38  ;;  %2174 = vmatprep.mubr.msk.f32.mxu1 %vm287_vm2, %v2471_v19 }
  0x67   : > { %2188 = vmatprep.mubr.msk.f32.mxu0 %vm287_vm2, %v2475_v20 }
  0x69   : > { %2175 = vmatmul.mubr.msk.f32.vlgmr.msra.gmra.mxu1 %vm287_vm2, %v2480_v22 }
  0x6a   : > { %2189 = vmatmul.mubr.msk.f32.vlgmr.msra.gmra.mxu0 %vm287_vm2, %v2486_v24  ;;  %2177 = vmatprep.mubr.msk.f32.mxu1 %vm287_vm2, %v2489_v25 }
  0x6b   : > { %2191 = vmatprep.mubr.msk.f32.mxu0 %vm287_vm2, %v2494_v26 }
  0x6d   : > { %2178 = vmatmul.mubr.msk.f32.gmra.mxu1 %vm287_vm2, %v2503_v27 }
  0x6e   : > { %2192 = vmatmul.mubr.msk.f32.gmra.mxu0 %vm287_vm2, %v579_v28  ;;  %2180 = vmatprep.mubr.msk.f32.mxu1 %vm287_vm2, %v431_v29  ;;  %v272_v28 = vld [vmem:[#allocation2 + $0x28] sm:$0xff] }
  0x6f   : > { %2194 = vmatprep.mubr.msk.f32.mxu0 %vm287_vm2, %v580_v30  ;;  %v271_v30 = vld [vmem:[#allocation2 + $0x20] sm:$0xff] }
  0x71   : > { %2181 = vmatmul.mubr.msk.f32.gmra.mxu1 %vm287_vm2, %v432_v31 }
  0x72   : > { %2195 = vmatmul.mubr.msk.f32.gmra.mxu0 %vm287_vm2, %v581_v32  ;;  %2183 = vmatprep.mubr.msk.f32.mxu1 %vm287_vm2, %v1907_v36 }
  0x73   : > { %2197 = vmatprep.mubr.msk.f32.mxu0 %vm287_vm2, %v1925_v37  ;;  %v274_v37 = vld [vmem:[#allocation2 + $0x38] sm:$0xff] }
  0x75   : > { %2184 = vmatmul.mubr.msk.f32.gmra.mxu1 %vm287_vm2, %v1961_v39 }
  0x76   : > { %2198 = vmatmul.mubr.msk.f32.gmra.mxu0 %vm287_vm2, %v1979_v40 }
  0xf1   : > { %v2084_v41 = vpop.f32.mrf.mxu1 }
  0xf2   : > { %v2078_v42 = vpop.f32.mrf.mxu0  ;;  %v422_v36 = vadd.f32 %v2084_v41, %v272_v28 }
  0xf3   : > { %v2601_v43 = vpop.f32.mrf.mxu1  ;;  %v418_v16 = vadd.f32 %v2078_v42, %v268_v11 }
  0xf4   : > { %v378_v44 = vpop.f32.mrf.mxu0 }
  0xf5   : > { %v2603_v45 = vpop.f32.mrf.mxu1  ;;  %v417_v20 = vadd.f32 %v378_v44, %v267_v14  ;;  %v421_v44 = vadd.f32 %v2601_v43, %v271_v30 }
  0xf6   : > { %v2081_v46 = vpop.f32.mrf.mxu0 }
  0xf7   : > { %v2605_v47 = vpop.f32.mrf.mxu1  ;;  %v420_v25 = vadd.f32 %v2081_v46, %v270_v18  ;;  %v273_v46 = vld [vmem:[#allocation2 + $0x30] sm:$0xff] }
  0xf8   : > { %v388_v48 = vpop.f32.mrf.mxu0 }
  0xf9   : > { %v2092_v49 = vpop.f32.mrf.mxu1  ;;  %v419_v31 = vadd.f32 %v388_v48, %v269_v23  ;;  %v424_v48 = vadd.f32 %v2603_v45, %v274_v37 }
  0xfa   : > { %v2106_v50 = vpop.f32.mrf.mxu0  ;;  %v567_v21 = vadd.f32 %v2092_v49, %v418_v16 }
  0xfb   : > { %v527_v51 = vpop.f32.mrf.mxu1 }
  0xfc   : > { %v676_v52 = vpop.f32.mrf.mxu0  ;;  %v566_v26 = vadd.f32 %v527_v51, %v417_v20  ;;  %v716_v32 = vadd.f32 %v2106_v50, %v567_v21 }
  0xfd   : > { %v2095_v53 = vpop.f32.mrf.mxu1 }
  0xfe   : > { %v2109_v54 = vpop.f32.mrf.mxu0  ;;  %v569_v33 = vadd.f32 %v2095_v53, %v420_v25  ;;  %v715_v38 = vadd.f32 %v676_v52, %v566_v26  ;;  %v423_v52 = vadd.f32 %v2605_v47, %v273_v46 }
  0xff   : > { %v537_v55 = vpop.f32.mrf.mxu1 }
 0x100   : > { %v686_v56 = vpop.f32.mrf.mxu0  ;;  %v568_v39 = vadd.f32 %v537_v55, %v419_v31  ;;  %v718_v51 = vadd.f32 %v2109_v54, %v569_v33 }
 0x101   : > { %v2098_v57 = vpop.f32.mrf.mxu1 }
 0x102   : > { %v2607_v58 = vpop.f32.mrf.mxu0  ;;  %v571_v11 = vadd.f32 %v2098_v57, %v422_v36  ;;  %v717_v18 = vadd.f32 %v686_v56, %v568_v39 }
 0x103   : > { %v547_v59 = vpop.f32.mrf.mxu1 }
 0x104   : > { %v2609_v60 = vpop.f32.mrf.mxu0  ;;  %v570_v50 = vadd.f32 %v547_v59, %v421_v44  ;;  %v720_v43 = vadd.f32 %v2607_v58, %v571_v11 }
 0x105   : > { %v2101_v61 = vpop.f32.mrf.mxu1 }
 0x106   : > { %v2611_v62 = vpop.f32.mrf.mxu0  ;;  %v573_v55 = vadd.f32 %v2101_v61, %v424_v48 }
 0x107   : > { %v2613_v63 = vpop.f32.mrf.mxu1 }
 0x108   : > { %v2615_v0 = vpop.f32.mrf.mxu0  ;;  %v572_v45 = vadd.f32 %v2613_v63, %v423_v52  ;;  %v722_v28 = vadd.f32 %v2611_v62, %v573_v55 }
 0x109   : > { %v2120_v1 = vpop.f32.mrf.mxu1 }
 0x10a   : > { %v2134_v2 = vpop.f32.mrf.mxu0  ;;  %v866_v40 = vadd.f32 %v2120_v1, %v716_v32 }
 0x10b   : > { %v826_v3 = vpop.f32.mrf.mxu1 }
 0x10c   : > { %v975_v4 = vpop.f32.mrf.mxu0  ;;  %v865_v14 = vadd.f32 %v826_v3, %v715_v38  ;;  %v1015_v20 = vadd.f32 %v2134_v2, %v866_v40  ;;  %v719_v3 = vadd.f32 %v2609_v60, %v570_v50 }
 0x10d   : > { %v2123_v5 = vpop.f32.mrf.mxu1 }
 0x10e   : > { %v2137_v6 = vpop.f32.mrf.mxu0  ;;  %v868_v41 = vadd.f32 %v2123_v5, %v718_v51  ;;  %v1014_v23 = vadd.f32 %v975_v4, %v865_v14 }
 0x10f   : > { %v836_v7 = vpop.f32.mrf.mxu1 }
 0x110   : > { %v2617_v8 = vpop.f32.mrf.mxu0  ;;  %v867_v25 = vadd.f32 %v836_v7, %v717_v18  ;;  %v1017_v26 = vadd.f32 %v2137_v6, %v868_v41 }
 0x111   : > { %v2126_v9 = vpop.f32.mrf.mxu1 }
 0x112   : > { %v2619_v10 = vpop.f32.mrf.mxu0  ;;  %v870_v56 = vadd.f32 %v2126_v9, %v720_v43  ;;  %v1016_v30 = vadd.f32 %v2617_v8, %v867_v25 }
 0x113   : > { %v846_v12 = vpop.f32.mrf.mxu1 }
 0x114   : > { %v2621_v13 = vpop.f32.mrf.mxu0  ;;  %v869_v47 = vadd.f32 %v846_v12, %v719_v3  ;;  %v1019_v63 = vadd.f32 %v2619_v10, %v870_v56 }
 0x115   : > { %v2623_v15 = vpop.f32.mrf.mxu1 }
 0x116   : > { %v2625_v17 = vpop.f32.mrf.mxu0  ;;  %v872_v60 = vadd.f32 %v2623_v15, %v722_v28  ;;  %v1018_v62 = vadd.f32 %v2621_v13, %v869_v47 }
 0x117   : > { %v2627_v19 = vpop.f32.mrf.mxu1 }
 0x118   : > { %v2629_v22 = vpop.f32.mrf.mxu0 }
 0x119   : > { %v2148_v24 = vpop.f32.mrf.mxu1 }
 0x11a   : > { %v2162_v27 = vpop.f32.mrf.mxu0  ;;  %v1164_v54 = vadd.f32 %v2148_v24, %v1015_v20  ;;  %v721_v24 = vadd.f32 %v2615_v0, %v572_v45  ;;  %v1021_v0 = vadd.f32 %v2625_v17, %v872_v60 }
 0x11b   : > { %v1124_v29 = vpop.f32.mrf.mxu1 }
 0x11c   : > { %v1274_v34 = vpop.f32.mrf.mxu0  ;;  %v1163_v2 = vadd.f32 %v1124_v29, %v1014_v23  ;;  %v1314_v58 = vadd.f32 %v2162_v27, %v1164_v54  ;;  %v871_v12 = vadd.f32 %v2627_v19, %v721_v24 }
 0x11d   : > { %v2151_v35 = vpop.f32.mrf.mxu1 }
 0x11e   : > { %v2165_v42 = vpop.f32.mrf.mxu0  ;;  %v1166_v4 = vadd.f32 %v2151_v35, %v1017_v26  ;;  %v1313_v6 = vadd.f32 %v1274_v34, %v1163_v2  ;;  %v1020_v13 = vadd.f32 %v2629_v22, %v871_v12 }
 0x11f   : > { %v1134_v49 = vpop.f32.mrf.mxu1 }
 0x120   : > { %v1284_v16 = vpop.f32.mrf.mxu0  ;;  %v1165_v9 = vadd.f32 %v1134_v49, %v1016_v30  ;;  %v1316_v8 = vadd.f32 %v2165_v42, %v1166_v4 }
 0x121   : > { %v2154_v53 = vpop.f32.mrf.mxu1 }
 0x122   : > { %v2168_v21 = vpop.f32.mrf.mxu0  ;;  %v1168_v27 = vadd.f32 %v2154_v53, %v1019_v63  ;;  %v1315_v38 = vadd.f32 %v1284_v16, %v1165_v9 }
 0x123   : > { %v1144_v1 = vpop.f32.mrf.mxu1 }
 0x124   : > { %v1294_v57 = vpop.f32.mrf.mxu0  ;;  %v1167_v39 = vadd.f32 %v1144_v1, %v1018_v62  ;;  %v1318_v19 = vadd.f32 %v2168_v21, %v1168_v27 }
 0x125   : > { %v2157_v59 = vpop.f32.mrf.mxu1 }
 0x126   : > { %v2171_v5 = vpop.f32.mrf.mxu0  ;;  %v1170_v49 = vadd.f32 %v2157_v59, %v1021_v0  ;;  %v1317_v17 = vadd.f32 %v1294_v57, %v1167_v39 }
 0x127   : > { %v1154_v61 = vpop.f32.mrf.mxu1 }
 0x128   : > { %v1304_v7 = vpop.f32.mrf.mxu0  ;;  %v1169_v14 = vadd.f32 %v1154_v61, %v1020_v13  ;;  %v1320_v18 = vadd.f32 %v2171_v5, %v1170_v49 }
 0x129   : > { %v2176_v31 = vpop.f32.mrf.mxu1 }
 0x12a   : > { %v1463_v29 = vadd.f32 %v2176_v31, %v1314_v58  ;;  %v2190_v32 = vpop.f32.mrf.mxu0  ;;  %v1319_v52 = vadd.f32 %v1304_v7, %v1169_v14 }
 0x12b   : > { %v1423_v33 = vpop.f32.mrf.mxu1 }
 0x12c   : > { %v1612_v35 = vadd.f32 %v2190_v32, %v1463_v29  ;;  %v1462_v36 = vadd.f32 %v1423_v33, %v1313_v6  ;;  %v1572_v37 = vpop.f32.mrf.mxu0 }
 0x12d   : > { %v2179_v15 = vpop.f32.mrf.mxu1 }
 0x12e   : > { %1620 = vst.msk [vmem:[#allocation2 + $0x8] sm:$0xff] %vm287_vm2, %v1612_v35  ;;  %v1611_v10 = vadd.f32 %v1572_v37, %v1462_v36  ;;  %v1465_v34 = vadd.f32 %v2179_v15, %v1316_v8  ;;  %v2193_v40 = vpop.f32.mrf.mxu0 }
 0x12f   : > { %v1433_v44 = vpop.f32.mrf.mxu1 }
 0x130   : > { %1619 = vst.msk [vmem:[#allocation2] sm:$0xff] %vm287_vm2, %v1611_v10  ;;  %v1614_v42 = vadd.f32 %v2193_v40, %v1465_v34  ;;  %v1464_v46 = vadd.f32 %v1433_v44, %v1315_v38  ;;  %v1582_v51 = vpop.f32.mrf.mxu0 }
 0x131   : > { %v2182_v11 = vpop.f32.mrf.mxu1 }
 0x132   : > { %1622 = vst.msk [vmem:[#allocation2 + $0x18] sm:$0xff] %vm287_vm2, %v1614_v42  ;;  %v1613_v16 = vadd.f32 %v1582_v51, %v1464_v46  ;;  %v1467_v48 = vadd.f32 %v2182_v11, %v1318_v19  ;;  %v2196_v50 = vpop.f32.mrf.mxu0 }
 0x133   : > { %v1443_v53 = vpop.f32.mrf.mxu1 }
 0x134   : > { %1621 = vst.msk [vmem:[#allocation2 + $0x10] sm:$0xff] %vm287_vm2, %v1613_v16  ;;  %v1616_v22 = vadd.f32 %v2196_v50, %v1467_v48  ;;  %v1466_v20 = vadd.f32 %v1443_v53, %v1317_v17  ;;  %v1592_v41 = vpop.f32.mrf.mxu0 }
 0x135   : > { %v2185_v21 = vpop.f32.mrf.mxu1 }
 0x136   : > { %1624 = vst.msk [vmem:[#allocation2 + $0x28] sm:$0xff] %vm287_vm2, %v1616_v22  ;;  %v1615_v55 = vadd.f32 %v1592_v41, %v1466_v20  ;;  %v1469_v1 = vadd.f32 %v2185_v21, %v1320_v18  ;;  %v2199_v43 = vpop.f32.mrf.mxu0 }
 0x137   : > { %v1453_v23 = vpop.f32.mrf.mxu1 }
 0x138   : > { %1623 = vst.msk [vmem:[#allocation2 + $0x20] sm:$0xff] %vm287_vm2, %v1615_v55  ;;  %v1618_v25 = vadd.f32 %v2199_v43, %v1469_v1  ;;  %v1468_v54 = vadd.f32 %v1453_v23, %v1319_v52  ;;  %v1602_v57 = vpop.f32.mrf.mxu0  ;;  %1630 = sbr.rel (%p1990_p2) target bundleno = 350 (0x15e), region = 40 }
 0x13a   : > { %1626 = vst.msk [vmem:[#allocation2 + $0x38] sm:$0xff] %vm287_vm2, %v1618_v25  ;;  %v1617_v3 = vadd.f32 %v1602_v57, %v1468_v54 }
 0x13c   : > { %1625 = vst.msk [vmem:[#allocation2 + $0x30] sm:$0xff] %vm287_vm2, %v1617_v3 }
 0x13d   : > { %1631 = vst.msk [vmem:[%s2409_s24] sm:$0xff] %vm287_vm2, %v1611_v10  ;;  %1632 = vst.msk [vmem:[%s2409_s24 + $0x8] sm:$0xff] %vm287_vm2, %v1612_v35  ;;  %v1640_v45 = vsel %vm287_vm2, %v1611_v10, 0.0  ;;  %v1641_v59 = vsel %vm287_vm2, %v1612_v35, 0.0  ;;  %v1643_v26 = vsel %vm287_vm2, %v1613_v16, 0.0  ;;  %v1645_v2 = vsel %vm287_vm2, %v1614_v42, 0.0 }
 0x13e   : > { %1633 = vst.msk [vmem:[%s2409_s24 + $0x10] sm:$0xff] %vm287_vm2, %v1613_v16  ;;  %1634 = vst.msk [vmem:[%s2409_s24 + $0x18] sm:$0xff] %vm287_vm2, %v1614_v42  ;;  %v1642_v56 = vadd.f32 %v1641_v59, %v1640_v45  ;;  %v1665_v5 = vmul.f32 %v1611_v10, %v1611_v10  ;;  %v1666_v28 = vmul.f32 %v1612_v35, %v1612_v35  ;;  %v1647_v58 = vsel %vm287_vm2, %v1615_v55, 0.0  ;;  %v1639_v14 = vld [vmem:[%s2723_s3] sm:$0x1] }
 0x13f   : > { %1635 = vst.msk [vmem:[%s2409_s24 + $0x20] sm:$0xff] %vm287_vm2, %v1615_v55  ;;  %1636 = vst.msk [vmem:[%s2409_s24 + $0x28] sm:$0xff] %vm287_vm2, %v1616_v22  ;;  %v1667_v61 = vmul.f32 %v1613_v16, %v1613_v16  ;;  %v1668_v30 = vmul.f32 %v1614_v42, %v1614_v42  ;;  %v1669_v24 = vmul.f32 %v1615_v55, %v1615_v55  ;;  %v1649_v63 = vsel %vm287_vm2, %v1616_v22, 0.0 }
 0x140   : > { %1637 = vst.msk [vmem:[%s2409_s24 + $0x30] sm:$0xff] %vm287_vm2, %v1617_v3  ;;  %1638 = vst.msk [vmem:[%s2409_s24 + $0x38] sm:$0xff] %vm287_vm2, %v1618_v25  ;;  %v1644_v47 = vadd.f32 %v1643_v26, %v1642_v56  ;;  %v1673_v4 = vsel %vm287_vm2, %v1665_v5, 0.0  ;;  %v1674_v60 = vsel %vm287_vm2, %v1666_v28, 0.0  ;;  %v1670_v29 = vmul.f32 %v1616_v22, %v1616_v22  ;;  %v1664_v22 = vld [vmem:[%s2724_s4] sm:$0x1] }
 0x141   : > { %v1676_v31 = vsel %vm287_vm2, %v1667_v61, 0.0  ;;  %v1675_v6 = vadd.f32 %v1674_v60, %v1673_v4  ;;  %v1678_v32 = vsel %vm287_vm2, %v1668_v30, 0.0  ;;  %v1651_v62 = vsel %vm287_vm2, %v1617_v3, 0.0 }
 0x142   : > { %v1646_v7 = vadd.f32 %v1645_v2, %v1644_v47  ;;  %v1671_v8 = vmul.f32 %v1617_v3, %v1617_v3  ;;  %v1680_v27 = vsel %vm287_vm2, %v1669_v24, 0.0  ;;  %v1653_v35 = vsel %vm287_vm2, %v1618_v25, 0.0 }
 0x143   : > { %v1677_v12 = vadd.f32 %v1676_v31, %v1675_v6  ;;  %v1672_v0 = vmul.f32 %v1618_v25, %v1618_v25  ;;  %v1682_v15 = vsel %vm287_vm2, %v1670_v29, 0.0  ;;  %vm1662_vm3 = vcmask 57344  }
 0x144   : > { %v1648_v9 = vadd.f32 %v1647_v58, %v1646_v7  ;;  %v1684_v10 = vsel %vm287_vm2, %v1671_v8, 0.0 }
 0x145   : > { %v1679_v36 = vadd.f32 %v1678_v32, %v1677_v12  ;;  %v1686_v13 = vsel %vm287_vm2, %v1672_v0, 0.0 }
 0x146   : > { %v1650_v33 = vadd.f32 %v1649_v63, %v1648_v9 }
 0x147   : > { %v1681_v38 = vadd.f32 %v1680_v27, %v1679_v36 }
 0x148   : > { %v1652_v37 = vadd.f32 %v1651_v62, %v1650_v33 }
 0x149   : > { %v1683_v34 = vadd.f32 %v1682_v15, %v1681_v38 }
 0x14a   : > { %v1654_v39 = vadd.f32 %v1653_v35, %v1652_v37 }
 0x14b   : > { %v1685_v44 = vadd.f32 %v1684_v10, %v1683_v34 }
 0x14c   : > { %v1655_v40 = vrot.slane %v1654_v39, 4 }
 0x14d   : > { %v1687_v49 = vadd.f32 %v1686_v13, %v1685_v44 }
 0x14e   : > { %v1656_v19 = vadd.f32 %v1655_v40, %v1654_v39 }
 0x14f   : > { %v1688_v46 = vrot.slane %v1687_v49, 4 }
 0x150   : > { %v1657_v42 = vrot.slane %v1656_v19, 2 }
 0x151   : > { %v1689_v11 = vadd.f32 %v1688_v46, %v1687_v49 }
 0x152   : > { %v1658_v51 = vadd.f32 %v1657_v42, %v1656_v19 }
 0x153   : > { %v1690_v16 = vrot.slane %v1689_v11, 2 }
 0x154   : > { %v1659_v17 = vrot.slane %v1658_v51, 1 }
 0x155   : > { %v1691_v50 = vadd.f32 %v1690_v16, %v1689_v11 }
 0x156   : > { %v1660_v48 = vadd.f32 %v1659_v17, %v1658_v51 }
 0x157   : > { %v1692_v18 = vrot.slane %v1691_v50, 1 }
 0x158   : > { %v1661_v53 = vadd.f32 %v1660_v48, %v1639_v14 }
 0x159   : > { %v1693_v20 = vadd.f32 %v1692_v18, %v1691_v50 }
 0x15a   : > { %1663 = vst.msk [vmem:[%s2723_s3] sm:$0x1] %vm1662_vm3, %v1661_v53 }
 0x15b   : > { %v1694_v41 = vadd.f32 %v1693_v20, %v1664_v22 }
 0x15d   : > { %1695 = vst.msk [vmem:[%s2724_s4] sm:$0x1] %vm1662_vm3, %v1694_v41 }
 0x15e PF: > { %s15_s21 = sadd.s32 1, %s2316_s21   ;;  %s2726_s11 = sld [smem:[#allocation3_spill]] }
 0x15f   : > { %p12_p3 = scmp.ge.s32.totalorder %s15_s21, 50   ;;  %s2727_s15 = smov %s2304_s18 }
 0x160   : > { %s2728_s16 = smov %s2308_s19  ;;  %s2729_s17 = smov %s2312_s20 }
 0x161   : > { %s2730_s18 = smov %s2734_s22  ;;  %s2731_s19 = smov %s2738_s23 }
 0x162   :  { %14 = sbr.rel (!%p12_p3) target bundleno = 4 (0x4), region = 97 }
 0x164   : > { %s2732_s20 = smov %s2726_s11 }

</bundles_post_ra>
